<compile_context>
chip_gen: v7x
topology: tpu7x:2x2x1
jax: 0.10.0
libtpu: 0.0.40
codegen_flags: <defaults>
</compile_context>

<pallas_src>
import functools

import jax
import jax.numpy as jnp
import numpy as np
from jax.experimental import pallas as pl
from jax.experimental.pallas import tpu as pltpu


def _ceil_to(v, m):
    return ((v + m - 1) // m) * m


def t1net_kernel(x_ref, wih_ref, whh_ref, b_ref, h0_ref, c0_ref,
                 fc1w_ref, fc1b_ref, fc2w_ref, fc2b_ref,
                 out_ref, hn_ref, cn_ref,
                 buf_a, buf_b, xw_ref,
                 *, num_layers, seq_len, hidden, nbp, pack):
    L, T, H, P = num_layers, seq_len, hidden, pack
    bufs = [buf_a, buf_b]

    # Hoisted lane masks: forward half = lanes [0,H), backward half = lanes [H,2H)
    # of each P-wide packed block.  Built once (JAX does not CSE broadcast_in_dim).
    lane4 = jax.lax.broadcasted_iota(jnp.int32, (nbp, 4 * P), 1)
    sel_fwd4 = (lane4 % P) < H
    laneP = jax.lax.broadcasted_iota(jnp.int32, (nbp, P), 1)
    m_fwd = laneP < H
    m_bwd = jnp.logical_and(laneP >= H, laneP < 2 * H)

    # Zero the layer-output scratch once so padding lanes stay exactly 0 (they only
    # ever multiply zero weight rows, but must never be NaN garbage).
    buf_a[...] = jnp.zeros_like(buf_a)
    buf_b[...] = jnp.zeros_like(buf_b)

    for l in range(L):
        in_bf = (x_ref[...] if l == 0 else bufs[(l + 1) % 2][...]).astype(jnp.bfloat16)
        out_buf = bufs[l % 2]
        whh = whh_ref[l]                       # (P, 4P) bf16, block-diagonal per direction

        # Hoisted input GEMM + bias for BOTH directions and ALL timesteps of layer l.
        # Only h @ W_hh remains on the serial critical path.
        xw_ref[...] = jnp.dot(in_bf, wih_ref[l],
                              preferred_element_type=jnp.float32) + b_ref[l]

        def step(t, carry, out_buf=out_buf, whh=whh):
            # Fused fwd+bwd recurrence: lanes [0,H) carry the forward direction (time t),
            # lanes [H,2H) the backward direction (time T-1-t).
            h, c = carry                        # (nbp, P) f32
            row_f = pl.multiple_of(t * nbp, nbp)
            row_b = pl.multiple_of((T - 1 - t) * nbp, nbp)
            xw_f = xw_ref[pl.ds(row_f, nbp), :]
            xw_b = xw_ref[pl.ds(row_b, nbp), :]
            gates = (jnp.where(sel_fwd4, xw_f, xw_b)
                     + jnp.dot(h.astype(jnp.bfloat16), whh,
                               preferred_element_type=jnp.float32))   # (nbp, 4P) f32
            i_g = jax.nn.sigmoid(gates[:, 0 * P:1 * P])
            f_g = jax.nn.sigmoid(gates[:, 1 * P:2 * P])
            g_g = jnp.tanh(gates[:, 2 * P:3 * P])
            o_g = jax.nn.sigmoid(gates[:, 3 * P:4 * P])
            c = f_g * c + i_g * g_g
            h = o_g * jnp.tanh(c)
            # Scatter: forward half -> row t, backward half -> row T-1-t, as dense
            # (8,128) read-modify-write blends (no masked vst, lane-tile aligned).
            cur_f = out_buf[pl.ds(row_f, nbp), :]
            out_buf[pl.ds(row_f, nbp), :] = jnp.where(m_fwd, h, cur_f)
            cur_b = out_buf[pl.ds(row_b, nbp), :]
            out_buf[pl.ds(row_b, nbp), :] = jnp.where(m_bwd, h, cur_b)
            return (h, c)

        h_fin, c_fin = jax.lax.fori_loop(
            0, T, step, (h0_ref[l], c0_ref[l]),
            unroll=(True if T <= 8 else 4))
        hn_ref[l] = h_fin
        cn_ref[l] = c_fin

    # fc1 as a K-chunked accumulation over timesteps of the last layer's output
    # (no flatten copy; same structure needed to stream fc1_w for large T).
    last = bufs[(L - 1) % 2]
    y1 = fc1b_ref[...]                                             # (1, F1p) f32
    for t in range(T):
        chunk = last[t * nbp:(t + 1) * nbp, :].astype(jnp.bfloat16)  # (nbp, P)
        y1 = y1 + jnp.dot(chunk, fc1w_ref[t], preferred_element_type=jnp.float32)
    y2 = jnp.dot(y1.astype(jnp.bfloat16), fc2w_ref[...],
                 preferred_element_type=jnp.float32) + fc2b_ref[...]
    out_ref[...] = y2


def pack_params(params, *, input_size, hidden, num_layers, seq_len, output_dim):
    """Pad + reorder the logical (PyTorch-layout) params into the lane-packed kernel layout."""
    H, L, T = hidden, num_layers, seq_len
    P = _ceil_to(2 * H, 128)                   # both directions packed into one lane block
    F = 2 * T * H
    F1p = _ceil_to(F, 128)
    ODp = _ceil_to(output_dim, 128)
    assert input_size <= P

    wih_p = np.zeros((L, P, 4 * P), np.float32)
    whh_p = np.zeros((L, P, 4 * P), np.float32)
    b_p = np.zeros((L, 1, 4 * P), np.float32)
    for l in range(L):
        for d in range(2):                     # 0 = forward, 1 = backward
            idx = 2 * l + d
            wih = np.asarray(params["w_ih"][idx]).T        # (in_dim, 4H)
            whh = np.asarray(params["w_hh"][idx]).T        # (H, 4H)
            bias = np.asarray(params["b_ih"][idx]) + np.asarray(params["b_hh"][idx])
            in_dim = wih.shape[0]              # input_size (l=0) or 2H (l>0, = [h_f|h_b])
            for g in range(4):                 # i, f, g, o gate blocks, each P lanes wide
                col = slice(g * P + d * H, g * P + (d + 1) * H)
                src = slice(g * H, (g + 1) * H)
                wih_p[l, :in_dim, col] = wih[:, src]
                whh_p[l, d * H:(d + 1) * H, col] = whh[:, src]   # block-diagonal
                b_p[l, 0, col] = bias[src]

    fc1_w = np.asarray(params["fc1_w"])                    # (F, F)
    fc1w_p = np.zeros((T, P, F1p), np.float32)             # per-timestep K-chunks
    for t in range(T):
        fc1w_p[t, :2 * H, :F] = fc1_w[:, t * 2 * H:(t + 1) * 2 * H].T
    fc1b_p = np.zeros((1, F1p), np.float32)
    fc1b_p[0, :F] = np.asarray(params["fc1_b"])
    fc2w_p = np.zeros((F1p, ODp), np.float32)
    fc2w_p[:F, :output_dim] = np.asarray(params["fc2_w"]).T
    fc2b_p = np.zeros((1, ODp), np.float32)
    fc2b_p[0, :output_dim] = np.asarray(params["fc2_b"])

    h0 = np.asarray(params["h0"])
    c0 = np.asarray(params["c0"])
    h0_p = np.zeros((L, 1, P), np.float32)
    c0_p = np.zeros((L, 1, P), np.float32)
    for l in range(L):
        for d in range(2):
            h0_p[l, 0, d * H:(d + 1) * H] = h0[2 * l + d, 0]
            c0_p[l, 0, d * H:(d + 1) * H] = c0[2 * l + d, 0]

    return dict(
        w_ih=jnp.asarray(wih_p, jnp.bfloat16),
        w_hh=jnp.asarray(whh_p, jnp.bfloat16),
        b=jnp.asarray(b_p, jnp.float32),
        fc1_w=jnp.asarray(fc1w_p, jnp.bfloat16),
        fc1_b=jnp.asarray(fc1b_p, jnp.float32),
        fc2_w=jnp.asarray(fc2w_p, jnp.bfloat16),
        fc2_b=jnp.asarray(fc2b_p, jnp.float32),
        h0=jnp.asarray(h0_p, jnp.float32),
        c0=jnp.asarray(c0_p, jnp.float32),
    )


def t1net_forward(x, packed, *, input_size, hidden, num_layers, seq_len, output_dim):
    nb, nt, ch = x.shape
    assert nt == seq_len and ch == input_size
    H, L, T = hidden, num_layers, seq_len
    P = _ceil_to(2 * H, 128)
    ODp = _ceil_to(output_dim, 128)
    F1p = _ceil_to(2 * T * H, 128)
    nbp = _ceil_to(nb, 8)
    assert ch <= P

    # time-major, batch/channel-padded input, bf16 for the MXU: row t*nbp + b
    xt = jnp.transpose(x, (1, 0, 2))                               # (T, nb, ch)
    xt = jnp.pad(xt, ((0, 0), (0, nbp - nb), (0, P - ch)))
    xp = xt.reshape(T * nbp, P).astype(jnp.bfloat16)

    h0p = jnp.broadcast_to(packed["h0"], (L, nbp, P))
    c0p = jnp.broadcast_to(packed["c0"], (L, nbp, P))

    kernel = functools.partial(t1net_kernel, num_layers=L, seq_len=T,
                               hidden=H, nbp=nbp, pack=P)
    vmem = pl.BlockSpec(memory_space=pltpu.MemorySpace.VMEM)
    out_shapes = (
        jax.ShapeDtypeStruct((nbp, ODp), jnp.float32),
        jax.ShapeDtypeStruct((L, nbp, P), jnp.float32),
        jax.ShapeDtypeStruct((L, nbp, P), jnp.float32),
    )
    scratch = [
        pltpu.VMEM((T * nbp, P), jnp.float32),        # layer ping buffer
        pltpu.VMEM((T * nbp, P), jnp.float32),        # layer pong buffer
        pltpu.VMEM((T * nbp, 4 * P), jnp.float32),    # hoisted x @ W_ih (+bias), both dirs
    ]

    def _sz(shape, itemsize):
        return int(np.prod(shape)) * itemsize
    total_bytes = (
        _sz((T * nbp, P), 2) + 2 * _sz((L, P, 4 * P), 2) + _sz((L, 1, 4 * P), 4)
        + 2 * _sz((L, nbp, P), 4) + _sz((T, P, F1p), 2) + _sz((1, F1p), 4)
        + _sz((F1p, ODp), 2) + _sz((1, ODp), 4) + _sz((nbp, ODp), 4)
        + 2 * _sz((L, nbp, P), 4) + 2 * _sz((T * nbp, P), 4) + _sz((T * nbp, 4 * P), 4))
    vmem_limit = min(int(total_bytes) + (16 << 20), 120 << 20)

    out, hn, cn = pl.pallas_call(
        kernel,
        out_shape=out_shapes,
        in_specs=[vmem] * 10,
        out_specs=(vmem, vmem, vmem),
        scratch_shapes=scratch,
        compiler_params=pltpu.CompilerParams(vmem_limit_bytes=vmem_limit),
    )(xp, packed["w_ih"], packed["w_hh"], packed["b"], h0p, c0p,
      packed["fc1_w"], packed["fc1_b"], packed["fc2_w"], packed["fc2_b"])

    out = out[:nb, :output_dim].reshape(nb, output_dim, 1)
    hn_s = hn[:, :nb, :2 * H].reshape(L, nb, 2, H).transpose(0, 2, 1, 3).reshape(2 * L, nb, H)
    cn_s = cn[:, :nb, :2 * H].reshape(L, nb, 2, H).transpose(0, 2, 1, 3).reshape(2 * L, nb, H)
    return out, (hn_s, cn_s)


def init_params(key, input_size, hidden, num_layers, seq_len, output_dim):
    H, L, T = hidden, num_layers, seq_len
    k = 1.0 / np.sqrt(H)
    keys = jax.random.split(key, 4 * 2 * L + 4)

    def u(kk, shape, lim, bf16_round=False):
        w = jax.random.uniform(kk, shape, jnp.float32, -lim, lim)
        if bf16_round:   # matmul weights are consumed in bf16 by the kernel
            w = w.astype(jnp.bfloat16).astype(jnp.float32)
        return w

    w_ih, w_hh, b_ih, b_hh = [], [], [], []
    ki = 0
    for l in range(L):
        in_dim = input_size if l == 0 else 2 * H
        for _d in range(2):
            w_ih.append(u(keys[ki + 0], (4 * H, in_dim), k, True))
            w_hh.append(u(keys[ki + 1], (4 * H, H), k, True))
            b_ih.append(u(keys[ki + 2], (4 * H,), k))
            b_hh.append(u(keys[ki + 3], (4 * H,), k))
            ki += 4

    F = 2 * T * H
    kf = 1.0 / np.sqrt(F)
    fc1_w = u(keys[ki + 0], (F, F), kf, True)
    fc1_b = u(keys[ki + 1], (F,), kf)
    fc2_w = u(keys[ki + 2], (output_dim, F), kf, True)
    fc2_b = u(keys[ki + 3], (output_dim,), kf)

    h0 = jnp.zeros((2 * L, 1, H), jnp.float32)   # zero-initialized nn.Parameters
    c0 = jnp.zeros((2 * L, 1, H), jnp.float32)
    return dict(w_ih=w_ih, w_hh=w_hh, b_ih=b_ih, b_hh=b_hh,
                fc1_w=fc1_w, fc1_b=fc1_b, fc2_w=fc2_w, fc2_b=fc2_b, h0=h0, c0=c0)


def t1net_reference(x, params, *, hidden, num_layers, seq_len, output_dim):
    """Plain-JAX (f32) reference with identical semantics to the PyTorch module."""
    nb, nt, _ = x.shape
    H, L, T = hidden, num_layers, seq_len
    h0 = jnp.broadcast_to(params["h0"], (2 * L, nb, H))
    c0 = jnp.broadcast_to(params["c0"], (2 * L, nb, H))
    xs = [x[:, t, :] for t in range(T)]
    hn = [None] * (2 * L)
    cn = [None] * (2 * L)
    for l in range(L):
        dir_outs = []
        for d in range(2):
            idx = 2 * l + d
            wih, whh = params["w_ih"][idx], params["w_hh"][idx]
            b = params["b_ih"][idx] + params["b_hh"][idx]
            h, c = h0[idx], c0[idx]
            order = range(T) if d == 0 else range(T - 1, -1, -1)
            outs = [None] * T
            for t in order:
                gates = xs[t] @ wih.T + h @ whh.T + b
                i_g = jax.nn.sigmoid(gates[:, :H])
                f_g = jax.nn.sigmoid(gates[:, H:2 * H])
                g_g = jnp.tanh(gates[:, 2 * H:3 * H])
                o_g = jax.nn.sigmoid(gates[:, 3 * H:])
                c = f_g * c + i_g * g_g
                h = o_g * jnp.tanh(c)
                outs[t] = h
            hn[idx], cn[idx] = h, c
            dir_outs.append(outs)
        xs = [jnp.concatenate([dir_outs[0][t], dir_outs[1][t]], axis=-1)
              for t in range(T)]
    flat = jnp.concatenate(xs, axis=-1)            # == reshape((nb, T*2H))
    y = flat @ params["fc1_w"].T + params["fc1_b"]
    y = y @ params["fc2_w"].T + params["fc2_b"]
    return y.reshape(nb, output_dim, 1), (jnp.stack(hn), jnp.stack(cn))


if __name__ == "__main__":
    # small but structurally faithful config (module defaults: hidden=64, seq_len=3)
    INPUT_SIZE, HIDDEN, NUM_LAYERS, SEQ_LEN, OUTPUT_DIM, BATCH = 2, 64, 3, 3, 3, 2

    key = jax.random.PRNGKey(0)
    kx, kp = jax.random.split(key)
    x = jax.random.normal(kx, (BATCH, SEQ_LEN, INPUT_SIZE), jnp.float32)
    x = x.astype(jnp.bfloat16).astype(jnp.float32)   # kernel feeds the MXU in bf16

    params = init_params(kp, INPUT_SIZE, HIDDEN, NUM_LAYERS, SEQ_LEN, OUTPUT_DIM)
    packed = pack_params(params, input_size=INPUT_SIZE, hidden=HIDDEN,
                         num_layers=NUM_LAYERS, seq_len=SEQ_LEN, output_dim=OUTPUT_DIM)

    out, (hn, cn) = t1net_forward(
        x, packed, input_size=INPUT_SIZE, hidden=HIDDEN,
        num_layers=NUM_LAYERS, seq_len=SEQ_LEN, output_dim=OUTPUT_DIM)
    jax.block_until_ready((out, hn, cn))

    out_ref, (hn_ref, cn_ref) = t1net_reference(
        x, params, hidden=HIDDEN, num_layers=NUM_LAYERS, seq_len=SEQ_LEN,
        output_dim=OUTPUT_DIM)

    np.testing.assert_allclose(np.asarray(out), np.asarray(out_ref), rtol=2e-2, atol=2e-2)
    np.testing.assert_allclose(np.asarray(hn), np.asarray(hn_ref), rtol=2e-2, atol=2e-2)
    np.testing.assert_allclose(np.asarray(cn), np.asarray(cn_ref), rtol=2e-2, atol=2e-2)

    assert out.shape == (BATCH, OUTPUT_DIM, 1)
    assert hn.shape == (2 * NUM_LAYERS, BATCH, HIDDEN)
    assert cn.shape == (2 * NUM_LAYERS, BATCH, HIDDEN)
    print("KERNEL_OK")
</pallas_src>

<mosaic_0001>
module attributes {stable_mosaic.version = 11 : i64} {
  func.func @t1net_kernel(%arg0: memref<24x128xbf16, #tpu.memory_space<vmem>>, %arg1: memref<3x128x512xbf16, #tpu.memory_space<vmem>>, %arg2: memref<3x128x512xbf16, #tpu.memory_space<vmem>>, %arg3: memref<3x1x512xf32, #tpu.memory_space<vmem>>, %arg4: memref<3x8x128xf32, #tpu.memory_space<vmem>>, %arg5: memref<3x8x128xf32, #tpu.memory_space<vmem>>, %arg6: memref<3x128x384xbf16, #tpu.memory_space<vmem>>, %arg7: memref<1x384xf32, #tpu.memory_space<vmem>>, %arg8: memref<384x128xbf16, #tpu.memory_space<vmem>>, %arg9: memref<1x128xf32, #tpu.memory_space<vmem>>, %arg10: memref<8x128xf32, #tpu.memory_space<vmem>>, %arg11: memref<3x8x128xf32, #tpu.memory_space<vmem>>, %arg12: memref<3x8x128xf32, #tpu.memory_space<vmem>>, %arg13: memref<24x128xf32, #tpu.memory_space<vmem>>, %arg14: memref<24x128xf32, #tpu.memory_space<vmem>>, %arg15: memref<24x512xf32, #tpu.memory_space<vmem>>) attributes {dimension_semantics = [], scalar_prefetch = 0 : i64, scratch_operands = 3 : i64, tpu.core_type = #tpu.core_type<tc>} {
    %0 = tpu.iota {dimensions = array<i32: 1>} : vector<8x512xi32>
    %c128_i32 = arith.constant 128 : i32
    %c0_i32 = arith.constant 0 : i32
    %1 = arith.cmpi eq, %c128_i32, %c0_i32 : i32
    %c1_i32 = arith.constant 1 : i32
    %2 = arith.select %1, %c1_i32, %c128_i32 : i32
    %3 = vector.broadcast %2 : i32 to vector<8x512xi32>
    %4 = arith.remsi %0, %3 : vector<8x512xi32>
    %c0_i32_0 = arith.constant 0 : i32
    %5 = vector.broadcast %c0_i32_0 : i32 to vector<8x512xi32>
    %6 = arith.cmpi ne, %4, %5 : vector<8x512xi32>
    %c0_i32_1 = arith.constant 0 : i32
    %7 = vector.broadcast %c0_i32_1 : i32 to vector<8x512xi32>
    %8 = arith.cmpi slt, %4, %7 : vector<8x512xi32>
    %c0_i32_2 = arith.constant 0 : i32
    %9 = arith.cmpi slt, %2, %c0_i32_2 : i32
    %10 = vector.broadcast %9 : i1 to vector<8x512xi1>
    %11 = vector.broadcast %10 : vector<8x512xi1> to vector<8x512xi1>
    %12 = arith.xori %8, %11 : vector<8x512xi1>
    %13 = arith.andi %12, %6 : vector<8x512xi1>
    %14 = vector.broadcast %2 : i32 to vector<8x512xi32>
    %15 = arith.addi %4, %14 : vector<8x512xi32>
    %16 = arith.select %13, %15, %4 : vector<8x512xi1>, vector<8x512xi32>
    %c64_i32 = arith.constant 64 : i32
    %17 = vector.broadcast %c64_i32 : i32 to vector<8x512xi32>
    %18 = arith.cmpi slt, %16, %17 : vector<8x512xi32>
    %19 = tpu.iota {dimensions = array<i32: 1>} : vector<8x128xi32>
    %c64_i32_3 = arith.constant 64 : i32
    %20 = vector.broadcast %c64_i32_3 : i32 to vector<8x128xi32>
    %21 = arith.cmpi slt, %19, %20 : vector<8x128xi32>
    %c64_i32_4 = arith.constant 64 : i32
    %22 = vector.broadcast %c64_i32_4 : i32 to vector<8x128xi32>
    %23 = arith.cmpi sge, %19, %22 : vector<8x128xi32>
    %c128_i32_5 = arith.constant 128 : i32
    %24 = vector.broadcast %c128_i32_5 : i32 to vector<8x128xi32>
    %25 = arith.cmpi slt, %19, %24 : vector<8x128xi32>
    %26 = arith.andi %23, %25 : vector<8x128xi1>
    %cst = arith.constant 0.000000e+00 : f32
    %27 = vector.broadcast %cst : f32 to vector<24x128xf32>
    %c0 = arith.constant 0 : index
    %c0_6 = arith.constant 0 : index
    %28 = vector.load %arg13[%c0, %c0_6] : memref<24x128xf32, #tpu.memory_space<vmem>>, vector<24x128xf32>
    tpu.vector_store %arg13[%c0, %c0_6], %27 {strides = array<i32>} : memref<24x128xf32, #tpu.memory_space<vmem>>, vector<24x128xf32>,
    %cst_7 = arith.constant 0.000000e+00 : f32
    %29 = vector.broadcast %cst_7 : f32 to vector<24x128xf32>
    %c0_8 = arith.constant 0 : index
    %c0_9 = arith.constant 0 : index
    %30 = vector.load %arg14[%c0_8, %c0_9] : memref<24x128xf32, #tpu.memory_space<vmem>>, vector<24x128xf32>
    tpu.vector_store %arg14[%c0_8, %c0_9], %29 {strides = array<i32>} : memref<24x128xf32, #tpu.memory_space<vmem>>, vector<24x128xf32>,
    %c0_10 = arith.constant 0 : index
    %c0_11 = arith.constant 0 : index
    %31 = vector.load %arg0[%c0_10, %c0_11] : memref<24x128xbf16, #tpu.memory_space<vmem>>, vector<24x128xbf16>
    %c0_12 = arith.constant 0 : index
    %c0_13 = arith.constant 0 : index
    %c0_14 = arith.constant 0 : index
    %32 = vector.load %arg2[%c0_12, %c0_13, %c0_14] : memref<3x128x512xbf16, #tpu.memory_space<vmem>>, vector<1x128x512xbf16>
    %33 = vector.shape_cast %32 : vector<1x128x512xbf16> to vector<128x512xbf16>
    %c0_15 = arith.constant 0 : index
    %c0_16 = arith.constant 0 : index
    %c0_17 = arith.constant 0 : index
    %34 = vector.load %arg1[%c0_15, %c0_16, %c0_17] : memref<3x128x512xbf16, #tpu.memory_space<vmem>>, vector<1x128x512xbf16>
    %35 = vector.shape_cast %34 : vector<1x128x512xbf16> to vector<128x512xbf16>
    %cst_18 = arith.constant dense<0.000000e+00> : vector<24x512xf32>
    %36 = tpu.matmul %31, %35, %cst_18 {dimension_numbers = #tpu.dot_dimension_numbers<[1], [0], [0], [1], [0, 0, 1, 1], [], []>} : vector<24x128xbf16>, vector<128x512xbf16>, vector<24x512xf32> -> vector<24x512xf32>
    %c0_19 = arith.constant 0 : index
    %c0_20 = arith.constant 0 : index
    %c0_21 = arith.constant 0 : index
    %37 = vector.load %arg3[%c0_19, %c0_20, %c0_21] : memref<3x1x512xf32, #tpu.memory_space<vmem>>, vector<1x1x512xf32>
    %38 = vector.shape_cast %37 : vector<1x1x512xf32> to vector<1x512xf32>
    %39 = vector.broadcast %38 : vector<1x512xf32> to vector<24x512xf32>
    %40 = arith.addf %36, %39 : vector<24x512xf32>
    %c0_22 = arith.constant 0 : index
    %c0_23 = arith.constant 0 : index
    %41 = vector.load %arg15[%c0_22, %c0_23] : memref<24x512xf32, #tpu.memory_space<vmem>>, vector<24x512xf32>
    tpu.vector_store %arg15[%c0_22, %c0_23], %40 {strides = array<i32>} : memref<24x512xf32, #tpu.memory_space<vmem>>, vector<24x512xf32>,
    %c0_24 = arith.constant 0 : index
    %c0_25 = arith.constant 0 : index
    %c0_26 = arith.constant 0 : index
    %42 = vector.load %arg4[%c0_24, %c0_25, %c0_26] : memref<3x8x128xf32, #tpu.memory_space<vmem>>, vector<1x8x128xf32>
    %43 = vector.shape_cast %42 : vector<1x8x128xf32> to vector<8x128xf32>
    %c0_27 = arith.constant 0 : index
    %c0_28 = arith.constant 0 : index
    %c0_29 = arith.constant 0 : index
    %44 = vector.load %arg5[%c0_27, %c0_28, %c0_29] : memref<3x8x128xf32, #tpu.memory_space<vmem>>, vector<1x8x128xf32>
    %45 = vector.shape_cast %44 : vector<1x8x128xf32> to vector<8x128xf32>
    %c0_i32_30 = arith.constant 0 : i32
    %c8_i32 = arith.constant 8 : i32
    %46 = arith.muli %c0_i32_30, %c8_i32 : i32
    %47 = tpu.assume_multiple %46, 8 : i32
    %c2_i32 = arith.constant 2 : i32
    %48 = arith.subi %c2_i32, %c0_i32_30 : i32
    %c8_i32_31 = arith.constant 8 : i32
    %49 = arith.muli %48, %c8_i32_31 : i32
    %50 = tpu.assume_multiple %49, 8 : i32
    %51 = arith.index_cast %47 : i32 to index
    %c0_32 = arith.constant 0 : index
    %52 = vector.load %arg15[%51, %c0_32] : memref<24x512xf32, #tpu.memory_space<vmem>>, vector<8x512xf32>
    %53 = arith.index_cast %50 : i32 to index
    %c0_33 = arith.constant 0 : index
    %54 = vector.load %arg15[%53, %c0_33] : memref<24x512xf32, #tpu.memory_space<vmem>>, vector<8x512xf32>
    %55 = arith.select %18, %52, %54 : vector<8x512xi1>, vector<8x512xf32>
    %56 = arith.truncf %43 : vector<8x128xf32> to vector<8x128xbf16>
    %cst_34 = arith.constant dense<0.000000e+00> : vector<8x512xf32>
    %57 = tpu.matmul %56, %33, %cst_34 {dimension_numbers = #tpu.dot_dimension_numbers<[1], [0], [0], [1], [0, 0, 1, 1], [], []>} : vector<8x128xbf16>, vector<128x512xbf16>, vector<8x512xf32> -> vector<8x512xf32>
    %58 = arith.addf %55, %57 : vector<8x512xf32>
    %59 = vector.extract_strided_slice %58 {offsets = [0, 0], sizes = [8, 128], strides = [1, 1]} : vector<8x512xf32> to vector<8x128xf32>
    %60 = arith.negf %59 : vector<8x128xf32>
    %61 = math.exp %60 : vector<8x128xf32>
    %cst_35 = arith.constant 1.000000e+00 : f32
    %62 = vector.broadcast %cst_35 : f32 to vector<8x128xf32>
    %63 = arith.addf %62, %61 : vector<8x128xf32>
    %64 = arith.divf %62, %63 : vector<8x128xf32>
    %65 = vector.extract_strided_slice %58 {offsets = [0, 128], sizes = [8, 128], strides = [1, 1]} : vector<8x512xf32> to vector<8x128xf32>
    %66 = arith.negf %65 : vector<8x128xf32>
    %67 = math.exp %66 : vector<8x128xf32>
    %cst_36 = arith.constant 1.000000e+00 : f32
    %68 = vector.broadcast %cst_36 : f32 to vector<8x128xf32>
    %69 = arith.addf %68, %67 : vector<8x128xf32>
    %70 = arith.divf %68, %69 : vector<8x128xf32>
    %71 = vector.extract_strided_slice %58 {offsets = [0, 256], sizes = [8, 128], strides = [1, 1]} : vector<8x512xf32> to vector<8x128xf32>
    %72 = math.tanh %71 : vector<8x128xf32>
    %73 = vector.extract_strided_slice %58 {offsets = [0, 384], sizes = [8, 128], strides = [1, 1]} : vector<8x512xf32> to vector<8x128xf32>
    %74 = arith.negf %73 : vector<8x128xf32>
    %75 = math.exp %74 : vector<8x128xf32>
    %cst_37 = arith.constant 1.000000e+00 : f32
    %76 = vector.broadcast %cst_37 : f32 to vector<8x128xf32>
    %77 = arith.addf %76, %75 : vector<8x128xf32>
    %78 = arith.divf %76, %77 : vector<8x128xf32>
    %79 = arith.mulf %70, %45 : vector<8x128xf32>
    %80 = arith.mulf %64, %72 : vector<8x128xf32>
    %81 = arith.addf %79, %80 : vector<8x128xf32>
    %82 = math.tanh %81 : vector<8x128xf32>
    %83 = arith.mulf %78, %82 : vector<8x128xf32>
    %84 = arith.index_cast %47 : i32 to index
    %c0_38 = arith.constant 0 : index
    %85 = vector.load %arg13[%84, %c0_38] : memref<24x128xf32, #tpu.memory_space<vmem>>, vector<8x128xf32>
    %86 = arith.select %21, %83, %85 : vector<8x128xi1>, vector<8x128xf32>
    %87 = arith.index_cast %47 : i32 to index
    %c0_39 = arith.constant 0 : index
    %88 = vector.load %arg13[%87, %c0_39] : memref<24x128xf32, #tpu.memory_space<vmem>>, vector<8x128xf32>
    tpu.vector_store %arg13[%87, %c0_39], %86 {strides = array<i32>} : memref<24x128xf32, #tpu.memory_space<vmem>>, vector<8x128xf32>,
    %89 = arith.index_cast %50 : i32 to index
    %c0_40 = arith.constant 0 : index
    %90 = vector.load %arg13[%89, %c0_40] : memref<24x128xf32, #tpu.memory_space<vmem>>, vector<8x128xf32>
    %91 = arith.select %26, %83, %90 : vector<8x128xi1>, vector<8x128xf32>
    %92 = arith.index_cast %50 : i32 to index
    %c0_41 = arith.constant 0 : index
    %93 = vector.load %arg13[%92, %c0_41] : memref<24x128xf32, #tpu.memory_space<vmem>>, vector<8x128xf32>
    tpu.vector_store %arg13[%92, %c0_41], %91 {strides = array<i32>} : memref<24x128xf32, #tpu.memory_space<vmem>>, vector<8x128xf32>,
    %c1_i32_42 = arith.constant 1 : i32
    %c8_i32_43 = arith.constant 8 : i32
    %94 = arith.muli %c1_i32_42, %c8_i32_43 : i32
    %95 = tpu.assume_multiple %94, 8 : i32
    %c2_i32_44 = arith.constant 2 : i32
    %96 = arith.subi %c2_i32_44, %c1_i32_42 : i32
    %c8_i32_45 = arith.constant 8 : i32
    %97 = arith.muli %96, %c8_i32_45 : i32
    %98 = tpu.assume_multiple %97, 8 : i32
    %99 = arith.index_cast %95 : i32 to index
    %c0_46 = arith.constant 0 : index
    %100 = vector.load %arg15[%99, %c0_46] : memref<24x512xf32, #tpu.memory_space<vmem>>, vector<8x512xf32>
    %101 = arith.index_cast %98 : i32 to index
    %c0_47 = arith.constant 0 : index
    %102 = vector.load %arg15[%101, %c0_47] : memref<24x512xf32, #tpu.memory_space<vmem>>, vector<8x512xf32>
    %103 = arith.select %18, %100, %102 : vector<8x512xi1>, vector<8x512xf32>
    %104 = arith.truncf %83 : vector<8x128xf32> to vector<8x128xbf16>
    %cst_48 = arith.constant dense<0.000000e+00> : vector<8x512xf32>
    %105 = tpu.matmul %104, %33, %cst_48 {dimension_numbers = #tpu.dot_dimension_numbers<[1], [0], [0], [1], [0, 0, 1, 1], [], []>} : vector<8x128xbf16>, vector<128x512xbf16>, vector<8x512xf32> -> vector<8x512xf32>
    %106 = arith.addf %103, %105 : vector<8x512xf32>
    %107 = vector.extract_strided_slice %106 {offsets = [0, 0], sizes = [8, 128], strides = [1, 1]} : vector<8x512xf32> to vector<8x128xf32>
    %108 = arith.negf %107 : vector<8x128xf32>
    %109 = math.exp %108 : vector<8x128xf32>
    %cst_49 = arith.constant 1.000000e+00 : f32
    %110 = vector.broadcast %cst_49 : f32 to vector<8x128xf32>
    %111 = arith.addf %110, %109 : vector<8x128xf32>
    %112 = arith.divf %110, %111 : vector<8x128xf32>
    %113 = vector.extract_strided_slice %106 {offsets = [0, 128], sizes = [8, 128], strides = [1, 1]} : vector<8x512xf32> to vector<8x128xf32>
    %114 = arith.negf %113 : vector<8x128xf32>
    %115 = math.exp %114 : vector<8x128xf32>
    %cst_50 = arith.constant 1.000000e+00 : f32
    %116 = vector.broadcast %cst_50 : f32 to vector<8x128xf32>
    %117 = arith.addf %116, %115 : vector<8x128xf32>
    %118 = arith.divf %116, %117 : vector<8x128xf32>
    %119 = vector.extract_strided_slice %106 {offsets = [0, 256], sizes = [8, 128], strides = [1, 1]} : vector<8x512xf32> to vector<8x128xf32>
    %120 = math.tanh %119 : vector<8x128xf32>
    %121 = vector.extract_strided_slice %106 {offsets = [0, 384], sizes = [8, 128], strides = [1, 1]} : vector<8x512xf32> to vector<8x128xf32>
    %122 = arith.negf %121 : vector<8x128xf32>
    %123 = math.exp %122 : vector<8x128xf32>
    %cst_51 = arith.constant 1.000000e+00 : f32
    %124 = vector.broadcast %cst_51 : f32 to vector<8x128xf32>
    %125 = arith.addf %124, %123 : vector<8x128xf32>
    %126 = arith.divf %124, %125 : vector<8x128xf32>
    %127 = arith.mulf %118, %81 : vector<8x128xf32>
    %128 = arith.mulf %112, %120 : vector<8x128xf32>
    %129 = arith.addf %127, %128 : vector<8x128xf32>
    %130 = math.tanh %129 : vector<8x128xf32>
    %131 = arith.mulf %126, %130 : vector<8x128xf32>
    %132 = arith.index_cast %95 : i32 to index
    %c0_52 = arith.constant 0 : index
    %133 = vector.load %arg13[%132, %c0_52] : memref<24x128xf32, #tpu.memory_space<vmem>>, vector<8x128xf32>
    %134 = arith.select %21, %131, %133 : vector<8x128xi1>, vector<8x128xf32>
    %135 = arith.index_cast %95 : i32 to index
    %c0_53 = arith.constant 0 : index
    %136 = vector.load %arg13[%135, %c0_53] : memref<24x128xf32, #tpu.memory_space<vmem>>, vector<8x128xf32>
    tpu.vector_store %arg13[%135, %c0_53], %134 {strides = array<i32>} : memref<24x128xf32, #tpu.memory_space<vmem>>, vector<8x128xf32>,
    %137 = arith.index_cast %98 : i32 to index
    %c0_54 = arith.constant 0 : index
    %138 = vector.load %arg13[%137, %c0_54] : memref<24x128xf32, #tpu.memory_space<vmem>>, vector<8x128xf32>
    %139 = arith.select %26, %131, %138 : vector<8x128xi1>, vector<8x128xf32>
    %140 = arith.index_cast %98 : i32 to index
    %c0_55 = arith.constant 0 : index
    %141 = vector.load %arg13[%140, %c0_55] : memref<24x128xf32, #tpu.memory_space<vmem>>, vector<8x128xf32>
    tpu.vector_store %arg13[%140, %c0_55], %139 {strides = array<i32>} : memref<24x128xf32, #tpu.memory_space<vmem>>, vector<8x128xf32>,
    %c2_i32_56 = arith.constant 2 : i32
    %c8_i32_57 = arith.constant 8 : i32
    %142 = arith.muli %c2_i32_56, %c8_i32_57 : i32
    %143 = tpu.assume_multiple %142, 8 : i32
    %c2_i32_58 = arith.constant 2 : i32
    %144 = arith.subi %c2_i32_58, %c2_i32_56 : i32
    %c8_i32_59 = arith.constant 8 : i32
    %145 = arith.muli %144, %c8_i32_59 : i32
    %146 = tpu.assume_multiple %145, 8 : i32
    %147 = arith.index_cast %143 : i32 to index
    %c0_60 = arith.constant 0 : index
    %148 = vector.load %arg15[%147, %c0_60] : memref<24x512xf32, #tpu.memory_space<vmem>>, vector<8x512xf32>
    %149 = arith.index_cast %146 : i32 to index
    %c0_61 = arith.constant 0 : index
    %150 = vector.load %arg15[%149, %c0_61] : memref<24x512xf32, #tpu.memory_space<vmem>>, vector<8x512xf32>
    %151 = arith.select %18, %148, %150 : vector<8x512xi1>, vector<8x512xf32>
    %152 = arith.truncf %131 : vector<8x128xf32> to vector<8x128xbf16>
    %cst_62 = arith.constant dense<0.000000e+00> : vector<8x512xf32>
    %153 = tpu.matmul %152, %33, %cst_62 {dimension_numbers = #tpu.dot_dimension_numbers<[1], [0], [0], [1], [0, 0, 1, 1], [], []>} : vector<8x128xbf16>, vector<128x512xbf16>, vector<8x512xf32> -> vector<8x512xf32>
    %154 = arith.addf %151, %153 : vector<8x512xf32>
    %155 = vector.extract_strided_slice %154 {offsets = [0, 0], sizes = [8, 128], strides = [1, 1]} : vector<8x512xf32> to vector<8x128xf32>
    %156 = arith.negf %155 : vector<8x128xf32>
    %157 = math.exp %156 : vector<8x128xf32>
    %cst_63 = arith.constant 1.000000e+00 : f32
    %158 = vector.broadcast %cst_63 : f32 to vector<8x128xf32>
    %159 = arith.addf %158, %157 : vector<8x128xf32>
    %160 = arith.divf %158, %159 : vector<8x128xf32>
    %161 = vector.extract_strided_slice %154 {offsets = [0, 128], sizes = [8, 128], strides = [1, 1]} : vector<8x512xf32> to vector<8x128xf32>
    %162 = arith.negf %161 : vector<8x128xf32>
    %163 = math.exp %162 : vector<8x128xf32>
    %cst_64 = arith.constant 1.000000e+00 : f32
    %164 = vector.broadcast %cst_64 : f32 to vector<8x128xf32>
    %165 = arith.addf %164, %163 : vector<8x128xf32>
    %166 = arith.divf %164, %165 : vector<8x128xf32>
    %167 = vector.extract_strided_slice %154 {offsets = [0, 256], sizes = [8, 128], strides = [1, 1]} : vector<8x512xf32> to vector<8x128xf32>
    %168 = math.tanh %167 : vector<8x128xf32>
    %169 = vector.extract_strided_slice %154 {offsets = [0, 384], sizes = [8, 128], strides = [1, 1]} : vector<8x512xf32> to vector<8x128xf32>
    %170 = arith.negf %169 : vector<8x128xf32>
    %171 = math.exp %170 : vector<8x128xf32>
    %cst_65 = arith.constant 1.000000e+00 : f32
    %172 = vector.broadcast %cst_65 : f32 to vector<8x128xf32>
    %173 = arith.addf %172, %171 : vector<8x128xf32>
    %174 = arith.divf %172, %173 : vector<8x128xf32>
    %175 = arith.mulf %166, %129 : vector<8x128xf32>
    %176 = arith.mulf %160, %168 : vector<8x128xf32>
    %177 = arith.addf %175, %176 : vector<8x128xf32>
    %178 = math.tanh %177 : vector<8x128xf32>
    %179 = arith.mulf %174, %178 : vector<8x128xf32>
    %180 = arith.index_cast %143 : i32 to index
    %c0_66 = arith.constant 0 : index
    %181 = vector.load %arg13[%180, %c0_66] : memref<24x128xf32, #tpu.memory_space<vmem>>, vector<8x128xf32>
    %182 = arith.select %21, %179, %181 : vector<8x128xi1>, vector<8x128xf32>
    %183 = arith.index_cast %143 : i32 to index
    %c0_67 = arith.constant 0 : index
    %184 = vector.load %arg13[%183, %c0_67] : memref<24x128xf32, #tpu.memory_space<vmem>>, vector<8x128xf32>
    tpu.vector_store %arg13[%183, %c0_67], %182 {strides = array<i32>} : memref<24x128xf32, #tpu.memory_space<vmem>>, vector<8x128xf32>,
    %185 = arith.index_cast %146 : i32 to index
    %c0_68 = arith.constant 0 : index
    %186 = vector.load %arg13[%185, %c0_68] : memref<24x128xf32, #tpu.memory_space<vmem>>, vector<8x128xf32>
    %187 = arith.select %26, %179, %186 : vector<8x128xi1>, vector<8x128xf32>
    %188 = arith.index_cast %146 : i32 to index
    %c0_69 = arith.constant 0 : index
    %189 = vector.load %arg13[%188, %c0_69] : memref<24x128xf32, #tpu.memory_space<vmem>>, vector<8x128xf32>
    tpu.vector_store %arg13[%188, %c0_69], %187 {strides = array<i32>} : memref<24x128xf32, #tpu.memory_space<vmem>>, vector<8x128xf32>,
    %c3_i32 = arith.constant 3 : i32
    %c0_70 = arith.constant 0 : index
    %c0_71 = arith.constant 0 : index
    %c0_72 = arith.constant 0 : index
    %190 = vector.load %arg11[%c0_70, %c0_71, %c0_72] : memref<3x8x128xf32, #tpu.memory_space<vmem>>, vector<1x8x128xf32>
    %191 = vector.shape_cast %190 : vector<1x8x128xf32> to vector<8x128xf32>
    %192 = vector.shape_cast %179 : vector<8x128xf32> to vector<1x8x128xf32>
    tpu.vector_store %arg11[%c0_70, %c0_71, %c0_72], %192 {strides = array<i32>} : memref<3x8x128xf32, #tpu.memory_space<vmem>>, vector<1x8x128xf32>,
    %c0_73 = arith.constant 0 : index
    %c0_74 = arith.constant 0 : index
    %c0_75 = arith.constant 0 : index
    %193 = vector.load %arg12[%c0_73, %c0_74, %c0_75] : memref<3x8x128xf32, #tpu.memory_space<vmem>>, vector<1x8x128xf32>
    %194 = vector.shape_cast %193 : vector<1x8x128xf32> to vector<8x128xf32>
    %195 = vector.shape_cast %177 : vector<8x128xf32> to vector<1x8x128xf32>
    tpu.vector_store %arg12[%c0_73, %c0_74, %c0_75], %195 {strides = array<i32>} : memref<3x8x128xf32, #tpu.memory_space<vmem>>, vector<1x8x128xf32>,
    %c0_76 = arith.constant 0 : index
    %c0_77 = arith.constant 0 : index
    %196 = vector.load %arg13[%c0_76, %c0_77] : memref<24x128xf32, #tpu.memory_space<vmem>>, vector<24x128xf32>
    %197 = arith.truncf %196 : vector<24x128xf32> to vector<24x128xbf16>
    %c1 = arith.constant 1 : index
    %c0_78 = arith.constant 0 : index
    %c0_79 = arith.constant 0 : index
    %198 = vector.load %arg2[%c1, %c0_78, %c0_79] : memref<3x128x512xbf16, #tpu.memory_space<vmem>>, vector<1x128x512xbf16>
    %199 = vector.shape_cast %198 : vector<1x128x512xbf16> to vector<128x512xbf16>
    %c1_80 = arith.constant 1 : index
    %c0_81 = arith.constant 0 : index
    %c0_82 = arith.constant 0 : index
    %200 = vector.load %arg1[%c1_80, %c0_81, %c0_82] : memref<3x128x512xbf16, #tpu.memory_space<vmem>>, vector<1x128x512xbf16>
    %201 = vector.shape_cast %200 : vector<1x128x512xbf16> to vector<128x512xbf16>
    %cst_83 = arith.constant dense<0.000000e+00> : vector<24x512xf32>
    %202 = tpu.matmul %197, %201, %cst_83 {dimension_numbers = #tpu.dot_dimension_numbers<[1], [0], [0], [1], [0, 0, 1, 1], [], []>} : vector<24x128xbf16>, vector<128x512xbf16>, vector<24x512xf32> -> vector<24x512xf32>
    %c1_84 = arith.constant 1 : index
    %c0_85 = arith.constant 0 : index
    %c0_86 = arith.constant 0 : index
    %203 = vector.load %arg3[%c1_84, %c0_85, %c0_86] : memref<3x1x512xf32, #tpu.memory_space<vmem>>, vector<1x1x512xf32>
    %204 = vector.shape_cast %203 : vector<1x1x512xf32> to vector<1x512xf32>
    %205 = vector.broadcast %204 : vector<1x512xf32> to vector<24x512xf32>
    %206 = arith.addf %202, %205 : vector<24x512xf32>
    %c0_87 = arith.constant 0 : index
    %c0_88 = arith.constant 0 : index
    %207 = vector.load %arg15[%c0_87, %c0_88] : memref<24x512xf32, #tpu.memory_space<vmem>>, vector<24x512xf32>
    tpu.vector_store %arg15[%c0_87, %c0_88], %206 {strides = array<i32>} : memref<24x512xf32, #tpu.memory_space<vmem>>, vector<24x512xf32>,
    %c1_89 = arith.constant 1 : index
    %c0_90 = arith.constant 0 : index
    %c0_91 = arith.constant 0 : index
    %208 = vector.load %arg4[%c1_89, %c0_90, %c0_91] : memref<3x8x128xf32, #tpu.memory_space<vmem>>, vector<1x8x128xf32>
    %209 = vector.shape_cast %208 : vector<1x8x128xf32> to vector<8x128xf32>
    %c1_92 = arith.constant 1 : index
    %c0_93 = arith.constant 0 : index
    %c0_94 = arith.constant 0 : index
    %210 = vector.load %arg5[%c1_92, %c0_93, %c0_94] : memref<3x8x128xf32, #tpu.memory_space<vmem>>, vector<1x8x128xf32>
    %211 = vector.shape_cast %210 : vector<1x8x128xf32> to vector<8x128xf32>
    %c0_i32_95 = arith.constant 0 : i32
    %c8_i32_96 = arith.constant 8 : i32
    %212 = arith.muli %c0_i32_95, %c8_i32_96 : i32
    %213 = tpu.assume_multiple %212, 8 : i32
    %c2_i32_97 = arith.constant 2 : i32
    %214 = arith.subi %c2_i32_97, %c0_i32_95 : i32
    %c8_i32_98 = arith.constant 8 : i32
    %215 = arith.muli %214, %c8_i32_98 : i32
    %216 = tpu.assume_multiple %215, 8 : i32
    %217 = arith.index_cast %213 : i32 to index
    %c0_99 = arith.constant 0 : index
    %218 = vector.load %arg15[%217, %c0_99] : memref<24x512xf32, #tpu.memory_space<vmem>>, vector<8x512xf32>
    %219 = arith.index_cast %216 : i32 to index
    %c0_100 = arith.constant 0 : index
    %220 = vector.load %arg15[%219, %c0_100] : memref<24x512xf32, #tpu.memory_space<vmem>>, vector<8x512xf32>
    %221 = arith.select %18, %218, %220 : vector<8x512xi1>, vector<8x512xf32>
    %222 = arith.truncf %209 : vector<8x128xf32> to vector<8x128xbf16>
    %cst_101 = arith.constant dense<0.000000e+00> : vector<8x512xf32>
    %223 = tpu.matmul %222, %199, %cst_101 {dimension_numbers = #tpu.dot_dimension_numbers<[1], [0], [0], [1], [0, 0, 1, 1], [], []>} : vector<8x128xbf16>, vector<128x512xbf16>, vector<8x512xf32> -> vector<8x512xf32>
    %224 = arith.addf %221, %223 : vector<8x512xf32>
    %225 = vector.extract_strided_slice %224 {offsets = [0, 0], sizes = [8, 128], strides = [1, 1]} : vector<8x512xf32> to vector<8x128xf32>
    %226 = arith.negf %225 : vector<8x128xf32>
    %227 = math.exp %226 : vector<8x128xf32>
    %cst_102 = arith.constant 1.000000e+00 : f32
    %228 = vector.broadcast %cst_102 : f32 to vector<8x128xf32>
    %229 = arith.addf %228, %227 : vector<8x128xf32>
    %230 = arith.divf %228, %229 : vector<8x128xf32>
    %231 = vector.extract_strided_slice %224 {offsets = [0, 128], sizes = [8, 128], strides = [1, 1]} : vector<8x512xf32> to vector<8x128xf32>
    %232 = arith.negf %231 : vector<8x128xf32>
    %233 = math.exp %232 : vector<8x128xf32>
    %cst_103 = arith.constant 1.000000e+00 : f32
    %234 = vector.broadcast %cst_103 : f32 to vector<8x128xf32>
    %235 = arith.addf %234, %233 : vector<8x128xf32>
    %236 = arith.divf %234, %235 : vector<8x128xf32>
    %237 = vector.extract_strided_slice %224 {offsets = [0, 256], sizes = [8, 128], strides = [1, 1]} : vector<8x512xf32> to vector<8x128xf32>
    %238 = math.tanh %237 : vector<8x128xf32>
    %239 = vector.extract_strided_slice %224 {offsets = [0, 384], sizes = [8, 128], strides = [1, 1]} : vector<8x512xf32> to vector<8x128xf32>
    %240 = arith.negf %239 : vector<8x128xf32>
    %241 = math.exp %240 : vector<8x128xf32>
    %cst_104 = arith.constant 1.000000e+00 : f32
    %242 = vector.broadcast %cst_104 : f32 to vector<8x128xf32>
    %243 = arith.addf %242, %241 : vector<8x128xf32>
    %244 = arith.divf %242, %243 : vector<8x128xf32>
    %245 = arith.mulf %236, %211 : vector<8x128xf32>
    %246 = arith.mulf %230, %238 : vector<8x128xf32>
    %247 = arith.addf %245, %246 : vector<8x128xf32>
    %248 = math.tanh %247 : vector<8x128xf32>
    %249 = arith.mulf %244, %248 : vector<8x128xf32>
    %250 = arith.index_cast %213 : i32 to index
    %c0_105 = arith.constant 0 : index
    %251 = vector.load %arg14[%250, %c0_105] : memref<24x128xf32, #tpu.memory_space<vmem>>, vector<8x128xf32>
    %252 = arith.select %21, %249, %251 : vector<8x128xi1>, vector<8x128xf32>
    %253 = arith.index_cast %213 : i32 to index
    %c0_106 = arith.constant 0 : index
    %254 = vector.load %arg14[%253, %c0_106] : memref<24x128xf32, #tpu.memory_space<vmem>>, vector<8x128xf32>
    tpu.vector_store %arg14[%253, %c0_106], %252 {strides = array<i32>} : memref<24x128xf32, #tpu.memory_space<vmem>>, vector<8x128xf32>,
    %255 = arith.index_cast %216 : i32 to index
    %c0_107 = arith.constant 0 : index
    %256 = vector.load %arg14[%255, %c0_107] : memref<24x128xf32, #tpu.memory_space<vmem>>, vector<8x128xf32>
    %257 = arith.select %26, %249, %256 : vector<8x128xi1>, vector<8x128xf32>
    %258 = arith.index_cast %216 : i32 to index
    %c0_108 = arith.constant 0 : index
    %259 = vector.load %arg14[%258, %c0_108] : memref<24x128xf32, #tpu.memory_space<vmem>>, vector<8x128xf32>
    tpu.vector_store %arg14[%258, %c0_108], %257 {strides = array<i32>} : memref<24x128xf32, #tpu.memory_space<vmem>>, vector<8x128xf32>,
    %c1_i32_109 = arith.constant 1 : i32
    %c8_i32_110 = arith.constant 8 : i32
    %260 = arith.muli %c1_i32_109, %c8_i32_110 : i32
    %261 = tpu.assume_multiple %260, 8 : i32
    %c2_i32_111 = arith.constant 2 : i32
    %262 = arith.subi %c2_i32_111, %c1_i32_109 : i32
    %c8_i32_112 = arith.constant 8 : i32
    %263 = arith.muli %262, %c8_i32_112 : i32
    %264 = tpu.assume_multiple %263, 8 : i32
    %265 = arith.index_cast %261 : i32 to index
    %c0_113 = arith.constant 0 : index
    %266 = vector.load %arg15[%265, %c0_113] : memref<24x512xf32, #tpu.memory_space<vmem>>, vector<8x512xf32>
    %267 = arith.index_cast %264 : i32 to index
    %c0_114 = arith.constant 0 : index
    %268 = vector.load %arg15[%267, %c0_114] : memref<24x512xf32, #tpu.memory_space<vmem>>, vector<8x512xf32>
    %269 = arith.select %18, %266, %268 : vector<8x512xi1>, vector<8x512xf32>
    %270 = arith.truncf %249 : vector<8x128xf32> to vector<8x128xbf16>
    %cst_115 = arith.constant dense<0.000000e+00> : vector<8x512xf32>
    %271 = tpu.matmul %270, %199, %cst_115 {dimension_numbers = #tpu.dot_dimension_numbers<[1], [0], [0], [1], [0, 0, 1, 1], [], []>} : vector<8x128xbf16>, vector<128x512xbf16>, vector<8x512xf32> -> vector<8x512xf32>
    %272 = arith.addf %269, %271 : vector<8x512xf32>
    %273 = vector.extract_strided_slice %272 {offsets = [0, 0], sizes = [8, 128], strides = [1, 1]} : vector<8x512xf32> to vector<8x128xf32>
    %274 = arith.negf %273 : vector<8x128xf32>
    %275 = math.exp %274 : vector<8x128xf32>
    %cst_116 = arith.constant 1.000000e+00 : f32
    %276 = vector.broadcast %cst_116 : f32 to vector<8x128xf32>
    %277 = arith.addf %276, %275 : vector<8x128xf32>
    %278 = arith.divf %276, %277 : vector<8x128xf32>
    %279 = vector.extract_strided_slice %272 {offsets = [0, 128], sizes = [8, 128], strides = [1, 1]} : vector<8x512xf32> to vector<8x128xf32>
    %280 = arith.negf %279 : vector<8x128xf32>
    %281 = math.exp %280 : vector<8x128xf32>
    %cst_117 = arith.constant 1.000000e+00 : f32
    %282 = vector.broadcast %cst_117 : f32 to vector<8x128xf32>
    %283 = arith.addf %282, %281 : vector<8x128xf32>
    %284 = arith.divf %282, %283 : vector<8x128xf32>
    %285 = vector.extract_strided_slice %272 {offsets = [0, 256], sizes = [8, 128], strides = [1, 1]} : vector<8x512xf32> to vector<8x128xf32>
    %286 = math.tanh %285 : vector<8x128xf32>
    %287 = vector.extract_strided_slice %272 {offsets = [0, 384], sizes = [8, 128], strides = [1, 1]} : vector<8x512xf32> to vector<8x128xf32>
    %288 = arith.negf %287 : vector<8x128xf32>
    %289 = math.exp %288 : vector<8x128xf32>
    %cst_118 = arith.constant 1.000000e+00 : f32
    %290 = vector.broadcast %cst_118 : f32 to vector<8x128xf32>
    %291 = arith.addf %290, %289 : vector<8x128xf32>
    %292 = arith.divf %290, %291 : vector<8x128xf32>
    %293 = arith.mulf %284, %247 : vector<8x128xf32>
    %294 = arith.mulf %278, %286 : vector<8x128xf32>
    %295 = arith.addf %293, %294 : vector<8x128xf32>
    %296 = math.tanh %295 : vector<8x128xf32>
    %297 = arith.mulf %292, %296 : vector<8x128xf32>
    %298 = arith.index_cast %261 : i32 to index
    %c0_119 = arith.constant 0 : index
    %299 = vector.load %arg14[%298, %c0_119] : memref<24x128xf32, #tpu.memory_space<vmem>>, vector<8x128xf32>
    %300 = arith.select %21, %297, %299 : vector<8x128xi1>, vector<8x128xf32>
    %301 = arith.index_cast %261 : i32 to index
    %c0_120 = arith.constant 0 : index
    %302 = vector.load %arg14[%301, %c0_120] : memref<24x128xf32, #tpu.memory_space<vmem>>, vector<8x128xf32>
    tpu.vector_store %arg14[%301, %c0_120], %300 {strides = array<i32>} : memref<24x128xf32, #tpu.memory_space<vmem>>, vector<8x128xf32>,
    %303 = arith.index_cast %264 : i32 to index
    %c0_121 = arith.constant 0 : index
    %304 = vector.load %arg14[%303, %c0_121] : memref<24x128xf32, #tpu.memory_space<vmem>>, vector<8x128xf32>
    %305 = arith.select %26, %297, %304 : vector<8x128xi1>, vector<8x128xf32>
    %306 = arith.index_cast %264 : i32 to index
    %c0_122 = arith.constant 0 : index
    %307 = vector.load %arg14[%306, %c0_122] : memref<24x128xf32, #tpu.memory_space<vmem>>, vector<8x128xf32>
    tpu.vector_store %arg14[%306, %c0_122], %305 {strides = array<i32>} : memref<24x128xf32, #tpu.memory_space<vmem>>, vector<8x128xf32>,
    %c2_i32_123 = arith.constant 2 : i32
    %c8_i32_124 = arith.constant 8 : i32
    %308 = arith.muli %c2_i32_123, %c8_i32_124 : i32
    %309 = tpu.assume_multiple %308, 8 : i32
    %c2_i32_125 = arith.constant 2 : i32
    %310 = arith.subi %c2_i32_125, %c2_i32_123 : i32
    %c8_i32_126 = arith.constant 8 : i32
    %311 = arith.muli %310, %c8_i32_126 : i32
    %312 = tpu.assume_multiple %311, 8 : i32
    %313 = arith.index_cast %309 : i32 to index
    %c0_127 = arith.constant 0 : index
    %314 = vector.load %arg15[%313, %c0_127] : memref<24x512xf32, #tpu.memory_space<vmem>>, vector<8x512xf32>
    %315 = arith.index_cast %312 : i32 to index
    %c0_128 = arith.constant 0 : index
    %316 = vector.load %arg15[%315, %c0_128] : memref<24x512xf32, #tpu.memory_space<vmem>>, vector<8x512xf32>
    %317 = arith.select %18, %314, %316 : vector<8x512xi1>, vector<8x512xf32>
    %318 = arith.truncf %297 : vector<8x128xf32> to vector<8x128xbf16>
    %cst_129 = arith.constant dense<0.000000e+00> : vector<8x512xf32>
    %319 = tpu.matmul %318, %199, %cst_129 {dimension_numbers = #tpu.dot_dimension_numbers<[1], [0], [0], [1], [0, 0, 1, 1], [], []>} : vector<8x128xbf16>, vector<128x512xbf16>, vector<8x512xf32> -> vector<8x512xf32>
    %320 = arith.addf %317, %319 : vector<8x512xf32>
    %321 = vector.extract_strided_slice %320 {offsets = [0, 0], sizes = [8, 128], strides = [1, 1]} : vector<8x512xf32> to vector<8x128xf32>
    %322 = arith.negf %321 : vector<8x128xf32>
    %323 = math.exp %322 : vector<8x128xf32>
    %cst_130 = arith.constant 1.000000e+00 : f32
    %324 = vector.broadcast %cst_130 : f32 to vector<8x128xf32>
    %325 = arith.addf %324, %323 : vector<8x128xf32>
    %326 = arith.divf %324, %325 : vector<8x128xf32>
    %327 = vector.extract_strided_slice %320 {offsets = [0, 128], sizes = [8, 128], strides = [1, 1]} : vector<8x512xf32> to vector<8x128xf32>
    %328 = arith.negf %327 : vector<8x128xf32>
    %329 = math.exp %328 : vector<8x128xf32>
    %cst_131 = arith.constant 1.000000e+00 : f32
    %330 = vector.broadcast %cst_131 : f32 to vector<8x128xf32>
    %331 = arith.addf %330, %329 : vector<8x128xf32>
    %332 = arith.divf %330, %331 : vector<8x128xf32>
    %333 = vector.extract_strided_slice %320 {offsets = [0, 256], sizes = [8, 128], strides = [1, 1]} : vector<8x512xf32> to vector<8x128xf32>
    %334 = math.tanh %333 : vector<8x128xf32>
    %335 = vector.extract_strided_slice %320 {offsets = [0, 384], sizes = [8, 128], strides = [1, 1]} : vector<8x512xf32> to vector<8x128xf32>
    %336 = arith.negf %335 : vector<8x128xf32>
    %337 = math.exp %336 : vector<8x128xf32>
    %cst_132 = arith.constant 1.000000e+00 : f32
    %338 = vector.broadcast %cst_132 : f32 to vector<8x128xf32>
    %339 = arith.addf %338, %337 : vector<8x128xf32>
    %340 = arith.divf %338, %339 : vector<8x128xf32>
    %341 = arith.mulf %332, %295 : vector<8x128xf32>
    %342 = arith.mulf %326, %334 : vector<8x128xf32>
    %343 = arith.addf %341, %342 : vector<8x128xf32>
    %344 = math.tanh %343 : vector<8x128xf32>
    %345 = arith.mulf %340, %344 : vector<8x128xf32>
    %346 = arith.index_cast %309 : i32 to index
    %c0_133 = arith.constant 0 : index
    %347 = vector.load %arg14[%346, %c0_133] : memref<24x128xf32, #tpu.memory_space<vmem>>, vector<8x128xf32>
    %348 = arith.select %21, %345, %347 : vector<8x128xi1>, vector<8x128xf32>
    %349 = arith.index_cast %309 : i32 to index
    %c0_134 = arith.constant 0 : index
    %350 = vector.load %arg14[%349, %c0_134] : memref<24x128xf32, #tpu.memory_space<vmem>>, vector<8x128xf32>
    tpu.vector_store %arg14[%349, %c0_134], %348 {strides = array<i32>} : memref<24x128xf32, #tpu.memory_space<vmem>>, vector<8x128xf32>,
    %351 = arith.index_cast %312 : i32 to index
    %c0_135 = arith.constant 0 : index
    %352 = vector.load %arg14[%351, %c0_135] : memref<24x128xf32, #tpu.memory_space<vmem>>, vector<8x128xf32>
    %353 = arith.select %26, %345, %352 : vector<8x128xi1>, vector<8x128xf32>
    %354 = arith.index_cast %312 : i32 to index
    %c0_136 = arith.constant 0 : index
    %355 = vector.load %arg14[%354, %c0_136] : memref<24x128xf32, #tpu.memory_space<vmem>>, vector<8x128xf32>
    tpu.vector_store %arg14[%354, %c0_136], %353 {strides = array<i32>} : memref<24x128xf32, #tpu.memory_space<vmem>>, vector<8x128xf32>,
    %c3_i32_137 = arith.constant 3 : i32
    %c1_138 = arith.constant 1 : index
    %c0_139 = arith.constant 0 : index
    %c0_140 = arith.constant 0 : index
    %356 = vector.load %arg11[%c1_138, %c0_139, %c0_140] : memref<3x8x128xf32, #tpu.memory_space<vmem>>, vector<1x8x128xf32>
    %357 = vector.shape_cast %356 : vector<1x8x128xf32> to vector<8x128xf32>
    %358 = vector.shape_cast %345 : vector<8x128xf32> to vector<1x8x128xf32>
    tpu.vector_store %arg11[%c1_138, %c0_139, %c0_140], %358 {strides = array<i32>} : memref<3x8x128xf32, #tpu.memory_space<vmem>>, vector<1x8x128xf32>,
    %c1_141 = arith.constant 1 : index
    %c0_142 = arith.constant 0 : index
    %c0_143 = arith.constant 0 : index
    %359 = vector.load %arg12[%c1_141, %c0_142, %c0_143] : memref<3x8x128xf32, #tpu.memory_space<vmem>>, vector<1x8x128xf32>
    %360 = vector.shape_cast %359 : vector<1x8x128xf32> to vector<8x128xf32>
    %361 = vector.shape_cast %343 : vector<8x128xf32> to vector<1x8x128xf32>
    tpu.vector_store %arg12[%c1_141, %c0_142, %c0_143], %361 {strides = array<i32>} : memref<3x8x128xf32, #tpu.memory_space<vmem>>, vector<1x8x128xf32>,
    %c0_144 = arith.constant 0 : index
    %c0_145 = arith.constant 0 : index
    %362 = vector.load %arg14[%c0_144, %c0_145] : memref<24x128xf32, #tpu.memory_space<vmem>>, vector<24x128xf32>
    %363 = arith.truncf %362 : vector<24x128xf32> to vector<24x128xbf16>
    %c2 = arith.constant 2 : index
    %c0_146 = arith.constant 0 : index
    %c0_147 = arith.constant 0 : index
    %364 = vector.load %arg2[%c2, %c0_146, %c0_147] : memref<3x128x512xbf16, #tpu.memory_space<vmem>>, vector<1x128x512xbf16>
    %365 = vector.shape_cast %364 : vector<1x128x512xbf16> to vector<128x512xbf16>
    %c2_148 = arith.constant 2 : index
    %c0_149 = arith.constant 0 : index
    %c0_150 = arith.constant 0 : index
    %366 = vector.load %arg1[%c2_148, %c0_149, %c0_150] : memref<3x128x512xbf16, #tpu.memory_space<vmem>>, vector<1x128x512xbf16>
    %367 = vector.shape_cast %366 : vector<1x128x512xbf16> to vector<128x512xbf16>
    %cst_151 = arith.constant dense<0.000000e+00> : vector<24x512xf32>
    %368 = tpu.matmul %363, %367, %cst_151 {dimension_numbers = #tpu.dot_dimension_numbers<[1], [0], [0], [1], [0, 0, 1, 1], [], []>} : vector<24x128xbf16>, vector<128x512xbf16>, vector<24x512xf32> -> vector<24x512xf32>
    %c2_152 = arith.constant 2 : index
    %c0_153 = arith.constant 0 : index
    %c0_154 = arith.constant 0 : index
    %369 = vector.load %arg3[%c2_152, %c0_153, %c0_154] : memref<3x1x512xf32, #tpu.memory_space<vmem>>, vector<1x1x512xf32>
    %370 = vector.shape_cast %369 : vector<1x1x512xf32> to vector<1x512xf32>
    %371 = vector.broadcast %370 : vector<1x512xf32> to vector<24x512xf32>
    %372 = arith.addf %368, %371 : vector<24x512xf32>
    %c0_155 = arith.constant 0 : index
    %c0_156 = arith.constant 0 : index
    %373 = vector.load %arg15[%c0_155, %c0_156] : memref<24x512xf32, #tpu.memory_space<vmem>>, vector<24x512xf32>
    tpu.vector_store %arg15[%c0_155, %c0_156], %372 {strides = array<i32>} : memref<24x512xf32, #tpu.memory_space<vmem>>, vector<24x512xf32>,
    %c2_157 = arith.constant 2 : index
    %c0_158 = arith.constant 0 : index
    %c0_159 = arith.constant 0 : index
    %374 = vector.load %arg4[%c2_157, %c0_158, %c0_159] : memref<3x8x128xf32, #tpu.memory_space<vmem>>, vector<1x8x128xf32>
    %375 = vector.shape_cast %374 : vector<1x8x128xf32> to vector<8x128xf32>
    %c2_160 = arith.constant 2 : index
    %c0_161 = arith.constant 0 : index
    %c0_162 = arith.constant 0 : index
    %376 = vector.load %arg5[%c2_160, %c0_161, %c0_162] : memref<3x8x128xf32, #tpu.memory_space<vmem>>, vector<1x8x128xf32>
    %377 = vector.shape_cast %376 : vector<1x8x128xf32> to vector<8x128xf32>
    %c0_i32_163 = arith.constant 0 : i32
    %c8_i32_164 = arith.constant 8 : i32
    %378 = arith.muli %c0_i32_163, %c8_i32_164 : i32
    %379 = tpu.assume_multiple %378, 8 : i32
    %c2_i32_165 = arith.constant 2 : i32
    %380 = arith.subi %c2_i32_165, %c0_i32_163 : i32
    %c8_i32_166 = arith.constant 8 : i32
    %381 = arith.muli %380, %c8_i32_166 : i32
    %382 = tpu.assume_multiple %381, 8 : i32
    %383 = arith.index_cast %379 : i32 to index
    %c0_167 = arith.constant 0 : index
    %384 = vector.load %arg15[%383, %c0_167] : memref<24x512xf32, #tpu.memory_space<vmem>>, vector<8x512xf32>
    %385 = arith.index_cast %382 : i32 to index
    %c0_168 = arith.constant 0 : index
    %386 = vector.load %arg15[%385, %c0_168] : memref<24x512xf32, #tpu.memory_space<vmem>>, vector<8x512xf32>
    %387 = arith.select %18, %384, %386 : vector<8x512xi1>, vector<8x512xf32>
    %388 = arith.truncf %375 : vector<8x128xf32> to vector<8x128xbf16>
    %cst_169 = arith.constant dense<0.000000e+00> : vector<8x512xf32>
    %389 = tpu.matmul %388, %365, %cst_169 {dimension_numbers = #tpu.dot_dimension_numbers<[1], [0], [0], [1], [0, 0, 1, 1], [], []>} : vector<8x128xbf16>, vector<128x512xbf16>, vector<8x512xf32> -> vector<8x512xf32>
    %390 = arith.addf %387, %389 : vector<8x512xf32>
    %391 = vector.extract_strided_slice %390 {offsets = [0, 0], sizes = [8, 128], strides = [1, 1]} : vector<8x512xf32> to vector<8x128xf32>
    %392 = arith.negf %391 : vector<8x128xf32>
    %393 = math.exp %392 : vector<8x128xf32>
    %cst_170 = arith.constant 1.000000e+00 : f32
    %394 = vector.broadcast %cst_170 : f32 to vector<8x128xf32>
    %395 = arith.addf %394, %393 : vector<8x128xf32>
    %396 = arith.divf %394, %395 : vector<8x128xf32>
    %397 = vector.extract_strided_slice %390 {offsets = [0, 128], sizes = [8, 128], strides = [1, 1]} : vector<8x512xf32> to vector<8x128xf32>
    %398 = arith.negf %397 : vector<8x128xf32>
    %399 = math.exp %398 : vector<8x128xf32>
    %cst_171 = arith.constant 1.000000e+00 : f32
    %400 = vector.broadcast %cst_171 : f32 to vector<8x128xf32>
    %401 = arith.addf %400, %399 : vector<8x128xf32>
    %402 = arith.divf %400, %401 : vector<8x128xf32>
    %403 = vector.extract_strided_slice %390 {offsets = [0, 256], sizes = [8, 128], strides = [1, 1]} : vector<8x512xf32> to vector<8x128xf32>
    %404 = math.tanh %403 : vector<8x128xf32>
    %405 = vector.extract_strided_slice %390 {offsets = [0, 384], sizes = [8, 128], strides = [1, 1]} : vector<8x512xf32> to vector<8x128xf32>
    %406 = arith.negf %405 : vector<8x128xf32>
    %407 = math.exp %406 : vector<8x128xf32>
    %cst_172 = arith.constant 1.000000e+00 : f32
    %408 = vector.broadcast %cst_172 : f32 to vector<8x128xf32>
    %409 = arith.addf %408, %407 : vector<8x128xf32>
    %410 = arith.divf %408, %409 : vector<8x128xf32>
    %411 = arith.mulf %402, %377 : vector<8x128xf32>
    %412 = arith.mulf %396, %404 : vector<8x128xf32>
    %413 = arith.addf %411, %412 : vector<8x128xf32>
    %414 = math.tanh %413 : vector<8x128xf32>
    %415 = arith.mulf %410, %414 : vector<8x128xf32>
    %416 = arith.index_cast %379 : i32 to index
    %c0_173 = arith.constant 0 : index
    %417 = vector.load %arg13[%416, %c0_173] : memref<24x128xf32, #tpu.memory_space<vmem>>, vector<8x128xf32>
    %418 = arith.select %21, %415, %417 : vector<8x128xi1>, vector<8x128xf32>
    %419 = arith.index_cast %379 : i32 to index
    %c0_174 = arith.constant 0 : index
    %420 = vector.load %arg13[%419, %c0_174] : memref<24x128xf32, #tpu.memory_space<vmem>>, vector<8x128xf32>
    tpu.vector_store %arg13[%419, %c0_174], %418 {strides = array<i32>} : memref<24x128xf32, #tpu.memory_space<vmem>>, vector<8x128xf32>,
    %421 = arith.index_cast %382 : i32 to index
    %c0_175 = arith.constant 0 : index
    %422 = vector.load %arg13[%421, %c0_175] : memref<24x128xf32, #tpu.memory_space<vmem>>, vector<8x128xf32>
    %423 = arith.select %26, %415, %422 : vector<8x128xi1>, vector<8x128xf32>
    %424 = arith.index_cast %382 : i32 to index
    %c0_176 = arith.constant 0 : index
    %425 = vector.load %arg13[%424, %c0_176] : memref<24x128xf32, #tpu.memory_space<vmem>>, vector<8x128xf32>
    tpu.vector_store %arg13[%424, %c0_176], %423 {strides = array<i32>} : memref<24x128xf32, #tpu.memory_space<vmem>>, vector<8x128xf32>,
    %c1_i32_177 = arith.constant 1 : i32
    %c8_i32_178 = arith.constant 8 : i32
    %426 = arith.muli %c1_i32_177, %c8_i32_178 : i32
    %427 = tpu.assume_multiple %426, 8 : i32
    %c2_i32_179 = arith.constant 2 : i32
    %428 = arith.subi %c2_i32_179, %c1_i32_177 : i32
    %c8_i32_180 = arith.constant 8 : i32
    %429 = arith.muli %428, %c8_i32_180 : i32
    %430 = tpu.assume_multiple %429, 8 : i32
    %431 = arith.index_cast %427 : i32 to index
    %c0_181 = arith.constant 0 : index
    %432 = vector.load %arg15[%431, %c0_181] : memref<24x512xf32, #tpu.memory_space<vmem>>, vector<8x512xf32>
    %433 = arith.index_cast %430 : i32 to index
    %c0_182 = arith.constant 0 : index
    %434 = vector.load %arg15[%433, %c0_182] : memref<24x512xf32, #tpu.memory_space<vmem>>, vector<8x512xf32>
    %435 = arith.select %18, %432, %434 : vector<8x512xi1>, vector<8x512xf32>
    %436 = arith.truncf %415 : vector<8x128xf32> to vector<8x128xbf16>
    %cst_183 = arith.constant dense<0.000000e+00> : vector<8x512xf32>
    %437 = tpu.matmul %436, %365, %cst_183 {dimension_numbers = #tpu.dot_dimension_numbers<[1], [0], [0], [1], [0, 0, 1, 1], [], []>} : vector<8x128xbf16>, vector<128x512xbf16>, vector<8x512xf32> -> vector<8x512xf32>
    %438 = arith.addf %435, %437 : vector<8x512xf32>
    %439 = vector.extract_strided_slice %438 {offsets = [0, 0], sizes = [8, 128], strides = [1, 1]} : vector<8x512xf32> to vector<8x128xf32>
    %440 = arith.negf %439 : vector<8x128xf32>
    %441 = math.exp %440 : vector<8x128xf32>
    %cst_184 = arith.constant 1.000000e+00 : f32
    %442 = vector.broadcast %cst_184 : f32 to vector<8x128xf32>
    %443 = arith.addf %442, %441 : vector<8x128xf32>
    %444 = arith.divf %442, %443 : vector<8x128xf32>
    %445 = vector.extract_strided_slice %438 {offsets = [0, 128], sizes = [8, 128], strides = [1, 1]} : vector<8x512xf32> to vector<8x128xf32>
    %446 = arith.negf %445 : vector<8x128xf32>
    %447 = math.exp %446 : vector<8x128xf32>
    %cst_185 = arith.constant 1.000000e+00 : f32
    %448 = vector.broadcast %cst_185 : f32 to vector<8x128xf32>
    %449 = arith.addf %448, %447 : vector<8x128xf32>
    %450 = arith.divf %448, %449 : vector<8x128xf32>
    %451 = vector.extract_strided_slice %438 {offsets = [0, 256], sizes = [8, 128], strides = [1, 1]} : vector<8x512xf32> to vector<8x128xf32>
    %452 = math.tanh %451 : vector<8x128xf32>
    %453 = vector.extract_strided_slice %438 {offsets = [0, 384], sizes = [8, 128], strides = [1, 1]} : vector<8x512xf32> to vector<8x128xf32>
    %454 = arith.negf %453 : vector<8x128xf32>
    %455 = math.exp %454 : vector<8x128xf32>
    %cst_186 = arith.constant 1.000000e+00 : f32
    %456 = vector.broadcast %cst_186 : f32 to vector<8x128xf32>
    %457 = arith.addf %456, %455 : vector<8x128xf32>
    %458 = arith.divf %456, %457 : vector<8x128xf32>
    %459 = arith.mulf %450, %413 : vector<8x128xf32>
    %460 = arith.mulf %444, %452 : vector<8x128xf32>
    %461 = arith.addf %459, %460 : vector<8x128xf32>
    %462 = math.tanh %461 : vector<8x128xf32>
    %463 = arith.mulf %458, %462 : vector<8x128xf32>
    %464 = arith.index_cast %427 : i32 to index
    %c0_187 = arith.constant 0 : index
    %465 = vector.load %arg13[%464, %c0_187] : memref<24x128xf32, #tpu.memory_space<vmem>>, vector<8x128xf32>
    %466 = arith.select %21, %463, %465 : vector<8x128xi1>, vector<8x128xf32>
    %467 = arith.index_cast %427 : i32 to index
    %c0_188 = arith.constant 0 : index
    %468 = vector.load %arg13[%467, %c0_188] : memref<24x128xf32, #tpu.memory_space<vmem>>, vector<8x128xf32>
    tpu.vector_store %arg13[%467, %c0_188], %466 {strides = array<i32>} : memref<24x128xf32, #tpu.memory_space<vmem>>, vector<8x128xf32>,
    %469 = arith.index_cast %430 : i32 to index
    %c0_189 = arith.constant 0 : index
    %470 = vector.load %arg13[%469, %c0_189] : memref<24x128xf32, #tpu.memory_space<vmem>>, vector<8x128xf32>
    %471 = arith.select %26, %463, %470 : vector<8x128xi1>, vector<8x128xf32>
    %472 = arith.index_cast %430 : i32 to index
    %c0_190 = arith.constant 0 : index
    %473 = vector.load %arg13[%472, %c0_190] : memref<24x128xf32, #tpu.memory_space<vmem>>, vector<8x128xf32>
    tpu.vector_store %arg13[%472, %c0_190], %471 {strides = array<i32>} : memref<24x128xf32, #tpu.memory_space<vmem>>, vector<8x128xf32>,
    %c2_i32_191 = arith.constant 2 : i32
    %c8_i32_192 = arith.constant 8 : i32
    %474 = arith.muli %c2_i32_191, %c8_i32_192 : i32
    %475 = tpu.assume_multiple %474, 8 : i32
    %c2_i32_193 = arith.constant 2 : i32
    %476 = arith.subi %c2_i32_193, %c2_i32_191 : i32
    %c8_i32_194 = arith.constant 8 : i32
    %477 = arith.muli %476, %c8_i32_194 : i32
    %478 = tpu.assume_multiple %477, 8 : i32
    %479 = arith.index_cast %475 : i32 to index
    %c0_195 = arith.constant 0 : index
    %480 = vector.load %arg15[%479, %c0_195] : memref<24x512xf32, #tpu.memory_space<vmem>>, vector<8x512xf32>
    %481 = arith.index_cast %478 : i32 to index
    %c0_196 = arith.constant 0 : index
    %482 = vector.load %arg15[%481, %c0_196] : memref<24x512xf32, #tpu.memory_space<vmem>>, vector<8x512xf32>
    %483 = arith.select %18, %480, %482 : vector<8x512xi1>, vector<8x512xf32>
    %484 = arith.truncf %463 : vector<8x128xf32> to vector<8x128xbf16>
    %cst_197 = arith.constant dense<0.000000e+00> : vector<8x512xf32>
    %485 = tpu.matmul %484, %365, %cst_197 {dimension_numbers = #tpu.dot_dimension_numbers<[1], [0], [0], [1], [0, 0, 1, 1], [], []>} : vector<8x128xbf16>, vector<128x512xbf16>, vector<8x512xf32> -> vector<8x512xf32>
    %486 = arith.addf %483, %485 : vector<8x512xf32>
    %487 = vector.extract_strided_slice %486 {offsets = [0, 0], sizes = [8, 128], strides = [1, 1]} : vector<8x512xf32> to vector<8x128xf32>
    %488 = arith.negf %487 : vector<8x128xf32>
    %489 = math.exp %488 : vector<8x128xf32>
    %cst_198 = arith.constant 1.000000e+00 : f32
    %490 = vector.broadcast %cst_198 : f32 to vector<8x128xf32>
    %491 = arith.addf %490, %489 : vector<8x128xf32>
    %492 = arith.divf %490, %491 : vector<8x128xf32>
    %493 = vector.extract_strided_slice %486 {offsets = [0, 128], sizes = [8, 128], strides = [1, 1]} : vector<8x512xf32> to vector<8x128xf32>
    %494 = arith.negf %493 : vector<8x128xf32>
    %495 = math.exp %494 : vector<8x128xf32>
    %cst_199 = arith.constant 1.000000e+00 : f32
    %496 = vector.broadcast %cst_199 : f32 to vector<8x128xf32>
    %497 = arith.addf %496, %495 : vector<8x128xf32>
    %498 = arith.divf %496, %497 : vector<8x128xf32>
    %499 = vector.extract_strided_slice %486 {offsets = [0, 256], sizes = [8, 128], strides = [1, 1]} : vector<8x512xf32> to vector<8x128xf32>
    %500 = math.tanh %499 : vector<8x128xf32>
    %501 = vector.extract_strided_slice %486 {offsets = [0, 384], sizes = [8, 128], strides = [1, 1]} : vector<8x512xf32> to vector<8x128xf32>
    %502 = arith.negf %501 : vector<8x128xf32>
    %503 = math.exp %502 : vector<8x128xf32>
    %cst_200 = arith.constant 1.000000e+00 : f32
    %504 = vector.broadcast %cst_200 : f32 to vector<8x128xf32>
    %505 = arith.addf %504, %503 : vector<8x128xf32>
    %506 = arith.divf %504, %505 : vector<8x128xf32>
    %507 = arith.mulf %498, %461 : vector<8x128xf32>
    %508 = arith.mulf %492, %500 : vector<8x128xf32>
    %509 = arith.addf %507, %508 : vector<8x128xf32>
    %510 = math.tanh %509 : vector<8x128xf32>
    %511 = arith.mulf %506, %510 : vector<8x128xf32>
    %512 = arith.index_cast %475 : i32 to index
    %c0_201 = arith.constant 0 : index
    %513 = vector.load %arg13[%512, %c0_201] : memref<24x128xf32, #tpu.memory_space<vmem>>, vector<8x128xf32>
    %514 = arith.select %21, %511, %513 : vector<8x128xi1>, vector<8x128xf32>
    %515 = arith.index_cast %475 : i32 to index
    %c0_202 = arith.constant 0 : index
    %516 = vector.load %arg13[%515, %c0_202] : memref<24x128xf32, #tpu.memory_space<vmem>>, vector<8x128xf32>
    tpu.vector_store %arg13[%515, %c0_202], %514 {strides = array<i32>} : memref<24x128xf32, #tpu.memory_space<vmem>>, vector<8x128xf32>,
    %517 = arith.index_cast %478 : i32 to index
    %c0_203 = arith.constant 0 : index
    %518 = vector.load %arg13[%517, %c0_203] : memref<24x128xf32, #tpu.memory_space<vmem>>, vector<8x128xf32>
    %519 = arith.select %26, %511, %518 : vector<8x128xi1>, vector<8x128xf32>
    %520 = arith.index_cast %478 : i32 to index
    %c0_204 = arith.constant 0 : index
    %521 = vector.load %arg13[%520, %c0_204] : memref<24x128xf32, #tpu.memory_space<vmem>>, vector<8x128xf32>
    tpu.vector_store %arg13[%520, %c0_204], %519 {strides = array<i32>} : memref<24x128xf32, #tpu.memory_space<vmem>>, vector<8x128xf32>,
    %c3_i32_205 = arith.constant 3 : i32
    %c2_206 = arith.constant 2 : index
    %c0_207 = arith.constant 0 : index
    %c0_208 = arith.constant 0 : index
    %522 = vector.load %arg11[%c2_206, %c0_207, %c0_208] : memref<3x8x128xf32, #tpu.memory_space<vmem>>, vector<1x8x128xf32>
    %523 = vector.shape_cast %522 : vector<1x8x128xf32> to vector<8x128xf32>
    %524 = vector.shape_cast %511 : vector<8x128xf32> to vector<1x8x128xf32>
    tpu.vector_store %arg11[%c2_206, %c0_207, %c0_208], %524 {strides = array<i32>} : memref<3x8x128xf32, #tpu.memory_space<vmem>>, vector<1x8x128xf32>,
    %c2_209 = arith.constant 2 : index
    %c0_210 = arith.constant 0 : index
    %c0_211 = arith.constant 0 : index
    %525 = vector.load %arg12[%c2_209, %c0_210, %c0_211] : memref<3x8x128xf32, #tpu.memory_space<vmem>>, vector<1x8x128xf32>
    %526 = vector.shape_cast %525 : vector<1x8x128xf32> to vector<8x128xf32>
    %527 = vector.shape_cast %509 : vector<8x128xf32> to vector<1x8x128xf32>
    tpu.vector_store %arg12[%c2_209, %c0_210, %c0_211], %527 {strides = array<i32>} : memref<3x8x128xf32, #tpu.memory_space<vmem>>, vector<1x8x128xf32>,
    %c0_212 = arith.constant 0 : index
    %c0_213 = arith.constant 0 : index
    %528 = vector.load %arg7[%c0_212, %c0_213] : memref<1x384xf32, #tpu.memory_space<vmem>>, vector<1x384xf32>
    %c0_214 = arith.constant 0 : index
    %c0_215 = arith.constant 0 : index
    %529 = vector.load %arg13[%c0_214, %c0_215] : memref<24x128xf32, #tpu.memory_space<vmem>>, vector<8x128xf32>
    %530 = arith.truncf %529 : vector<8x128xf32> to vector<8x128xbf16>
    %c0_216 = arith.constant 0 : index
    %c0_217 = arith.constant 0 : index
    %c0_218 = arith.constant 0 : index
    %531 = vector.load %arg6[%c0_216, %c0_217, %c0_218] : memref<3x128x384xbf16, #tpu.memory_space<vmem>>, vector<1x128x384xbf16>
    %532 = vector.shape_cast %531 : vector<1x128x384xbf16> to vector<128x384xbf16>
    %cst_219 = arith.constant dense<0.000000e+00> : vector<8x384xf32>
    %533 = tpu.matmul %530, %532, %cst_219 {dimension_numbers = #tpu.dot_dimension_numbers<[1], [0], [0], [1], [0, 0, 1, 1], [], []>} : vector<8x128xbf16>, vector<128x384xbf16>, vector<8x384xf32> -> vector<8x384xf32>
    %534 = vector.broadcast %528 : vector<1x384xf32> to vector<8x384xf32>
    %535 = arith.addf %534, %533 : vector<8x384xf32>
    %c8 = arith.constant 8 : index
    %c0_220 = arith.constant 0 : index
    %536 = vector.load %arg13[%c8, %c0_220] : memref<24x128xf32, #tpu.memory_space<vmem>>, vector<8x128xf32>
    %537 = arith.truncf %536 : vector<8x128xf32> to vector<8x128xbf16>
    %c1_221 = arith.constant 1 : index
    %c0_222 = arith.constant 0 : index
    %c0_223 = arith.constant 0 : index
    %538 = vector.load %arg6[%c1_221, %c0_222, %c0_223] : memref<3x128x384xbf16, #tpu.memory_space<vmem>>, vector<1x128x384xbf16>
    %539 = vector.shape_cast %538 : vector<1x128x384xbf16> to vector<128x384xbf16>
    %cst_224 = arith.constant dense<0.000000e+00> : vector<8x384xf32>
    %540 = tpu.matmul %537, %539, %cst_224 {dimension_numbers = #tpu.dot_dimension_numbers<[1], [0], [0], [1], [0, 0, 1, 1], [], []>} : vector<8x128xbf16>, vector<128x384xbf16>, vector<8x384xf32> -> vector<8x384xf32>
    %541 = arith.addf %535, %540 : vector<8x384xf32>
    %c16 = arith.constant 16 : index
    %c0_225 = arith.constant 0 : index
    %542 = vector.load %arg13[%c16, %c0_225] : memref<24x128xf32, #tpu.memory_space<vmem>>, vector<8x128xf32>
    %543 = arith.truncf %542 : vector<8x128xf32> to vector<8x128xbf16>
    %c2_226 = arith.constant 2 : index
    %c0_227 = arith.constant 0 : index
    %c0_228 = arith.constant 0 : index
    %544 = vector.load %arg6[%c2_226, %c0_227, %c0_228] : memref<3x128x384xbf16, #tpu.memory_space<vmem>>, vector<1x128x384xbf16>
    %545 = vector.shape_cast %544 : vector<1x128x384xbf16> to vector<128x384xbf16>
    %cst_229 = arith.constant dense<0.000000e+00> : vector<8x384xf32>
    %546 = tpu.matmul %543, %545, %cst_229 {dimension_numbers = #tpu.dot_dimension_numbers<[1], [0], [0], [1], [0, 0, 1, 1], [], []>} : vector<8x128xbf16>, vector<128x384xbf16>, vector<8x384xf32> -> vector<8x384xf32>
    %547 = arith.addf %541, %546 : vector<8x384xf32>
    %548 = arith.truncf %547 : vector<8x384xf32> to vector<8x384xbf16>
    %c0_230 = arith.constant 0 : index
    %c0_231 = arith.constant 0 : index
    %549 = vector.load %arg8[%c0_230, %c0_231] : memref<384x128xbf16, #tpu.memory_space<vmem>>, vector<384x128xbf16>
    %cst_232 = arith.constant dense<0.000000e+00> : vector<8x128xf32>
    %550 = tpu.matmul %548, %549, %cst_232 {dimension_numbers = #tpu.dot_dimension_numbers<[1], [0], [0], [1], [0, 0, 1, 1], [], []>} : vector<8x384xbf16>, vector<384x128xbf16>, vector<8x128xf32> -> vector<8x128xf32>
    %c0_233 = arith.constant 0 : index
    %c0_234 = arith.constant 0 : index
    %551 = vector.load %arg9[%c0_233, %c0_234] : memref<1x128xf32, #tpu.memory_space<vmem>>, vector<1x128xf32>
    %552 = vector.broadcast %551 : vector<1x128xf32> to vector<8x128xf32>
    %553 = arith.addf %550, %552 : vector<8x128xf32>
    %c0_235 = arith.constant 0 : index
    %c0_236 = arith.constant 0 : index
    %554 = vector.load %arg10[%c0_235, %c0_236] : memref<8x128xf32, #tpu.memory_space<vmem>>, vector<8x128xf32>
    tpu.vector_store %arg10[%c0_235, %c0_236], %553 {strides = array<i32>} : memref<8x128xf32, #tpu.memory_space<vmem>>, vector<8x128xf32>,
    return
  }
}

</mosaic_0001>

<bundles_post_ra>
// kernel: tpu_custom_call.1
= control target key start
LH: loop header
LB: loop body
LE: loop exit
PB: predicated region body
PF: predicated region fallthrough
CT: control target
= control target key end

     0   :  { %18 = vsyncpa [#allocation6], 0  ;;  %s6559_s0 = inlined_call_operand.hbm [shape: bf16[24,128], index: 0, kind: input, shape index: {}]   ;;  %s6560_s1 = inlined_call_operand.hbm [shape: bf16[3,128,512], index: 1, kind: input, shape index: {}]   ;;  %s6561_s2 = inlined_call_operand.hbm [shape: bf16[3,128,512], index: 2, kind: input, shape index: {}]   ;;  %s6562_s3 = inlined_call_operand.hbm [shape: f32[3,1,512], index: 3, kind: input, shape index: {}]   ;;  %s6563_s4 = inlined_call_operand.hbm [shape: f32[3,8,128], index: 4, kind: input, shape index: {}]   ;;  %s6564_s5 = inlined_call_operand.hbm [shape: f32[3,8,128], index: 5, kind: input, shape index: {}]   ;;  %s6565_s6 = inlined_call_operand.hbm [shape: bf16[3,128,384], index: 6, kind: input, shape index: {}]   ;;  %s6566_s7 = inlined_call_operand.vmem [shape: f32[1,384], index: 7, kind: input, shape index: {}]   ;;  %s6567_s8 = inlined_call_operand.hbm [shape: bf16[384,128], index: 8, kind: input, shape index: {}]   ;;  %s6568_s9 = inlined_call_operand.vmem [shape: f32[1,128], index: 9, kind: input, shape index: {}]   ;;  %s6569_s10 = inlined_call_operand.hbm [shape: f32[8,128], index: 10, kind: output, shape index: {0}]   ;;  %s6570_s11 = inlined_call_operand.hbm [shape: f32[3,8,128], index: 11, kind: output, shape index: {1}]   ;;  %s6571_s12 = inlined_call_operand.hbm [shape: f32[3,8,128], index: 12, kind: output, shape index: {2}]  }
   0x1   :  { %19 = vsyncpa [#allocation9], 0 }
   0x2   :  { %20 = vsyncpa [#allocation12], 0 }
   0x3   :  { %21 = vsyncpa [#allocation15], 0 }
   0x4   :  { %22 = vsyncpa [#allocation18], 0 }
   0x5   :  { %23 = vsyncpa [#allocation7], 0 }
   0x6   :  { %24 = vsyncpa [#allocation21], 0  ;;  %s5375_s21 = smov [#allocation8]   ;;  %s5119_s25 = scalar_lea.hbm %s6560_s1, 12288 }
   0x7   :  { %s42_s22 = sshll.u32 %s5375_s21, 4  ;;  %p5120_p0 = scmp.ne.s32.totalorder %s6560_s1, %s5119_s25  ;;  %s43_s22 = int_to_ptr.vmem [resolvable:$true] %s42_s22 }
   0x8   :  { %p5123_p1 = scmp.lt.u32.totalorder %s5119_s25, %s6560_s1 }
   0xa   :  { %p5125_p2 = pnand %p5123_p1, %p5120_p0 }
   0xc   :  { %5128 = shalt.err (!%p5125_p2)
}
   0xd   :  { %s5129_s30 = scalar_lea.vmem %s43_s22, 12288  ;;  %p5134_p4 = scmp.lt.s32.totalorder %s43_s22, %s43_s22 }
   0xe   :  { %p5130_p3 = scmp.ne.s32.totalorder %s43_s22, %s5129_s30  ;;  %p5135_p5 = scmp.lt.s32.totalorder %s5129_s30, %s5129_s30 }
  0x10   :  { %p5136_p6 = por %p5135_p5, %p5134_p4 }
  0x12   :  { %p5137_p7 = pnand %p5136_p6, %p5130_p3 }
  0x14   :  { %5140 = shalt.err (!%p5137_p7)
}
  0x15   :  { %s5376_s13 = smov 256   ;;  %s5377_s14 = smov 16  }
  0x16   :  { %48 = dma.hbm_to_vmem [thread:$0]  %s6560_s1, 12288, %s43_s22, [#allocation9], %s5376_s13, %s5376_s13, %s5377_s14  }
  0x17   :  { %s5378_s17 = smov [#allocation11]   ;;  %s5141_s21 = scalar_lea.hbm %s6562_s3, 192 }
  0x18   :  { %s66_s18 = sshll.u32 %s5378_s17, 4  ;;  %p5142_p8 = scmp.ne.s32.totalorder %s6562_s3, %s5141_s21  ;;  %s67_s18 = int_to_ptr.vmem [resolvable:$true] %s66_s18 }
  0x19   :  { %p5145_p9 = scmp.lt.u32.totalorder %s5141_s21, %s6562_s3 }
  0x1b   :  { %p5147_p10 = pnand %p5145_p9, %p5142_p8 }
  0x1d   :  { %5150 = shalt.err (!%p5147_p10)
}
  0x1e   :  { %s5151_s27 = scalar_lea.vmem %s67_s18, 192  ;;  %p5156_p12 = scmp.lt.s32.totalorder %s67_s18, %s67_s18 }
  0x1f   :  { %p5152_p11 = scmp.ne.s32.totalorder %s67_s18, %s5151_s27  ;;  %p5157_p13 = scmp.lt.s32.totalorder %s5151_s27, %s5151_s27 }
  0x21   :  { %p5158_p0 = por %p5157_p13, %p5156_p12 }
  0x23   :  { %p5159_p1 = pnand %p5158_p0, %p5152_p11 }
  0x25   :  { %5162 = shalt.err (!%p5159_p1)
}
  0x26   :  { %s5379_s1 = smov 64   ;;  %s5380_s22 = smov 4  }
  0x27   :  { %72 = dma.hbm_to_vmem [thread:$0]  %s6562_s3, 192, %s67_s18, [#allocation12], %s5379_s1, %s5379_s1, %s5380_s22  }
  0x28   :  { %s5381_s30 = smov [#allocation14]   ;;  %s5382_s16 = smov [#allocation5]  }
  0x29   :  { %s90_s15 = sshll.u32 %s5381_s30, 4  ;;  %s30_s17 = sshll.u32 %s5382_s16, 4  ;;  %s91_s15 = int_to_ptr.vmem [resolvable:$true] %s90_s15  ;;  %s5492_s17 = int_to_ptr.vmem [resolvable:$true] %s30_s17 }
  0x2a   :  { %s5163_s21 = scalar_lea.hbm %s6564_s5, 384 }
  0x2b   :  { %p5164_p2 = scmp.ne.s32.totalorder %s6564_s5, %s5163_s21  ;;  %p5167_p3 = scmp.lt.u32.totalorder %s5163_s21, %s6564_s5 }
  0x2d   :  { %p5169_p4 = pnand %p5167_p3, %p5164_p2 }
  0x2f   :  { %5172 = shalt.err (!%p5169_p4)
}
  0x30   :  { %s5173_s3 = scalar_lea.vmem %s91_s15, 384  ;;  %p5178_p6 = scmp.lt.s32.totalorder %s91_s15, %s91_s15 }
  0x31   :  { %p5174_p5 = scmp.ne.s32.totalorder %s91_s15, %s5173_s3  ;;  %p5179_p7 = scmp.lt.s32.totalorder %s5173_s3, %s5173_s3 }
  0x33   :  { %p5180_p8 = por %p5179_p7, %p5178_p6 }
  0x35   :  { %p5181_p9 = pnand %p5180_p8, %p5174_p5 }
  0x37   :  { %5184 = shalt.err (!%p5181_p9)
}
  0x38   :  { %s5383_s18 = smov 128   ;;  %s5384_s27 = smov 8  }
  0x39   :  { %96 = dma.hbm_to_vmem [thread:$0]  %s6564_s5, 384, %s91_s15, [#allocation15], %s5383_s18, %s5383_s18, %s5384_s27  }
  0x3a   :  { %s5185_s19 = scalar_lea.hbm %s6559_s0, 192 }
  0x3b   :  { %p5186_p10 = scmp.ne.s32.totalorder %s6559_s0, %s5185_s19  ;;  %p5189_p11 = scmp.lt.u32.totalorder %s5185_s19, %s6559_s0 }
  0x3d   :  { %p5191_p12 = pnand %p5189_p11, %p5186_p10 }
  0x3f   :  { %5194 = shalt.err (!%p5191_p12)
}
  0x40   :  { %s5195_s25 = scalar_lea.vmem %s5492_s17, 192  ;;  %p5200_p0 = scmp.lt.s32.totalorder %s5492_s17, %s5492_s17 }
  0x41   :  { %p5196_p13 = scmp.ne.s32.totalorder %s5492_s17, %s5195_s25  ;;  %p5201_p1 = scmp.lt.s32.totalorder %s5195_s25, %s5195_s25 }
  0x43   :  { %p5202_p2 = por %p5201_p1, %p5200_p0 }
  0x45   :  { %p5203_p3 = pnand %p5202_p2, %p5196_p13 }
  0x47   :  { %5206 = shalt.err (!%p5203_p3)
}
  0x48   :  { %36 = dma.hbm_to_vmem [thread:$0]  %s6559_s0, 192, %s5492_s17, [#allocation6], %s5379_s1, %s5379_s1, %s5380_s22  }
  0x49   :  { %s5385_s26 = smov [#allocation10]   ;;  %s5386_s28 = smov [#allocation13]  }
  0x4a   :  { %s54_s3 = sshll.u32 %s5385_s26, 4  ;;  %s78_s29 = sshll.u32 %s5386_s28, 4  ;;  %s55_s3 = int_to_ptr.vmem [resolvable:$true] %s54_s3  ;;  %s5529_s29 = int_to_ptr.vmem [resolvable:$true] %s78_s29 }
  0x4b   :  { %s5207_s19 = scalar_lea.hbm %s6561_s2, 12288 }
  0x4c   :  { %p5208_p4 = scmp.ne.s32.totalorder %s6561_s2, %s5207_s19  ;;  %p5211_p5 = scmp.lt.u32.totalorder %s5207_s19, %s6561_s2 }
  0x4e   :  { %p5213_p6 = pnand %p5211_p5, %p5208_p4 }
  0x50   :  { %5216 = shalt.err (!%p5213_p6)
}
  0x51   :  { %s5217_s0 = scalar_lea.vmem %s55_s3, 12288  ;;  %p5222_p8 = scmp.lt.s32.totalorder %s55_s3, %s55_s3 }
  0x52   :  { %p5218_p7 = scmp.ne.s32.totalorder %s55_s3, %s5217_s0  ;;  %p5223_p9 = scmp.lt.s32.totalorder %s5217_s0, %s5217_s0 }
  0x54   :  { %p5224_p10 = por %p5223_p9, %p5222_p8 }
  0x56   :  { %p5225_p11 = pnand %p5224_p10, %p5218_p7 }
  0x58   :  { %5228 = shalt.err (!%p5225_p11)
}
  0x59   :  { %60 = dma.hbm_to_vmem [thread:$0]  %s6561_s2, 12288, %s55_s3, [#allocation9], %s5376_s13, %s5376_s13, %s5377_s14  }
  0x5a   :  { %s5229_s26 = scalar_lea.hbm %s6563_s4, 384 }
  0x5b   :  { %p5230_p12 = scmp.ne.s32.totalorder %s6563_s4, %s5229_s26  ;;  %p5233_p13 = scmp.lt.u32.totalorder %s5229_s26, %s6563_s4 }
  0x5d   :  { %p5235_p0 = pnand %p5233_p13, %p5230_p12 }
  0x5f   :  { %5238 = shalt.err (!%p5235_p0)
}
  0x60   :  { %s5239_s20 = scalar_lea.vmem %s5529_s29, 384  ;;  %p5244_p2 = scmp.lt.s32.totalorder %s5529_s29, %s5529_s29 }
  0x61   :  { %p5240_p1 = scmp.ne.s32.totalorder %s5529_s29, %s5239_s20  ;;  %p5245_p3 = scmp.lt.s32.totalorder %s5239_s20, %s5239_s20 }
  0x63   :  { %p5246_p4 = por %p5245_p3, %p5244_p2 }
  0x65   :  { %p5247_p5 = pnand %p5246_p4, %p5240_p1 }
  0x67   :  { %5250 = shalt.err (!%p5247_p5)
}
  0x68   :  { %84 = dma.hbm_to_vmem [thread:$0]  %s6563_s4, 384, %s5529_s29, [#allocation12], %s5383_s18, %s5383_s18, %s5384_s27  }
  0x69   :  { %s5387_s14 = smov [#allocation16]   ;;  %s5251_s24 = scalar_lea.hbm %s6565_s6, 9216 }
  0x6a   :  { %s102_s3 = sshll.u32 %s5387_s14, 4  ;;  %p5252_p6 = scmp.ne.s32.totalorder %s6565_s6, %s5251_s24  ;;  %s103_s3 = int_to_ptr.vmem [resolvable:$true] %s102_s3 }
  0x6b   :  { %p5255_p7 = scmp.lt.u32.totalorder %s5251_s24, %s6565_s6 }
  0x6d   :  { %p5257_p8 = pnand %p5255_p7, %p5252_p6 }
  0x6f   :  { %5260 = shalt.err (!%p5257_p8)
}
  0x70   :  { %s5261_s15 = scalar_lea.vmem %s103_s3, 9216  ;;  %p5266_p10 = scmp.lt.s32.totalorder %s103_s3, %s103_s3 }
  0x71   :  { %p5262_p9 = scmp.ne.s32.totalorder %s103_s3, %s5261_s15  ;;  %p5267_p11 = scmp.lt.s32.totalorder %s5261_s15, %s5261_s15 }
  0x73   :  { %p5268_p12 = por %p5267_p11, %p5266_p10 }
  0x75   :  { %p5269_p13 = pnand %p5268_p12, %p5262_p9 }
  0x77   :  { %5272 = shalt.err (!%p5269_p13)
}
  0x78   :  { %s5388_s4 = smov 192   ;;  %s5389_s29 = smov 12  }
  0x79   :  { %108 = dma.hbm_to_vmem [thread:$0]  %s6565_s6, 9216, %s103_s3, [#allocation15], %s5388_s4, %s5388_s4, %s5389_s29  }
  0x7a   :  { %s5390_s30 = smov [#allocation17]   ;;  %s5273_s2 = scalar_lea.hbm %s6567_s8, 3072 }
  0x7b   :  { %s116_s16 = sshll.u32 %s5390_s30, 4  ;;  %p5274_p0 = scmp.ne.s32.totalorder %s6567_s8, %s5273_s2  ;;  %s117_s16 = int_to_ptr.vmem [resolvable:$true] %s116_s16 }
  0x7c   :  { %p5277_p1 = scmp.lt.u32.totalorder %s5273_s2, %s6567_s8 }
  0x7e   :  { %p5279_p2 = pnand %p5277_p1, %p5274_p0 }
  0x80   :  { %5282 = shalt.err (!%p5279_p2)
}
  0x81   :  { %s5283_s24 = scalar_lea.vmem %s117_s16, 3072  ;;  %p5288_p4 = scmp.lt.s32.totalorder %s117_s16, %s117_s16 }
  0x82   :  { %p5284_p3 = scmp.ne.s32.totalorder %s117_s16, %s5283_s24  ;;  %p5289_p5 = scmp.lt.s32.totalorder %s5283_s24, %s5283_s24 }
  0x84   :  { %p5290_p6 = por %p5289_p5, %p5288_p4 }
  0x86   :  { %p5291_p7 = pnand %p5290_p6, %p5284_p3 }
  0x88   :  { %5294 = shalt.err (!%p5291_p7)
}
  0x89   :  { %122 = dma.hbm_to_vmem [thread:$0]  %s6567_s8, 3072, %s117_s16, [#allocation18], %s5379_s1, %s5379_s1, %s5380_s22  }
  0x8a   :  { %5361 = dma.done.wait [#allocation6], 192  }
  0x8b   :  { %5362 = vsyncadd [#allocation6], 4294967104 }
  0x8c   :  { %5363 = dma.done.wait [#allocation9], 24576  }
  0x8d   :  { %5364 = vsyncadd [#allocation9], 4294942720 }
  0x8e   :  { %5365 = dma.done.wait [#allocation12], 576  }
  0x8f   :  { %5366 = vsyncadd [#allocation12], 4294966720 }
  0x90   :  { %5367 = dma.done.wait [#allocation15], 9600  }
  0x91   :  { %5368 = vsyncadd [#allocation15], 4294957696 }
  0x92   :  { %5369 = dma.done.wait [#allocation18], 3072  }
  0x93   :  { %5370 = vsyncadd [#allocation18], 4294964224  ;;  %v6572_v0 = vmov 0   ;;  %v4565_v1 = vld [vmem:[#allocation8 + $0x4] ss:$16 sps:$4 sm:$0xff]   ;;  %vm5393_vm5 = vmmov 0  }
  0x94   :  { %508 = vmatprep.mubr.bf16.mxu0 %v6572_v0  ;;  %559 = vmatprep.mubr.bf16.mxu1 %v6572_v0  ;;  %v4567_v2 = vld [vmem:[#allocation8 + $0xc] ss:$16 sps:$4 sm:$0xff]   ;;  %v4569_v3 = vld [vmem:[#allocation8] ss:$16 sps:$4 sm:$0xff]   ;;  %v4570_v4 = vld [vmem:[#allocation8 + $0x8] ss:$16 sps:$4 sm:$0xff]  }
  0x95   :  { %476 = vmatprep.subr.bf16.mxu0 %v4565_v1  ;;  %527 = vmatprep.subr.bf16.mxu1 %v4567_v2  ;;  %v4571_v5 = vld [vmem:[#allocation8 + $0x24] ss:$16 sps:$4 sm:$0xff]   ;;  %v4573_v6 = vld [vmem:[#allocation8 + $0x2c] ss:$16 sps:$4 sm:$0xff]   ;;  %v4575_v7 = vld [vmem:[#allocation8 + $0x20] ss:$16 sps:$4 sm:$0xff]  }
  0x96   :  { %477 = vmatpush1.bf16.msra.mxu0 %v4569_v3  ;;  %528 = vmatpush1.bf16.msra.mxu1 %v4570_v4  ;;  %v4576_v8 = vld [vmem:[#allocation8 + $0x28] ss:$16 sps:$4 sm:$0xff]   ;;  %v4577_v9 = vld [vmem:[#allocation8 + $0x44] ss:$16 sps:$4 sm:$0xff]   ;;  %v4579_v10 = vld [vmem:[#allocation8 + $0x4c] ss:$16 sps:$4 sm:$0xff]  }
  0x97   :  { %478 = vmatprep.subr.bf16.mxu0 %v4571_v5  ;;  %529 = vmatprep.subr.bf16.mxu1 %v4573_v6  ;;  %v4581_v11 = vld [vmem:[#allocation8 + $0x40] ss:$16 sps:$4 sm:$0xff]   ;;  %v4582_v12 = vld [vmem:[#allocation8 + $0x48] ss:$16 sps:$4 sm:$0xff]   ;;  %v4583_v13 = vld [vmem:[#allocation8 + $0x64] ss:$16 sps:$4 sm:$0xff]   ;;  %v150_v6 = vlaneseq }
  0x98   :  { %v4585_v14 = vld [vmem:[#allocation8 + $0x6c] ss:$16 sps:$4 sm:$0xff]   ;;  %v4587_v15 = vld [vmem:[#allocation8 + $0x60] ss:$16 sps:$4 sm:$0xff]   ;;  %v4588_v16 = vld [vmem:[#allocation8 + $0x68] ss:$16 sps:$4 sm:$0xff]  }
  0x99   :  { %v4589_v17 = vld [vmem:[#allocation8 + $0x84] ss:$16 sps:$4 sm:$0xff]   ;;  %v4591_v18 = vld [vmem:[#allocation8 + $0x8c] ss:$16 sps:$4 sm:$0xff]   ;;  %v4593_v19 = vld [vmem:[#allocation8 + $0x80] ss:$16 sps:$4 sm:$0xff]  }
  0x9a   :  { %479 = vmatpush1.bf16.msra.mxu0 %v4575_v7  ;;  %530 = vmatpush1.bf16.msra.mxu1 %v4576_v8  ;;  %v4594_v20 = vld [vmem:[#allocation8 + $0x88] ss:$16 sps:$4 sm:$0xff]   ;;  %v4595_v21 = vld [vmem:[#allocation8 + $0xa4] ss:$16 sps:$4 sm:$0xff]   ;;  %v4597_v22 = vld [vmem:[#allocation8 + $0xac] ss:$16 sps:$4 sm:$0xff]  }
  0x9b   :  { %480 = vmatprep.subr.bf16.mxu0 %v4577_v9  ;;  %531 = vmatprep.subr.bf16.mxu1 %v4579_v10  ;;  %v4599_v23 = vld [vmem:[#allocation8 + $0xa0] ss:$16 sps:$4 sm:$0xff]   ;;  %v4600_v24 = vld [vmem:[#allocation8 + $0xa8] ss:$16 sps:$4 sm:$0xff]   ;;  %v4601_v25 = vld [vmem:[#allocation8 + $0xc4] ss:$16 sps:$4 sm:$0xff]  }
  0x9c   :  { %v4603_v26 = vld [vmem:[#allocation8 + $0xcc] ss:$16 sps:$4 sm:$0xff]   ;;  %v4605_v27 = vld [vmem:[#allocation8 + $0xc0] ss:$16 sps:$4 sm:$0xff]   ;;  %v4606_v28 = vld [vmem:[#allocation8 + $0xc8] ss:$16 sps:$4 sm:$0xff]  }
  0x9d   :  { %v4607_v29 = vld [vmem:[#allocation8 + $0xe4] ss:$16 sps:$4 sm:$0xff]   ;;  %v4609_v30 = vld [vmem:[#allocation8 + $0xec] ss:$16 sps:$4 sm:$0xff]   ;;  %v4611_v31 = vld [vmem:[#allocation8 + $0xe0] ss:$16 sps:$4 sm:$0xff]  }
  0x9e   :  { %481 = vmatpush1.bf16.msra.mxu0 %v4581_v11  ;;  %532 = vmatpush1.bf16.msra.mxu1 %v4582_v12  ;;  %v4612_v32 = vld [vmem:[#allocation8 + $0xe8] ss:$16 sps:$4 sm:$0xff]   ;;  %v5595_v33 = vld [vmem:[#allocation10 + $0x4] ss:$16 sps:$4 sm:$0xff]   ;;  %v5597_v34 = vld [vmem:[#allocation10 + $0xc] ss:$16 sps:$4 sm:$0xff]  }
  0x9f   :  { %482 = vmatprep.subr.bf16.mxu0 %v4583_v13  ;;  %533 = vmatprep.subr.bf16.mxu1 %v4585_v14  ;;  %v4613_v35 = vld [vmem:[#allocation5] sm:$0xff]   ;;  %v5599_v36 = vld [vmem:[#allocation10] ss:$16 sps:$4 sm:$0xff]   ;;  %v5607_v39 = vld [vmem:[#allocation10 + $0x2c] ss:$16 sps:$4 sm:$0xff]   ;;  %v287_v7 = vshrl.u32 %v150_v6, 7 }
  0xa0   :  { %v5601_v37 = vld [vmem:[#allocation10 + $0x8] ss:$16 sps:$4 sm:$0xff]   ;;  %v5605_v38 = vld [vmem:[#allocation10 + $0x24] ss:$16 sps:$4 sm:$0xff]   ;;  %v5609_v40 = vld [vmem:[#allocation10 + $0x20] ss:$16 sps:$4 sm:$0xff]  }
  0xa1   :  { %v5613_v41 = vld [vmem:[#allocation10 + $0x28] ss:$16 sps:$4 sm:$0xff]   ;;  %v5617_v42 = vld [vmem:[#allocation10 + $0x44] ss:$16 sps:$4 sm:$0xff]   ;;  %v5619_v43 = vld [vmem:[#allocation10 + $0x4c] ss:$16 sps:$4 sm:$0xff]  }
  0xa2   :  { %483 = vmatpush1.bf16.msra.mxu0 %v4587_v15  ;;  %534 = vmatpush1.bf16.msra.mxu1 %v4588_v16  ;;  %v4626_v44 = vld [vmem:[#allocation5 + $0x8] ss:$0 sps:$4 sm:$0xff]   ;;  %v5623_v45 = vld [vmem:[#allocation10 + $0x40] ss:$16 sps:$4 sm:$0xff]   ;;  %v5627_v46 = vld [vmem:[#allocation10 + $0x48] ss:$16 sps:$4 sm:$0xff]  }
  0xa3   :  { %484 = vmatprep.subr.bf16.mxu0 %v4589_v17  ;;  %535 = vmatprep.subr.bf16.mxu1 %v4591_v18  ;;  %v5631_v47 = vld [vmem:[#allocation10 + $0x64] ss:$16 sps:$4 sm:$0xff]   ;;  %v5633_v48 = vld [vmem:[#allocation10 + $0x6c] ss:$16 sps:$4 sm:$0xff]   ;;  %v5635_v49 = vld [vmem:[#allocation10 + $0x60] ss:$16 sps:$4 sm:$0xff]  }
  0xa4   :  { %v5639_v50 = vld [vmem:[#allocation10 + $0x68] ss:$16 sps:$4 sm:$0xff]   ;;  %v5641_v51 = vld [vmem:[#allocation10 + $0x84] ss:$16 sps:$4 sm:$0xff]   ;;  %v5643_v52 = vld [vmem:[#allocation10 + $0x8c] ss:$16 sps:$4 sm:$0xff]  }
  0xa5   :  { %v5647_v53 = vld [vmem:[#allocation10 + $0x80] ss:$16 sps:$4 sm:$0xff]   ;;  %v5649_v54 = vld [vmem:[#allocation10 + $0x88] ss:$16 sps:$4 sm:$0xff]   ;;  %v5653_v55 = vld [vmem:[#allocation10 + $0xa4] ss:$16 sps:$4 sm:$0xff]  }
  0xa6   :  { %485 = vmatpush1.bf16.msra.mxu0 %v4593_v19  ;;  %536 = vmatpush1.bf16.msra.mxu1 %v4594_v20  ;;  %v5655_v56 = vld [vmem:[#allocation10 + $0xac] ss:$16 sps:$4 sm:$0xff]   ;;  %v5661_v57 = vld [vmem:[#allocation10 + $0xa0] ss:$16 sps:$4 sm:$0xff]   ;;  %v5663_v58 = vld [vmem:[#allocation10 + $0xa8] ss:$16 sps:$4 sm:$0xff]  }
  0xa7   :  { %486 = vmatprep.subr.bf16.mxu0 %v4595_v21  ;;  %537 = vmatprep.subr.bf16.mxu1 %v4597_v22  ;;  %v5665_v59 = vld [vmem:[#allocation10 + $0xc4] ss:$16 sps:$4 sm:$0xff]   ;;  %v5667_v60 = vld [vmem:[#allocation10 + $0xcc] ss:$16 sps:$4 sm:$0xff]   ;;  %v5673_v61 = vld [vmem:[#allocation10 + $0xc0] ss:$16 sps:$4 sm:$0xff]  }
  0xa8   :  { %v5675_v62 = vld [vmem:[#allocation10 + $0xc8] ss:$16 sps:$4 sm:$0xff]   ;;  %v5677_v63 = vld [vmem:[#allocation10 + $0xe4] ss:$16 sps:$4 sm:$0xff]   ;;  %v5679_v1 = vld [vmem:[#allocation10 + $0xec] ss:$16 sps:$4 sm:$0xff]  }
  0xa9   :  { %v5685_v2 = vld [vmem:[#allocation10 + $0xe0] ss:$16 sps:$4 sm:$0xff]   ;;  %v5687_v3 = vld [vmem:[#allocation10 + $0xe8] ss:$16 sps:$4 sm:$0xff]   ;;  %v5731_v8 = vsub.s32 0, %v287_v7  ;;  %v5733_v9 = vsub.s32 2, %v287_v7 }
  0xaa   :  { %487 = vmatpush1.bf16.msra.mxu0 %v4599_v23  ;;  %538 = vmatpush1.bf16.msra.mxu1 %v4600_v24  ;;  %v590_v4 = vld [vmem:[#allocation13] sm:$0xff]  ;;  %v5735_v10 = vand.u32 127, %v150_v6  ;;  %v284_v11 = vld [vmem:[#allocation11] sm:$0xf]  ;;  %v5737_v12 = vsub.s32 3, %v287_v7  ;;  %v5739_v13 = vsub.s32 1, %v287_v7 }
  0xab   :  { %488 = vmatprep.subr.bf16.mxu0 %v4601_v25  ;;  %539 = vmatprep.subr.bf16.mxu1 %v4603_v26  ;;  %v610_v5 = vpack.c.bf16 %v590_v4, %v590_v4  ;;  %6599 = vst [vmem:[#allocation30_spill] sm:$0xff] %v5731_v8  ;;  %6600 = vst [vmem:[#allocation31_spill] sm:$0xff] %v5733_v9  ;;  %v289_v14 = vrot.slane %v284_v11, %v5731_v8 }
  0xac   :  { %6601 = vst [vmem:[#allocation32_spill] sm:$0xff] %v5735_v10  ;;  %6602 = vst [vmem:[#allocation33_spill] sm:$0xff] %v5737_v12  ;;  %v297_v15 = vrot.slane %v284_v11, %v5733_v9  ;;  %v301_v18 = vrot.slane %v284_v11, %v5737_v12  ;;  %v153_v19 = vadd.s32 256, %v5735_v10  ;;  %v152_v20 = vadd.s32 128, %v5735_v10 }
  0xad   :  { %6603 = vst [vmem:[#allocation34_spill] sm:$0xff] %v5739_v13  ;;  %v154_v23 = vadd.s32 384, %v5735_v10  ;;  %v293_v24 = vrot.slane %v284_v11, %v5739_v13  ;;  %vm203_vm0 = vcmp.lt.s32.totalorder %v5735_v10, 64  ;;  %v6606_v11 = vmov 0 }
  0xae   :  { %489 = vmatpush1.bf16.msra.mxu0 %v4605_v27  ;;  %540 = vmatpush1.bf16.msra.mxu1 %v4606_v28 }
  0xaf   :  { %490 = vmatprep.subr.bf16.mxu0 %v4607_v29  ;;  %541 = vmatprep.subr.bf16.mxu1 %v4609_v30 }
  0xb2   :  { %491 = vmatpush1.bf16.msra.mxu0 %v4611_v31  ;;  %542 = vmatpush1.bf16.msra.mxu1 %v4612_v32 }
  0xb3   :  { %771 = vmatprep.subr.bf16.mxu0 %v5595_v33  ;;  %812 = vmatprep.subr.bf16.mxu1 %v5597_v34 }
  0xb5   :  { %509 = vmatmul.mubr.bf16.vlgmr.msra.gmra.mrb[0].mxu0 %v4613_v35  ;;  %560 = vmatmul.mubr.bf16.vlgmr.msra.gmra.mrb[0].mxu1 %v4613_v35  ;;  %v180_v35 = vand.u32 127, %v154_v23 }
  0xb6   :  { %772 = vmatpush1.bf16.msra.mxu0 %v5599_v36  ;;  %813 = vmatpush1.bf16.msra.mxu1 %v5601_v37 }
  0xb7   :  { %773 = vmatprep.subr.bf16.mxu0 %v5605_v38  ;;  %814 = vmatprep.subr.bf16.mxu1 %v5607_v39  ;;  %vm5771_vm3 = vcmp.lt.s32.totalorder %v180_v35, 64 }
  0xb8   :  { %518 = vmatprep.mubr.bf16.mxu0 %v6572_v0  ;;  %569 = vmatprep.mubr.bf16.mxu1 %v6572_v0 }
  0xba   :  { %774 = vmatpush1.bf16.msra.mxu0 %v5609_v40  ;;  %815 = vmatpush1.bf16.msra.mxu1 %v5613_v41 }
  0xbb   :  { %775 = vmatprep.subr.bf16.mxu0 %v5617_v42  ;;  %816 = vmatprep.subr.bf16.mxu1 %v5619_v43 }
  0xbd   :  { %519 = vmatmul.mubr.bf16.gmra.mrb[4].mxu0 %v4626_v44  ;;  %570 = vmatmul.mubr.bf16.gmra.mrb[4].mxu1 %v4626_v44 }
  0xbe   :  { %776 = vmatpush1.bf16.msra.mxu0 %v5623_v45  ;;  %817 = vmatpush1.bf16.msra.mxu1 %v5627_v46 }
  0xbf   :  { %777 = vmatprep.subr.bf16.mxu0 %v5631_v47  ;;  %818 = vmatprep.subr.bf16.mxu1 %v5633_v48 }
  0xc0   :  { %803 = vmatprep.mubr.bf16.mxu0 %v6572_v0  ;;  %844 = vmatprep.mubr.bf16.mxu1 %v6572_v0 }
  0xc2   :  { %778 = vmatpush1.bf16.msra.mxu0 %v5635_v49  ;;  %819 = vmatpush1.bf16.msra.mxu1 %v5639_v50 }
  0xc3   :  { %779 = vmatprep.subr.bf16.mxu0 %v5641_v51  ;;  %820 = vmatprep.subr.bf16.mxu1 %v5643_v52 }
  0xc6   :  { %780 = vmatpush1.bf16.msra.mxu0 %v5647_v53  ;;  %821 = vmatpush1.bf16.msra.mxu1 %v5649_v54 }
  0xc7   :  { %781 = vmatprep.subr.bf16.mxu0 %v5653_v55  ;;  %822 = vmatprep.subr.bf16.mxu1 %v5655_v56 }
  0xca   :  { %782 = vmatpush1.bf16.msra.mxu0 %v5661_v57  ;;  %823 = vmatpush1.bf16.msra.mxu1 %v5663_v58 }
  0xcb   :  { %783 = vmatprep.subr.bf16.mxu0 %v5665_v59  ;;  %824 = vmatprep.subr.bf16.mxu1 %v5667_v60 }
  0xce   :  { %784 = vmatpush1.bf16.msra.mxu0 %v5673_v61  ;;  %825 = vmatpush1.bf16.msra.mxu1 %v5675_v62 }
  0xcf   :  { %785 = vmatprep.subr.bf16.mxu0 %v5677_v63  ;;  %826 = vmatprep.subr.bf16.mxu1 %v5679_v1 }
  0xd2   :  { %786 = vmatpush1.bf16.msra.mxu0 %v5685_v2  ;;  %827 = vmatpush1.bf16.msra.mxu1 %v5687_v3 }
  0xd3   :  { %896 = vmatprep.subr.bf16.mxu0 %v5595_v33  ;;  %937 = vmatprep.subr.bf16.mxu1 %v5597_v34 }
  0xd5   :  { %804 = vmatmul.mubr.bf16.vlgmr.msra.gmra.mrb[8].mxu0 %v610_v5  ;;  %845 = vmatmul.mubr.bf16.vlgmr.msra.gmra.mrb[8].mxu1 %v610_v5 }
  0xd6   :  { %897 = vmatpush1.bf16.msra.mxu0 %v5599_v36  ;;  %938 = vmatpush1.bf16.msra.mxu1 %v5601_v37 }
  0xd7   :  { %898 = vmatprep.subr.bf16.mxu0 %v5605_v38  ;;  %939 = vmatprep.subr.bf16.mxu1 %v5607_v39 }
  0xd8   :  { %928 = vmatprep.mubr.bf16.mxu0 %v6572_v0  ;;  %969 = vmatprep.mubr.bf16.mxu1 %v6572_v0 }
  0xda   :  { %899 = vmatpush1.bf16.msra.mxu0 %v5609_v40  ;;  %940 = vmatpush1.bf16.msra.mxu1 %v5613_v41 }
  0xdb   :  { %900 = vmatprep.subr.bf16.mxu0 %v5617_v42  ;;  %941 = vmatprep.subr.bf16.mxu1 %v5619_v43 }
  0xde   :  { %901 = vmatpush1.bf16.msra.mxu0 %v5623_v45  ;;  %942 = vmatpush1.bf16.msra.mxu1 %v5627_v46 }
  0xdf   :  { %902 = vmatprep.subr.bf16.mxu0 %v5631_v47  ;;  %943 = vmatprep.subr.bf16.mxu1 %v5633_v48 }
  0xe2   :  { %903 = vmatpush1.bf16.msra.mxu0 %v5635_v49  ;;  %944 = vmatpush1.bf16.msra.mxu1 %v5639_v50 }
  0xe3   :  { %904 = vmatprep.subr.bf16.mxu0 %v5641_v51  ;;  %945 = vmatprep.subr.bf16.mxu1 %v5643_v52 }
  0xe6   :  { %905 = vmatpush1.bf16.msra.mxu0 %v5647_v53  ;;  %946 = vmatpush1.bf16.msra.mxu1 %v5649_v54 }
  0xe7   :  { %906 = vmatprep.subr.bf16.mxu0 %v5653_v55  ;;  %947 = vmatprep.subr.bf16.mxu1 %v5655_v56 }
  0xea   :  { %907 = vmatpush1.bf16.msra.mxu0 %v5661_v57  ;;  %948 = vmatpush1.bf16.msra.mxu1 %v5663_v58 }
  0xeb   :  { %908 = vmatprep.subr.bf16.mxu0 %v5665_v59  ;;  %949 = vmatprep.subr.bf16.mxu1 %v5667_v60 }
  0xee   :  { %909 = vmatpush1.bf16.msra.mxu0 %v5673_v61  ;;  %950 = vmatpush1.bf16.msra.mxu1 %v5675_v62 }
  0xef   :  { %910 = vmatprep.subr.bf16.mxu0 %v5677_v63  ;;  %951 = vmatprep.subr.bf16.mxu1 %v5679_v1 }
  0xf2   :  { %911 = vmatpush1.bf16.msra.mxu0 %v5685_v2  ;;  %952 = vmatpush1.bf16.msra.mxu1 %v5687_v3 }
  0xf3   :  { %1026 = vmatprep.subr.bf16.mxu0 %v5595_v33  ;;  %1067 = vmatprep.subr.bf16.mxu1 %v5597_v34  ;;  %v173_v33 = vand.u32 127, %v153_v19  ;;  %v166_v34 = vand.u32 127, %v152_v20 }
  0xf5   :  { %vm5761_vm1 = vcmp.lt.s32.totalorder %v173_v33, 64  ;;  %vm5765_vm2 = vcmp.lt.s32.totalorder %v166_v34, 64 }
  0xf6   :  { %v6607_v11 = vsel %vm5765_vm2, 4294967295, %v6606_v11 }
  0xf7   :  { %6608 = vst [vmem:[#allocation35_spill] sm:$0xff] %v6607_v11 }
 0x188   :  { %v510_v16 = vpop.f32.mrb[0].mxu0  ;;  %v561_v17 = vpop.f32.mrb[0].mxu1 }
 0x189   :  { %v512_v21 = vpop.f32.mrb[1].mxu0  ;;  %v563_v22 = vpop.f32.mrb[1].mxu1  ;;  %v5756_v44 = vadd.f32 %v561_v17, %v297_v15 }
 0x18a   :  { %v514_v25 = vpop.f32.mrb[2].mxu0  ;;  %v565_v26 = vpop.f32.mrb[2].mxu1  ;;  %v5759_v5 = vadd.f32 %v563_v22, %v301_v18  ;;  %v5775_v22 = vadd.f32 %v512_v21, %v293_v24 }
 0x18b   :  { %v5748_v27 = vadd.f32 %v514_v25, %v289_v14  ;;  %v516_v28 = vpop.f32.mrb[3].mxu0  ;;  %v5750_v29 = vadd.f32 %v565_v26, %v297_v15  ;;  %v567_v30 = vpop.f32.mrb[3].mxu1  ;;  %v511_v25 = vadd.f32 %v510_v16, %v289_v14  ;;  %v6609_v26 = vmov 0 }
 0x18c   :  { %v5752_v31 = vadd.f32 %v516_v28, %v293_v24  ;;  %v5754_v32 = vadd.f32 %v567_v30, %v301_v18  ;;  %v6610_v26 = vsel %vm5771_vm3, 4294967295, %v6609_v26  ;;  %6612 = vst [vmem:[#allocation37_spill] sm:$0xff] %v5775_v22 }
 0x18d   :  { %6611 = vst [vmem:[#allocation36_spill] sm:$0xff] %v6610_v26 }
 0x190   :  { %v520_v4 = vpop.f32.mrb[4].mxu0  ;;  %v571_v6 = vpop.f32.mrb[4].mxu1 }
 0x191   :  { %v521_v19 = vadd.f32 %v520_v4, %v289_v14  ;;  %v522_v20 = vpop.f32.mrb[5].mxu0  ;;  %v5769_v23 = vadd.f32 %v571_v6, %v297_v15  ;;  %v573_v17 = vpop.f32.mrb[5].mxu1 }
 0x192   :  { %v5777_v28 = vadd.f32 %v522_v20, %v293_v24  ;;  %v5779_v30 = vadd.f32 %v573_v17, %v301_v18  ;;  %v524_v33 = vpop.f32.mrb[6].mxu0  ;;  %v575_v34 = vpop.f32.mrb[6].mxu1 }
 0x193   :  { %v525_v0 = vpop.f32.mrb[7].mxu0  ;;  %v576_v12 = vpop.f32.mrb[7].mxu1  ;;  %v606_v14 = vsel %vm203_vm0, %v511_v25, %v521_v19  ;;  %v608_v15 = vsel %vm5761_vm1, %v5756_v44, %v5769_v23  ;;  %v5789_v16 = vsel %vm203_vm0, %v521_v19, %v511_v25 }
 0x194   :  { %v607_v0 = vsel %vm5765_vm2, %v5775_v22, %v5777_v28  ;;  %v609_v12 = vsel %vm5771_vm3, %v5759_v5, %v5779_v30 }
 0x1a8   :  { %v805_v35 = vpop.f32.mrb[8].mxu0  ;;  %v846_v4 = vpop.f32.mrb[8].mxu1 }
 0x1a9   :  { %v853_v6 = vadd.f32 %v805_v35, %v606_v14  ;;  %v855_v25 = vadd.f32 %v846_v4, %v608_v15  ;;  %v807_v19 = vpop.f32.mrb[9].mxu0  ;;  %v848_v20 = vpop.f32.mrb[9].mxu1 }
 0x1aa   :  { %v854_v17 = vadd.f32 %v807_v19, %v607_v0  ;;  %v856_v33 = vadd.f32 %v848_v20, %v609_v12  ;;  %v809_v34 = vpop.f32.mrb[10].mxu0  ;;  %v850_v18 = vpop.f32.mrb[10].mxu1  ;;  %v591_v12 = vld [vmem:[#allocation14] sm:$0xff]  ;;  %v4674_v19 = vld [vmem:[#allocation8 + $0x12c] ss:$16 sps:$4 sm:$0xff]  }
 0x1ab   :  { %v4134_v13 = vmul.f32 -1.442695, %v853_v6  ;;  %v810_v9 = vpop.f32.mrb[11].mxu0  ;;  %v851_v8 = vpop.f32.mrb[11].mxu1  ;;  %v4669_v20 = vld [vmem:[#allocation8 + $0x120] ss:$16 sps:$4 sm:$0xff]  }
 0x1ac   :  { %v4135_v10 = vmul.f32 -1.442695, %v854_v17  ;;  %v4136_v21 = vmul.f32 -1.442695, %v856_v33  ;;  %v4672_v17 = vld [vmem:[#allocation8 + $0x128] ss:$16 sps:$4 sm:$0xff]  }
 0x1ad   :  { %4975 = vpow2.f32 %v4134_v13  ;;  %v4677_v33 = vld [vmem:[#allocation8 + $0x144] ss:$16 sps:$4 sm:$0xff]   ;;  %v4680_v34 = vld [vmem:[#allocation8 + $0x14c] ss:$16 sps:$4 sm:$0xff]  }
 0x1ae   :  { %4977 = vpow2.f32 %v4135_v10 }
 0x1af   :  { %4979 = vpow2.f32 %v4136_v21  ;;  %v6613_v21 = vmov 0  }
 0x1b0   :  { %4981 = vtanh.f32 %v855_v25  ;;  %v4671_v25 = vld [vmem:[#allocation8 + $0x124] ss:$16 sps:$4 sm:$0xff]  }
 0x1b7   :  { %v4976_v22 = vpop.eup %4975 }
 0x1b8   :  { %v4978_v26 = vpop.eup %4977  ;;  %v860_v24 = vadd.f32 1.0, %v4976_v22 }
 0x1b9   :  { %v866_v14 = vadd.f32 1.0, %v4978_v26  ;;  %v4980_v15 = vpop.eup %4979 }
 0x1ba   :  { %4983 = vrcp.f32 %v860_v24  ;;  %v4982_v0 = vpop.eup %4981  ;;  %v873_v9 = vadd.f32 1.0, %v4980_v15  ;;  %v4666_v24 = vld [vmem:[#allocation8 + $0x108] ss:$16 sps:$4 sm:$0xff]  }
 0x1bb   :  { %4985 = vrcp.f32 %v866_v14  ;;  %v4675_v14 = vld [vmem:[#allocation8 + $0x140] ss:$16 sps:$4 sm:$0xff]   ;;  %v4678_v15 = vld [vmem:[#allocation8 + $0x148] ss:$16 sps:$4 sm:$0xff]  }
 0x1bc   :  { %4987 = vrcp.f32 %v873_v9  ;;  %v4692_v9 = vld [vmem:[#allocation8 + $0x18c] ss:$16 sps:$4 sm:$0xff]  }
 0x1c4   :  { %v4984_v35 = vpop.eup %4983 }
 0x1c5   :  { %v4986_v18 = vpop.eup %4985  ;;  %v877_v4 = vmul.f32 %v4984_v35, %v4982_v0  ;;  %v4683_v0 = vld [vmem:[#allocation8 + $0x164] ss:$16 sps:$4 sm:$0xff]   ;;  %v4681_v35 = vld [vmem:[#allocation8 + $0x160] ss:$16 sps:$4 sm:$0xff]  }
 0x1c6   :  { %v876_v8 = vmul.f32 %v4986_v18, %v591_v12  ;;  %v4988_v10 = vpop.eup %4987  ;;  %v4686_v12 = vld [vmem:[#allocation8 + $0x16c] ss:$16 sps:$4 sm:$0xff]   ;;  %v4684_v18 = vld [vmem:[#allocation8 + $0x168] ss:$16 sps:$4 sm:$0xff]  }
 0x1c8   :  { %v5811_v6 = vadd.f32 %v877_v4, %v876_v8  ;;  %v4689_v4 = vld [vmem:[#allocation8 + $0x184] ss:$16 sps:$4 sm:$0xff]   ;;  %v4687_v8 = vld [vmem:[#allocation8 + $0x180] ss:$16 sps:$4 sm:$0xff]  }
 0x1ca   :  { %4989 = vtanh.f32 %v5811_v6 }
 0x1d4   :  { %v4990_v13 = vpop.eup %4989 }
 0x1d5   :  { %v5814_v22 = vmul.f32 %v4990_v13, %v4988_v10  ;;  %v4695_v10 = vld [vmem:[#allocation8 + $0x1a4] ss:$16 sps:$4 sm:$0xff]   ;;  %v4693_v13 = vld [vmem:[#allocation8 + $0x1a0] ss:$16 sps:$4 sm:$0xff]  }
 0x1d7   :  { %v895_v26 = vpack.c.bf16 %v5814_v22, %v5814_v22 }
 0x1d9   :  { %929 = vmatmul.mubr.bf16.vlgmr.msra.gmra.mrb[12].mxu0 %v895_v26  ;;  %970 = vmatmul.mubr.bf16.vlgmr.msra.gmra.mrb[12].mxu1 %v895_v26  ;;  %v4696_v26 = vld [vmem:[#allocation8 + $0x1a8] ss:$16 sps:$4 sm:$0xff]  }
 0x1da   :  { %1027 = vmatpush1.bf16.msra.mxu0 %v5599_v36  ;;  %1068 = vmatpush1.bf16.msra.mxu1 %v5601_v37 }
 0x1db   :  { %1028 = vmatprep.subr.bf16.mxu0 %v5605_v38  ;;  %1069 = vmatprep.subr.bf16.mxu1 %v5607_v39 }
 0x1dc   :  { %1058 = vmatprep.mubr.bf16.mxu0 %v6613_v21  ;;  %1099 = vmatprep.mubr.bf16.mxu1 %v6613_v21 }
 0x1de   :  { %1029 = vmatpush1.bf16.msra.mxu0 %v5609_v40  ;;  %1070 = vmatpush1.bf16.msra.mxu1 %v5613_v41 }
 0x1df   :  { %1030 = vmatprep.subr.bf16.mxu0 %v5617_v42  ;;  %1071 = vmatprep.subr.bf16.mxu1 %v5619_v43 }
 0x1e2   :  { %1031 = vmatpush1.bf16.msra.mxu0 %v5623_v45  ;;  %1072 = vmatpush1.bf16.msra.mxu1 %v5627_v46 }
 0x1e3   :  { %1032 = vmatprep.subr.bf16.mxu0 %v5631_v47  ;;  %1073 = vmatprep.subr.bf16.mxu1 %v5633_v48 }
 0x1e6   :  { %1033 = vmatpush1.bf16.msra.mxu0 %v5635_v49  ;;  %1074 = vmatpush1.bf16.msra.mxu1 %v5639_v50 }
 0x1e7   :  { %1034 = vmatprep.subr.bf16.mxu0 %v5641_v51  ;;  %1075 = vmatprep.subr.bf16.mxu1 %v5643_v52 }
 0x1ea   :  { %1035 = vmatpush1.bf16.msra.mxu0 %v5647_v53  ;;  %1076 = vmatpush1.bf16.msra.mxu1 %v5649_v54 }
 0x1eb   :  { %1036 = vmatprep.subr.bf16.mxu0 %v5653_v55  ;;  %1077 = vmatprep.subr.bf16.mxu1 %v5655_v56 }
 0x1ee   :  { %1037 = vmatpush1.bf16.msra.mxu0 %v5661_v57  ;;  %1078 = vmatpush1.bf16.msra.mxu1 %v5663_v58 }
 0x1ef   :  { %1038 = vmatprep.subr.bf16.mxu0 %v5665_v59  ;;  %1079 = vmatprep.subr.bf16.mxu1 %v5667_v60 }
 0x1f2   :  { %1039 = vmatpush1.bf16.msra.mxu0 %v5673_v61  ;;  %1080 = vmatpush1.bf16.msra.mxu1 %v5675_v62 }
 0x1f3   :  { %1040 = vmatprep.subr.bf16.mxu0 %v5677_v63  ;;  %1081 = vmatprep.subr.bf16.mxu1 %v5679_v1 }
 0x1f6   :  { %1041 = vmatpush1.bf16.msra.mxu0 %v5685_v2  ;;  %1082 = vmatpush1.bf16.msra.mxu1 %v5687_v3 }
 0x2ac   :  { %v930_v36 = vpop.f32.mrb[12].mxu0  ;;  %v971_v37 = vpop.f32.mrb[12].mxu1 }
 0x2ad   :  { %v978_v38 = vadd.f32 %v930_v36, %v5748_v27  ;;  %v980_v39 = vadd.f32 %v971_v37, %v5750_v29  ;;  %v932_v40 = vpop.f32.mrb[13].mxu0  ;;  %v973_v41 = vpop.f32.mrb[13].mxu1  ;;  %v4665_v29 = vld [vmem:[#allocation8 + $0x104] ss:$16 sps:$4 sm:$0xff]   ;;  %v4698_v36 = vld [vmem:[#allocation8 + $0x1ac] ss:$16 sps:$4 sm:$0xff]  }
 0x2ae   :  { %v979_v42 = vadd.f32 %v932_v40, %v5752_v31  ;;  %v981_v43 = vadd.f32 %v973_v41, %v5754_v32  ;;  %v934_v45 = vpop.f32.mrb[14].mxu0  ;;  %v975_v46 = vpop.f32.mrb[14].mxu1  ;;  %v4668_v31 = vld [vmem:[#allocation8 + $0x10c] ss:$16 sps:$4 sm:$0xff]   ;;  %v4663_v32 = vld [vmem:[#allocation8 + $0x100] ss:$16 sps:$4 sm:$0xff]   ;;  %1398 = vmatprep.subr.bf16.mxu0 %v4665_v29 }
 0x2af   :  { %v4137_v47 = vmul.f32 -1.442695, %v978_v38  ;;  %v935_v48 = vpop.f32.mrb[15].mxu0  ;;  %v976_v49 = vpop.f32.mrb[15].mxu1  ;;  %1449 = vmatprep.subr.bf16.mxu1 %v4668_v31  ;;  %v4701_v37 = vld [vmem:[#allocation8 + $0x1c4] ss:$16 sps:$4 sm:$0xff]  }
 0x2b0   :  { %v4138_v50 = vmul.f32 -1.442695, %v979_v42  ;;  %v4139_v51 = vmul.f32 -1.442695, %v981_v43  ;;  %v4704_v38 = vld [vmem:[#allocation8 + $0x1cc] ss:$16 sps:$4 sm:$0xff]  }
 0x2b1   :  { %4991 = vpow2.f32 %v4137_v47  ;;  %v4702_v40 = vld [vmem:[#allocation8 + $0x1c8] ss:$16 sps:$4 sm:$0xff]   ;;  %v4707_v41 = vld [vmem:[#allocation8 + $0x1e4] ss:$16 sps:$4 sm:$0xff]   ;;  %v4710_v42 = vld [vmem:[#allocation8 + $0x1ec] ss:$16 sps:$4 sm:$0xff]  }
 0x2b2   :  { %4993 = vpow2.f32 %v4138_v50  ;;  %v4705_v43 = vld [vmem:[#allocation8 + $0x1e0] ss:$16 sps:$4 sm:$0xff]   ;;  %v4708_v45 = vld [vmem:[#allocation8 + $0x1e8] ss:$16 sps:$4 sm:$0xff]   ;;  %v5864_v46 = vld [vmem:[#allocation10 + $0x104] ss:$16 sps:$4 sm:$0xff]  }
 0x2b3   :  { %4995 = vpow2.f32 %v4139_v51  ;;  %v5866_v47 = vld [vmem:[#allocation10 + $0x10c] ss:$16 sps:$4 sm:$0xff]   ;;  %v6614_v51 = vsel %vm5761_vm1, %v5769_v23, %v5756_v44 }
 0x2b4   :  { %4997 = vtanh.f32 %v980_v39  ;;  %v4699_v39 = vld [vmem:[#allocation8 + $0x1c0] ss:$16 sps:$4 sm:$0xff]  }
 0x2bb   :  { %v4992_v52 = vpop.eup %4991 }
 0x2bc   :  { %v4994_v53 = vpop.eup %4993  ;;  %v985_v54 = vadd.f32 1.0, %v4992_v52 }
 0x2bd   :  { %v991_v55 = vadd.f32 1.0, %v4994_v53  ;;  %v4996_v56 = vpop.eup %4995 }
 0x2be   :  { %4999 = vrcp.f32 %v985_v54  ;;  %v4998_v57 = vpop.eup %4997  ;;  %v998_v61 = vadd.f32 1.0, %v4996_v56 }
 0x2bf   :  { %5001 = vrcp.f32 %v991_v55  ;;  %v6615_v55 = vld [vmem:[#allocation37_spill] sm:$0xff] }
 0x2c0   :  { %5003 = vrcp.f32 %v998_v61  ;;  %v6616_v56 = vsel %vm5765_vm2, %v5777_v28, %v6615_v55  ;;  %v5982_v55 = vld [vmem:[#allocation10 + $0x1c4] ss:$16 sps:$4 sm:$0xff]  }
 0x2c8   :  { %v5000_v58 = vpop.eup %4999 }
 0x2c9   :  { %v5002_v59 = vpop.eup %5001  ;;  %v1002_v60 = vmul.f32 %v5000_v58, %v4998_v57 }
 0x2ca   :  { %v1001_v62 = vmul.f32 %v5002_v59, %v5811_v6  ;;  %v5004_v1 = vpop.eup %5003  ;;  %v4690_v6 = vld [vmem:[#allocation8 + $0x188] ss:$16 sps:$4 sm:$0xff]   ;;  %v6618_v59 = vsel %vm5771_vm3, %v5779_v30, %v5759_v5 }
 0x2cc   :  { %v5855_v63 = vadd.f32 %v1002_v60, %v1001_v62 }
 0x2ce   :  { %5005 = vtanh.f32 %v5855_v63 }
 0x2d8   :  { %v5006_v2 = vpop.eup %5005 }
 0x2d9   :  { %v5858_v3 = vmul.f32 %v5006_v2, %v5004_v1 }
 0x2db   :  { %v1025_v27 = vpack.c.bf16 %v5858_v3, %v5858_v3 }
 0x2dd   :  { %1059 = vmatmul.mubr.bf16.vlgmr.msra.gmra.mrb[16].mxu0 %v1025_v27  ;;  %1100 = vmatmul.mubr.bf16.vlgmr.msra.gmra.mrb[16].mxu1 %v1025_v27 }
 0x2de   :  { %1430 = vmatprep.mubr.bf16.mxu0 %v6613_v21  ;;  %1481 = vmatprep.mubr.bf16.mxu1 %v6613_v21 }
 0x2df   :  { %1399 = vmatpush1.bf16.msra.mxu0 %v4663_v32  ;;  %1450 = vmatpush1.bf16.msra.mxu1 %v4666_v24 }
 0x2e0   :  { %1400 = vmatprep.subr.bf16.mxu0 %v4671_v25  ;;  %1451 = vmatprep.subr.bf16.mxu1 %v4674_v19 }
 0x2e3   :  { %1401 = vmatpush1.bf16.msra.mxu0 %v4669_v20  ;;  %1452 = vmatpush1.bf16.msra.mxu1 %v4672_v17 }
 0x2e4   :  { %1402 = vmatprep.subr.bf16.mxu0 %v4677_v33  ;;  %1453 = vmatprep.subr.bf16.mxu1 %v4680_v34  ;;  %v6619_v34 = vld [vmem:[#allocation32_spill] sm:$0xff] }
 0x2e5   :  { %vm208_vm4 = vcmp.ge.s32.totalorder %v6619_v34, 64 }
 0x2e7   :  { %1403 = vmatpush1.bf16.msra.mxu0 %v4675_v14  ;;  %1454 = vmatpush1.bf16.msra.mxu1 %v4678_v15  ;;  %v1008_v15 = vsel %vm203_vm0, %v5858_v3, 0.0 }
 0x2e8   :  { %1404 = vmatprep.subr.bf16.mxu0 %v4683_v0  ;;  %1455 = vmatprep.subr.bf16.mxu1 %v4686_v12  ;;  %v882_v12 = vsel %vm203_vm0, %v5814_v22, 0.0 }
 0x2eb   :  { %1405 = vmatpush1.bf16.msra.mxu0 %v4681_v35  ;;  %1456 = vmatpush1.bf16.msra.mxu1 %v4684_v18  ;;  %v5897_v35 = vld [vmem:[#allocation10 + $0x100] ss:$16 sps:$4 sm:$0xff]   ;;  %v5899_v18 = vld [vmem:[#allocation10 + $0x108] ss:$16 sps:$4 sm:$0xff]  }
 0x2ec   :  { %1406 = vmatprep.subr.bf16.mxu0 %v4689_v4  ;;  %1457 = vmatprep.subr.bf16.mxu1 %v4692_v9  ;;  %v5904_v4 = vsel %vm208_vm4, %v5858_v3, %v1008_v15  ;;  %v5922_v3 = vld [vmem:[#allocation10 + $0x120] ss:$16 sps:$4 sm:$0xff]  }
 0x2ed   :  { %6620 = vst [vmem:[#allocation37_spill] sm:$0xff] %v5904_v4 }
 0x2ef   :  { %1407 = vmatpush1.bf16.msra.mxu0 %v4687_v8  ;;  %1458 = vmatpush1.bf16.msra.mxu1 %v4690_v6  ;;  %v5916_v6 = vld [vmem:[#allocation10 + $0x124] ss:$16 sps:$4 sm:$0xff]  }
 0x2f0   :  { %1408 = vmatprep.subr.bf16.mxu0 %v4695_v10  ;;  %1459 = vmatprep.subr.bf16.mxu1 %v4698_v36  ;;  %v5918_v10 = vld [vmem:[#allocation10 + $0x12c] ss:$16 sps:$4 sm:$0xff]  }
 0x2f1   :  { %v5930_v36 = vld [vmem:[#allocation10 + $0x14c] ss:$16 sps:$4 sm:$0xff]  }
 0x2f3   :  { %1409 = vmatpush1.bf16.msra.mxu0 %v4693_v13  ;;  %1460 = vmatpush1.bf16.msra.mxu1 %v4696_v26  ;;  %v5924_v13 = vld [vmem:[#allocation10 + $0x128] ss:$16 sps:$4 sm:$0xff]   ;;  %v5928_v26 = vld [vmem:[#allocation10 + $0x144] ss:$16 sps:$4 sm:$0xff]  }
 0x2f4   :  { %1410 = vmatprep.subr.bf16.mxu0 %v4701_v37  ;;  %1461 = vmatprep.subr.bf16.mxu1 %v4704_v38  ;;  %v5936_v37 = vld [vmem:[#allocation10 + $0x140] ss:$16 sps:$4 sm:$0xff]   ;;  %v5938_v38 = vld [vmem:[#allocation10 + $0x148] ss:$16 sps:$4 sm:$0xff]  }
 0x2f7   :  { %1411 = vmatpush1.bf16.msra.mxu0 %v4699_v39  ;;  %1462 = vmatpush1.bf16.msra.mxu1 %v4702_v40  ;;  %v5944_v40 = vld [vmem:[#allocation10 + $0x164] ss:$16 sps:$4 sm:$0xff]  }
 0x2f8   :  { %1412 = vmatprep.subr.bf16.mxu0 %v4707_v41  ;;  %1463 = vmatprep.subr.bf16.mxu1 %v4710_v42  ;;  %v5946_v41 = vld [vmem:[#allocation10 + $0x16c] ss:$16 sps:$4 sm:$0xff]   ;;  %v5950_v42 = vld [vmem:[#allocation10 + $0x160] ss:$16 sps:$4 sm:$0xff]  }
 0x2fb   :  { %1413 = vmatpush1.bf16.msra.mxu0 %v4705_v43  ;;  %1464 = vmatpush1.bf16.msra.mxu1 %v4708_v45  ;;  %v5952_v43 = vld [vmem:[#allocation10 + $0x168] ss:$16 sps:$4 sm:$0xff]   ;;  %v5956_v45 = vld [vmem:[#allocation10 + $0x184] ss:$16 sps:$4 sm:$0xff]  }
 0x2fc   :  { %1689 = vmatprep.subr.bf16.mxu0 %v5864_v46  ;;  %1730 = vmatprep.subr.bf16.mxu1 %v5866_v47 }
 0x3b0   :  { %v1060_v48 = vpop.f32.mrb[16].mxu0  ;;  %v1101_v49 = vpop.f32.mrb[16].mxu1 }
 0x3b1   :  { %v1108_v50 = vadd.f32 %v1060_v48, %v5789_v16  ;;  %v1110_v52 = vadd.f32 %v1101_v49, %v6614_v51  ;;  %v1062_v53 = vpop.f32.mrb[17].mxu0  ;;  %v1103_v54 = vpop.f32.mrb[17].mxu1  ;;  %v5958_v48 = vld [vmem:[#allocation10 + $0x18c] ss:$16 sps:$4 sm:$0xff]   ;;  %v5964_v49 = vld [vmem:[#allocation10 + $0x180] ss:$16 sps:$4 sm:$0xff]  }
 0x3b2   :  { %v1109_v57 = vadd.f32 %v1062_v53, %v6616_v56  ;;  %v1111_v16 = vadd.f32 %v1103_v54, %v6618_v59  ;;  %v1064_v60 = vpop.f32.mrb[18].mxu0  ;;  %v1105_v61 = vpop.f32.mrb[18].mxu1  ;;  %v5970_v51 = vld [vmem:[#allocation10 + $0x1a4] ss:$16 sps:$4 sm:$0xff]   ;;  %v5976_v53 = vld [vmem:[#allocation10 + $0x1a0] ss:$16 sps:$4 sm:$0xff]  }
 0x3b3   :  { %v4140_v62 = vmul.f32 -1.442695, %v1108_v50  ;;  %v1065_v1 = vpop.f32.mrb[19].mxu0  ;;  %v1106_v44 = vpop.f32.mrb[19].mxu1  ;;  %v5966_v50 = vld [vmem:[#allocation10 + $0x188] ss:$16 sps:$4 sm:$0xff]  }
 0x3b4   :  { %v4141_v23 = vmul.f32 -1.442695, %v1109_v57  ;;  %v4142_v2 = vmul.f32 -1.442695, %v1111_v16  ;;  %v5978_v54 = vld [vmem:[#allocation10 + $0x1a8] ss:$16 sps:$4 sm:$0xff]  }
 0x3b5   :  { %5007 = vpow2.f32 %v4140_v62  ;;  %v5984_v56 = vld [vmem:[#allocation10 + $0x1cc] ss:$16 sps:$4 sm:$0xff]   ;;  %v5988_v57 = vld [vmem:[#allocation10 + $0x1c0] ss:$16 sps:$4 sm:$0xff]   ;;  %v5990_v59 = vld [vmem:[#allocation10 + $0x1c8] ss:$16 sps:$4 sm:$0xff]  }
 0x3b6   :  { %5009 = vpow2.f32 %v4141_v23  ;;  %v5994_v16 = vld [vmem:[#allocation10 + $0x1e4] ss:$16 sps:$4 sm:$0xff]   ;;  %v5996_v60 = vld [vmem:[#allocation10 + $0x1ec] ss:$16 sps:$4 sm:$0xff]   ;;  %v6000_v61 = vld [vmem:[#allocation10 + $0x1e0] ss:$16 sps:$4 sm:$0xff]  }
 0x3b7   :  { %5011 = vpow2.f32 %v4142_v2  ;;  %v6002_v62 = vld [vmem:[#allocation10 + $0x1e8] ss:$16 sps:$4 sm:$0xff]   ;;  %v1216_v23 = vld [vmem:[#allocation11 + $0x4] sm:$0xf] }
 0x3b8   :  { %5013 = vtanh.f32 %v1110_v52  ;;  %v5972_v52 = vld [vmem:[#allocation10 + $0x1ac] ss:$16 sps:$4 sm:$0xff]   ;;  %v1513_v1 = vld [vmem:[#allocation13 + $0x8] sm:$0xff] }
 0x3b9   :  { %v1528_v44 = vpack.c.bf16 %v1513_v1, %v1513_v1 }
 0x3bf   :  { %v5008_v27 = vpop.eup %5007 }
 0x3c0   :  { %v5010_v29 = vpop.eup %5009  ;;  %v1115_v31 = vadd.f32 1.0, %v5008_v27 }
 0x3c1   :  { %v1121_v28 = vadd.f32 1.0, %v5010_v29  ;;  %v5012_v32 = vpop.eup %5011  ;;  %v6623_v29 = vld [vmem:[#allocation30_spill] sm:$0xff] }
 0x3c2   :  { %5015 = vrcp.f32 %v1115_v31  ;;  %v5014_v5 = vpop.eup %5013  ;;  %v1128_v19 = vadd.f32 1.0, %v5012_v32  ;;  %v1221_v31 = vrot.slane %v1216_v23, %v6623_v29 }
 0x3c3   :  { %5017 = vrcp.f32 %v1121_v28  ;;  %v6624_v28 = vld [vmem:[#allocation31_spill] sm:$0xff] }
 0x3c4   :  { %5019 = vrcp.f32 %v1128_v19  ;;  %v1229_v32 = vrot.slane %v1216_v23, %v6624_v28  ;;  %v6626_v19 = vld [vmem:[#allocation33_spill] sm:$0xff] }
 0x3cc   :  { %v5016_v30 = vpop.eup %5015 }
 0x3cd   :  { %v5018_v24 = vpop.eup %5017  ;;  %v1132_v25 = vmul.f32 %v5016_v30, %v5014_v5 }
 0x3ce   :  { %v1131_v20 = vmul.f32 %v5018_v24, %v5855_v63  ;;  %v5020_v33 = vpop.eup %5019  ;;  %v886_v63 = vsel %vm208_vm4, %v5814_v22, 0.0  ;;  %v6625_v24 = vld [vmem:[#allocation34_spill] sm:$0xff] }
 0x3d0   :  { %v1133_v17 = vadd.f32 %v1132_v25, %v1131_v20  ;;  %v1225_v25 = vrot.slane %v1216_v23, %v6625_v24  ;;  %v1233_v20 = vrot.slane %v1216_v23, %v6626_v19 }
 0x3d2   :  { %5021 = vtanh.f32 %v1133_v17  ;;  %1143 = vst [vmem:[#allocation22] sm:$0xff] %v1133_v17 }
 0x3dc   :  { %v5022_v14 = vpop.eup %5021 }
 0x3dd   :  { %v1135_v0 = vmul.f32 %v5022_v14, %v5020_v33 }
 0x3df   :  { %v5908_v9 = vsel %vm208_vm4, %v1135_v0, %v882_v12  ;;  %1142 = vst [vmem:[#allocation20] sm:$0xff] %v1135_v0  ;;  %v5912_v8 = vsel %vm203_vm0, %v1135_v0, %v886_v63 }
 0x3e0   :  { %6621 = vst [vmem:[#allocation38_spill] sm:$0xff] %v5908_v9  ;;  %6622 = vst [vmem:[#allocation39_spill] sm:$0xff] %v5912_v8  ;;  %v1147_v22 = vpack.c.bf16 %v5904_v4, %v5908_v9  ;;  %v1148_v39 = vpack.c.bf16 %v5912_v8, %v5912_v8 }
 0x3e2   :  { %1431 = vmatmul.mubr.bf16.vlgmr.msra.gmra.mrb[20].mxu0 %v1147_v22  ;;  %1482 = vmatmul.mubr.bf16.vlgmr.msra.gmra.mrb[20].mxu1 %v1147_v22 }
 0x3e3   :  { %1690 = vmatpush1.bf16.msra.mxu0 %v5897_v35  ;;  %1731 = vmatpush1.bf16.msra.mxu1 %v5899_v18 }
 0x3e4   :  { %1691 = vmatprep.subr.bf16.mxu0 %v5916_v6  ;;  %1732 = vmatprep.subr.bf16.mxu1 %v5918_v10 }
 0x3e5   :  { %1440 = vmatprep.mubr.bf16.mxu0 %v6613_v21  ;;  %1491 = vmatprep.mubr.bf16.mxu1 %v6613_v21 }
 0x3e7   :  { %1692 = vmatpush1.bf16.msra.mxu0 %v5922_v3  ;;  %1733 = vmatpush1.bf16.msra.mxu1 %v5924_v13 }
 0x3e8   :  { %1693 = vmatprep.subr.bf16.mxu0 %v5928_v26  ;;  %1734 = vmatprep.subr.bf16.mxu1 %v5930_v36 }
 0x3ea   :  { %1441 = vmatmul.mubr.bf16.gmra.mrb[24].mxu0 %v1148_v39  ;;  %1492 = vmatmul.mubr.bf16.gmra.mrb[24].mxu1 %v1148_v39 }
 0x3eb   :  { %1694 = vmatpush1.bf16.msra.mxu0 %v5936_v37  ;;  %1735 = vmatpush1.bf16.msra.mxu1 %v5938_v38 }
 0x3ec   :  { %1695 = vmatprep.subr.bf16.mxu0 %v5944_v40  ;;  %1736 = vmatprep.subr.bf16.mxu1 %v5946_v41 }
 0x3ed   :  { %1721 = vmatprep.mubr.bf16.mxu0 %v6613_v21  ;;  %1762 = vmatprep.mubr.bf16.mxu1 %v6613_v21 }
 0x3ef   :  { %1696 = vmatpush1.bf16.msra.mxu0 %v5950_v42  ;;  %1737 = vmatpush1.bf16.msra.mxu1 %v5952_v43 }
 0x3f0   :  { %1697 = vmatprep.subr.bf16.mxu0 %v5956_v45  ;;  %1738 = vmatprep.subr.bf16.mxu1 %v5958_v48 }
 0x3f3   :  { %1698 = vmatpush1.bf16.msra.mxu0 %v5964_v49  ;;  %1739 = vmatpush1.bf16.msra.mxu1 %v5966_v50 }
 0x3f4   :  { %1699 = vmatprep.subr.bf16.mxu0 %v5970_v51  ;;  %1740 = vmatprep.subr.bf16.mxu1 %v5972_v52 }
 0x3f7   :  { %1700 = vmatpush1.bf16.msra.mxu0 %v5976_v53  ;;  %1741 = vmatpush1.bf16.msra.mxu1 %v5978_v54 }
 0x3f8   :  { %1701 = vmatprep.subr.bf16.mxu0 %v5982_v55  ;;  %1742 = vmatprep.subr.bf16.mxu1 %v5984_v56 }
 0x3fb   :  { %1702 = vmatpush1.bf16.msra.mxu0 %v5988_v57  ;;  %1743 = vmatpush1.bf16.msra.mxu1 %v5990_v59 }
 0x3fc   :  { %1703 = vmatprep.subr.bf16.mxu0 %v5994_v16  ;;  %1744 = vmatprep.subr.bf16.mxu1 %v5996_v60 }
 0x3ff   :  { %1704 = vmatpush1.bf16.msra.mxu0 %v6000_v61  ;;  %1745 = vmatpush1.bf16.msra.mxu1 %v6002_v62 }
 0x400   :  { %1811 = vmatprep.subr.bf16.mxu0 %v5864_v46  ;;  %1852 = vmatprep.subr.bf16.mxu1 %v5866_v47 }
 0x402   :  { %1722 = vmatmul.mubr.bf16.vlgmr.msra.gmra.mrb[28].mxu0 %v1528_v44  ;;  %1763 = vmatmul.mubr.bf16.vlgmr.msra.gmra.mrb[28].mxu1 %v1528_v44 }
 0x403   :  { %1812 = vmatpush1.bf16.msra.mxu0 %v5897_v35  ;;  %1853 = vmatpush1.bf16.msra.mxu1 %v5899_v18 }
 0x404   :  { %1813 = vmatprep.subr.bf16.mxu0 %v5916_v6  ;;  %1854 = vmatprep.subr.bf16.mxu1 %v5918_v10 }
 0x405   :  { %1843 = vmatprep.mubr.bf16.mxu0 %v6613_v21  ;;  %1884 = vmatprep.mubr.bf16.mxu1 %v6613_v21 }
 0x407   :  { %1814 = vmatpush1.bf16.msra.mxu0 %v5922_v3  ;;  %1855 = vmatpush1.bf16.msra.mxu1 %v5924_v13 }
 0x408   :  { %1815 = vmatprep.subr.bf16.mxu0 %v5928_v26  ;;  %1856 = vmatprep.subr.bf16.mxu1 %v5930_v36 }
 0x40b   :  { %1816 = vmatpush1.bf16.msra.mxu0 %v5936_v37  ;;  %1857 = vmatpush1.bf16.msra.mxu1 %v5938_v38 }
 0x40c   :  { %1817 = vmatprep.subr.bf16.mxu0 %v5944_v40  ;;  %1858 = vmatprep.subr.bf16.mxu1 %v5946_v41 }
 0x40f   :  { %1818 = vmatpush1.bf16.msra.mxu0 %v5950_v42  ;;  %1859 = vmatpush1.bf16.msra.mxu1 %v5952_v43 }
 0x410   :  { %1819 = vmatprep.subr.bf16.mxu0 %v5956_v45  ;;  %1860 = vmatprep.subr.bf16.mxu1 %v5958_v48 }
 0x413   :  { %1820 = vmatpush1.bf16.msra.mxu0 %v5964_v49  ;;  %1861 = vmatpush1.bf16.msra.mxu1 %v5966_v50 }
 0x414   :  { %1821 = vmatprep.subr.bf16.mxu0 %v5970_v51  ;;  %1862 = vmatprep.subr.bf16.mxu1 %v5972_v52 }
 0x417   :  { %1822 = vmatpush1.bf16.msra.mxu0 %v5976_v53  ;;  %1863 = vmatpush1.bf16.msra.mxu1 %v5978_v54 }
 0x418   :  { %1823 = vmatprep.subr.bf16.mxu0 %v5982_v55  ;;  %1864 = vmatprep.subr.bf16.mxu1 %v5984_v56 }
 0x41b   :  { %1824 = vmatpush1.bf16.msra.mxu0 %v5988_v57  ;;  %1865 = vmatpush1.bf16.msra.mxu1 %v5990_v59 }
 0x41c   :  { %1825 = vmatprep.subr.bf16.mxu0 %v5994_v16  ;;  %1866 = vmatprep.subr.bf16.mxu1 %v5996_v60 }
 0x41f   :  { %1826 = vmatpush1.bf16.msra.mxu0 %v6000_v61  ;;  %1867 = vmatpush1.bf16.msra.mxu1 %v6002_v62 }
 0x420   :  { %1941 = vmatprep.subr.bf16.mxu0 %v5864_v46  ;;  %1982 = vmatprep.subr.bf16.mxu1 %v5866_v47 }
 0x4b5   :  { %v1432_v2 = vpop.f32.mrb[20].mxu0  ;;  %v1483_v27 = vpop.f32.mrb[20].mxu1 }
 0x4b6   :  { %v1434_v5 = vpop.f32.mrb[21].mxu0  ;;  %v1485_v30 = vpop.f32.mrb[21].mxu1  ;;  %v1433_v39 = vadd.f32 %v1432_v2, %v1221_v31  ;;  %v6056_v1 = vadd.f32 %v1483_v27, %v1229_v32 }
 0x4b7   :  { %v1436_v17 = vpop.f32.mrb[22].mxu0  ;;  %v1487_v33 = vpop.f32.mrb[22].mxu1 }
 0x4b8   :  { %v6048_v14 = vadd.f32 %v1436_v17, %v1221_v31  ;;  %v6050_v46 = vadd.f32 %v1487_v33, %v1229_v32  ;;  %v1438_v47 = vpop.f32.mrb[23].mxu0  ;;  %v1489_v15 = vpop.f32.mrb[23].mxu1  ;;  %v6060_v17 = vadd.f32 %v1434_v5, %v1225_v25  ;;  %v6062_v33 = vadd.f32 %v1485_v30, %v1233_v20 }
 0x4b9   :  { %v6052_v0 = vadd.f32 %v1438_v47, %v1225_v25  ;;  %v6054_v12 = vadd.f32 %v1489_v15, %v1233_v20 }
 0x4ba   :  { %6627 = vst [vmem:[#allocation40_spill] sm:$0xff] %v6060_v17 }
 0x4bd   :  { %v1442_v63 = vpop.f32.mrb[24].mxu0  ;;  %v1493_v22 = vpop.f32.mrb[24].mxu1 }
 0x4be   :  { %v1443_v44 = vadd.f32 %v1442_v63, %v1221_v31  ;;  %v6058_v4 = vadd.f32 %v1493_v22, %v1229_v32  ;;  %v1444_v23 = vpop.f32.mrb[25].mxu0  ;;  %v1495_v8 = vpop.f32.mrb[25].mxu1 }
 0x4bf   :  { %v6064_v9 = vadd.f32 %v1444_v23, %v1225_v25  ;;  %v6066_v47 = vadd.f32 %v1495_v8, %v1233_v20  ;;  %v1446_v15 = vpop.f32.mrb[26].mxu0  ;;  %v1497_v19 = vpop.f32.mrb[26].mxu1 }
 0x4c0   :  { %v1447_v24 = vpop.f32.mrb[27].mxu0  ;;  %v1498_v28 = vpop.f32.mrb[27].mxu1  ;;  %v1524_v2 = vsel %vm203_vm0, %v1433_v39, %v1443_v44  ;;  %v1526_v27 = vsel %vm5761_vm1, %v6056_v1, %v6058_v4  ;;  %v6076_v31 = vsel %vm203_vm0, %v1443_v44, %v1433_v39 }
 0x4c1   :  { %v1525_v28 = vsel %vm5765_vm2, %v6060_v17, %v6064_v9  ;;  %v1527_v32 = vsel %vm5771_vm3, %v6062_v33, %v6066_v47 }
 0x4d5   :  { %v1723_v24 = vpop.f32.mrb[28].mxu0  ;;  %v1764_v25 = vpop.f32.mrb[28].mxu1 }
 0x4d6   :  { %v1771_v19 = vadd.f32 %v1723_v24, %v1524_v2  ;;  %v1773_v20 = vadd.f32 %v1764_v25, %v1526_v27  ;;  %v1725_v63 = vpop.f32.mrb[29].mxu0  ;;  %v1766_v22 = vpop.f32.mrb[29].mxu1 }
 0x4d7   :  { %v1772_v39 = vadd.f32 %v1725_v63, %v1525_v28  ;;  %v1774_v44 = vadd.f32 %v1766_v22, %v1527_v32  ;;  %v1727_v23 = vpop.f32.mrb[30].mxu0  ;;  %v1768_v15 = vpop.f32.mrb[30].mxu1  ;;  %v1515_v32 = vld [vmem:[#allocation14 + $0x8] sm:$0xff] }
 0x4d8   :  { %v4207_v8 = vmul.f32 -1.442695, %v1771_v19  ;;  %v1728_v29 = vpop.f32.mrb[31].mxu0  ;;  %v1769_v34 = vpop.f32.mrb[31].mxu1  ;;  %v4765_v22 = vld [vmem:[#allocation8 + $0x220] ss:$16 sps:$4 sm:$0xff]  }
 0x4d9   :  { %v4208_v11 = vmul.f32 -1.442695, %v1772_v39  ;;  %v4209_v5 = vmul.f32 -1.442695, %v1774_v44  ;;  %v4768_v39 = vld [vmem:[#allocation8 + $0x228] ss:$16 sps:$4 sm:$0xff]  }
 0x4da   :  { %5023 = vpow2.f32 %v4207_v8  ;;  %v4773_v44 = vld [vmem:[#allocation8 + $0x244] ss:$16 sps:$4 sm:$0xff]   ;;  %v4776_v23 = vld [vmem:[#allocation8 + $0x24c] ss:$16 sps:$4 sm:$0xff]   ;;  %v4771_v15 = vld [vmem:[#allocation8 + $0x240] ss:$16 sps:$4 sm:$0xff]  }
 0x4db   :  { %5025 = vpow2.f32 %v4208_v11 }
 0x4dc   :  { %5027 = vpow2.f32 %v4209_v5  ;;  %v4762_v5 = vld [vmem:[#allocation8 + $0x208] ss:$16 sps:$4 sm:$0xff]  }
 0x4dd   :  { %5029 = vtanh.f32 %v1773_v20  ;;  %v4770_v20 = vld [vmem:[#allocation8 + $0x22c] ss:$16 sps:$4 sm:$0xff]  }
 0x4e4   :  { %v5024_v17 = vpop.eup %5023 }
 0x4e5   :  { %v5026_v58 = vpop.eup %5025  ;;  %v1778_v30 = vadd.f32 1.0, %v5024_v17 }
 0x4e6   :  { %v1784_v2 = vadd.f32 1.0, %v5026_v58  ;;  %v5028_v27 = vpop.eup %5027 }
 0x4e7   :  { %5031 = vrcp.f32 %v1778_v30  ;;  %v5030_v28 = vpop.eup %5029  ;;  %v1791_v29 = vadd.f32 1.0, %v5028_v27  ;;  %v4767_v30 = vld [vmem:[#allocation8 + $0x224] ss:$16 sps:$4 sm:$0xff]  }
 0x4e8   :  { %5033 = vrcp.f32 %v1784_v2  ;;  %v4774_v2 = vld [vmem:[#allocation8 + $0x248] ss:$16 sps:$4 sm:$0xff]   ;;  %v4779_v27 = vld [vmem:[#allocation8 + $0x264] ss:$16 sps:$4 sm:$0xff]  }
 0x4e9   :  { %5035 = vrcp.f32 %v1791_v29  ;;  %v4783_v29 = vld [vmem:[#allocation8 + $0x280] ss:$16 sps:$4 sm:$0xff]  }
 0x4f1   :  { %v5032_v24 = vpop.eup %5031 }
 0x4f2   :  { %v5034_v25 = vpop.eup %5033  ;;  %v1795_v19 = vmul.f32 %v5032_v24, %v5030_v28  ;;  %v4782_v28 = vld [vmem:[#allocation8 + $0x26c] ss:$16 sps:$4 sm:$0xff]   ;;  %v4780_v24 = vld [vmem:[#allocation8 + $0x268] ss:$16 sps:$4 sm:$0xff]  }
 0x4f3   :  { %v1794_v34 = vmul.f32 %v5034_v25, %v1515_v32  ;;  %v5036_v11 = vpop.eup %5035  ;;  %v4777_v32 = vld [vmem:[#allocation8 + $0x260] ss:$16 sps:$4 sm:$0xff]   ;;  %v4785_v25 = vld [vmem:[#allocation8 + $0x284] ss:$16 sps:$4 sm:$0xff]  }
 0x4f5   :  { %v6098_v63 = vadd.f32 %v1795_v19, %v1794_v34  ;;  %v4788_v19 = vld [vmem:[#allocation8 + $0x28c] ss:$16 sps:$4 sm:$0xff]   ;;  %v4786_v34 = vld [vmem:[#allocation8 + $0x288] ss:$16 sps:$4 sm:$0xff]  }
 0x4f7   :  { %5037 = vtanh.f32 %v6098_v63 }
 0x501   :  { %v5038_v17 = vpop.eup %5037 }
 0x502   :  { %v6101_v8 = vmul.f32 %v5038_v17, %v5036_v11  ;;  %v4789_v11 = vld [vmem:[#allocation8 + $0x2a0] ss:$16 sps:$4 sm:$0xff]   ;;  %v4792_v17 = vld [vmem:[#allocation8 + $0x2a8] ss:$16 sps:$4 sm:$0xff]  }
 0x504   :  { %v1810_v58 = vpack.c.bf16 %v6101_v8, %v6101_v8 }
 0x506   :  { %1844 = vmatmul.mubr.bf16.vlgmr.msra.gmra.mrb[32].mxu0 %v1810_v58  ;;  %1885 = vmatmul.mubr.bf16.vlgmr.msra.gmra.mrb[32].mxu1 %v1810_v58  ;;  %v4794_v58 = vld [vmem:[#allocation8 + $0x2ac] ss:$16 sps:$4 sm:$0xff]  }
 0x507   :  { %1942 = vmatpush1.bf16.msra.mxu0 %v5897_v35  ;;  %1983 = vmatpush1.bf16.msra.mxu1 %v5899_v18 }
 0x508   :  { %1943 = vmatprep.subr.bf16.mxu0 %v5916_v6  ;;  %1984 = vmatprep.subr.bf16.mxu1 %v5918_v10 }
 0x509   :  { %1973 = vmatprep.mubr.bf16.mxu0 %v6613_v21  ;;  %2014 = vmatprep.mubr.bf16.mxu1 %v6613_v21 }
 0x50b   :  { %1944 = vmatpush1.bf16.msra.mxu0 %v5922_v3  ;;  %1985 = vmatpush1.bf16.msra.mxu1 %v5924_v13 }
 0x50c   :  { %1945 = vmatprep.subr.bf16.mxu0 %v5928_v26  ;;  %1986 = vmatprep.subr.bf16.mxu1 %v5930_v36 }
 0x50f   :  { %1946 = vmatpush1.bf16.msra.mxu0 %v5936_v37  ;;  %1987 = vmatpush1.bf16.msra.mxu1 %v5938_v38 }
 0x510   :  { %1947 = vmatprep.subr.bf16.mxu0 %v5944_v40  ;;  %1988 = vmatprep.subr.bf16.mxu1 %v5946_v41 }
 0x513   :  { %1948 = vmatpush1.bf16.msra.mxu0 %v5950_v42  ;;  %1989 = vmatpush1.bf16.msra.mxu1 %v5952_v43 }
 0x514   :  { %1949 = vmatprep.subr.bf16.mxu0 %v5956_v45  ;;  %1990 = vmatprep.subr.bf16.mxu1 %v5958_v48 }
 0x517   :  { %1950 = vmatpush1.bf16.msra.mxu0 %v5964_v49  ;;  %1991 = vmatpush1.bf16.msra.mxu1 %v5966_v50 }
 0x518   :  { %1951 = vmatprep.subr.bf16.mxu0 %v5970_v51  ;;  %1992 = vmatprep.subr.bf16.mxu1 %v5972_v52 }
 0x51b   :  { %1952 = vmatpush1.bf16.msra.mxu0 %v5976_v53  ;;  %1993 = vmatpush1.bf16.msra.mxu1 %v5978_v54 }
 0x51c   :  { %1953 = vmatprep.subr.bf16.mxu0 %v5982_v55  ;;  %1994 = vmatprep.subr.bf16.mxu1 %v5984_v56 }
 0x51f   :  { %1954 = vmatpush1.bf16.msra.mxu0 %v5988_v57  ;;  %1995 = vmatpush1.bf16.msra.mxu1 %v5990_v59 }
 0x520   :  { %1955 = vmatprep.subr.bf16.mxu0 %v5994_v16  ;;  %1996 = vmatprep.subr.bf16.mxu1 %v5996_v60 }
 0x523   :  { %1956 = vmatpush1.bf16.msra.mxu0 %v6000_v61  ;;  %1997 = vmatpush1.bf16.msra.mxu1 %v6002_v62 }
 0x5d9   :  { %v1845_v35 = vpop.f32.mrb[32].mxu0  ;;  %v1886_v18 = vpop.f32.mrb[32].mxu1 }
 0x5da   :  { %v1893_v6 = vadd.f32 %v1845_v35, %v6048_v14  ;;  %v1895_v10 = vadd.f32 %v1886_v18, %v6050_v46  ;;  %v1847_v3 = vpop.f32.mrb[33].mxu0  ;;  %v1888_v13 = vpop.f32.mrb[33].mxu1  ;;  %v4761_v46 = vld [vmem:[#allocation8 + $0x204] ss:$16 sps:$4 sm:$0xff]   ;;  %v4800_v18 = vld [vmem:[#allocation8 + $0x2cc] ss:$16 sps:$4 sm:$0xff]  }
 0x5db   :  { %v1894_v26 = vadd.f32 %v1847_v3, %v6052_v0  ;;  %v1896_v36 = vadd.f32 %v1888_v13, %v6054_v12  ;;  %v1849_v37 = vpop.f32.mrb[34].mxu0  ;;  %v1890_v38 = vpop.f32.mrb[34].mxu1  ;;  %v4764_v0 = vld [vmem:[#allocation8 + $0x20c] ss:$16 sps:$4 sm:$0xff]   ;;  %v4759_v12 = vld [vmem:[#allocation8 + $0x200] ss:$16 sps:$4 sm:$0xff]   ;;  %2315 = vmatprep.subr.bf16.mxu0 %v4761_v46 }
 0x5dc   :  { %v4210_v40 = vmul.f32 -1.442695, %v1893_v6  ;;  %v1850_v41 = vpop.f32.mrb[35].mxu0  ;;  %v1891_v42 = vpop.f32.mrb[35].mxu1  ;;  %2366 = vmatprep.subr.bf16.mxu1 %v4764_v0  ;;  %v4797_v35 = vld [vmem:[#allocation8 + $0x2c4] ss:$16 sps:$4 sm:$0xff]  }
 0x5dd   :  { %v4211_v43 = vmul.f32 -1.442695, %v1894_v26  ;;  %v4212_v45 = vmul.f32 -1.442695, %v1896_v36  ;;  %v4795_v6 = vld [vmem:[#allocation8 + $0x2c0] ss:$16 sps:$4 sm:$0xff]  }
 0x5de   :  { %5039 = vpow2.f32 %v4210_v40  ;;  %v4803_v3 = vld [vmem:[#allocation8 + $0x2e4] ss:$16 sps:$4 sm:$0xff]   ;;  %v4806_v13 = vld [vmem:[#allocation8 + $0x2ec] ss:$16 sps:$4 sm:$0xff]   ;;  %v4801_v26 = vld [vmem:[#allocation8 + $0x2e0] ss:$16 sps:$4 sm:$0xff]  }
 0x5df   :  { %5041 = vpow2.f32 %v4211_v43  ;;  %v4804_v36 = vld [vmem:[#allocation8 + $0x2e8] ss:$16 sps:$4 sm:$0xff]   ;;  %v6151_v37 = vld [vmem:[#allocation10 + $0x204] ss:$16 sps:$4 sm:$0xff]   ;;  %v6153_v38 = vld [vmem:[#allocation10 + $0x20c] ss:$16 sps:$4 sm:$0xff]   ;;  %v6628_v43 = vsel %vm5761_vm1, %v6058_v4, %v6056_v1 }
 0x5e0   :  { %5043 = vpow2.f32 %v4212_v45 }
 0x5e1   :  { %5045 = vtanh.f32 %v1895_v10  ;;  %v4798_v10 = vld [vmem:[#allocation8 + $0x2c8] ss:$16 sps:$4 sm:$0xff]  }
 0x5e8   :  { %v5040_v48 = vpop.eup %5039 }
 0x5e9   :  { %v5042_v49 = vpop.eup %5041  ;;  %v1900_v50 = vadd.f32 1.0, %v5040_v48 }
 0x5ea   :  { %v1906_v51 = vadd.f32 1.0, %v5042_v49  ;;  %v5044_v52 = vpop.eup %5043 }
 0x5eb   :  { %5047 = vrcp.f32 %v1900_v50  ;;  %v5046_v53 = vpop.eup %5045  ;;  %v1913_v57 = vadd.f32 1.0, %v5044_v52 }
 0x5ec   :  { %5049 = vrcp.f32 %v1906_v51  ;;  %v6630_v51 = vld [vmem:[#allocation40_spill] sm:$0xff] }
 0x5ed   :  { %5051 = vrcp.f32 %v1913_v57  ;;  %v6631_v52 = vsel %vm5765_vm2, %v6064_v9, %v6630_v51  ;;  %v6258_v51 = vld [vmem:[#allocation10 + $0x2c4] ss:$16 sps:$4 sm:$0xff]  }
 0x5f5   :  { %v5048_v54 = vpop.eup %5047 }
 0x5f6   :  { %v5050_v55 = vpop.eup %5049  ;;  %v1917_v56 = vmul.f32 %v5048_v54, %v5046_v53 }
 0x5f7   :  { %v1916_v59 = vmul.f32 %v5050_v55, %v6098_v63  ;;  %v5052_v60 = vpop.eup %5051  ;;  %v4791_v63 = vld [vmem:[#allocation8 + $0x2a4] ss:$16 sps:$4 sm:$0xff]   ;;  %v6633_v55 = vsel %vm5771_vm3, %v6066_v47, %v6062_v33 }
 0x5f9   :  { %v6142_v16 = vadd.f32 %v1917_v56, %v1916_v59 }
 0x5fb   :  { %5053 = vtanh.f32 %v6142_v16 }
 0x605   :  { %v5054_v61 = vpop.eup %5053 }
 0x606   :  { %v6145_v62 = vmul.f32 %v5054_v61, %v5052_v60 }
 0x608   :  { %v1940_v14 = vpack.c.bf16 %v6145_v62, %v6145_v62 }
 0x60a   :  { %1974 = vmatmul.mubr.bf16.vlgmr.msra.gmra.mrb[36].mxu0 %v1940_v14  ;;  %2015 = vmatmul.mubr.bf16.vlgmr.msra.gmra.mrb[36].mxu1 %v1940_v14 }
 0x60b   :  { %2347 = vmatprep.mubr.bf16.mxu0 %v6613_v21  ;;  %2398 = vmatprep.mubr.bf16.mxu1 %v6613_v21 }
 0x60c   :  { %2316 = vmatpush1.bf16.msra.mxu0 %v4759_v12  ;;  %2367 = vmatpush1.bf16.msra.mxu1 %v4762_v5 }
 0x60d   :  { %2317 = vmatprep.subr.bf16.mxu0 %v4767_v30  ;;  %2368 = vmatprep.subr.bf16.mxu1 %v4770_v20 }
 0x610   :  { %2318 = vmatpush1.bf16.msra.mxu0 %v4765_v22  ;;  %2369 = vmatpush1.bf16.msra.mxu1 %v4768_v39 }
 0x611   :  { %2319 = vmatprep.subr.bf16.mxu0 %v4773_v44  ;;  %2370 = vmatprep.subr.bf16.mxu1 %v4776_v23 }
 0x614   :  { %2320 = vmatpush1.bf16.msra.mxu0 %v4771_v15  ;;  %2371 = vmatpush1.bf16.msra.mxu1 %v4774_v2  ;;  %v1923_v2 = vsel %vm203_vm0, %v6145_v62, 0.0 }
 0x615   :  { %2321 = vmatprep.subr.bf16.mxu0 %v4779_v27  ;;  %2372 = vmatprep.subr.bf16.mxu1 %v4782_v28  ;;  %v1800_v28 = vsel %vm203_vm0, %v6101_v8, 0.0 }
 0x618   :  { %2322 = vmatpush1.bf16.msra.mxu0 %v4777_v32  ;;  %2373 = vmatpush1.bf16.msra.mxu1 %v4780_v24  ;;  %v1804_v32 = vsel %vm208_vm4, %v6101_v8, 0.0  ;;  %v6185_v24 = vld [vmem:[#allocation10 + $0x208] ss:$16 sps:$4 sm:$0xff]   ;;  %v6200_v8 = vld [vmem:[#allocation10 + $0x220] ss:$16 sps:$4 sm:$0xff]  }
 0x619   :  { %2323 = vmatprep.subr.bf16.mxu0 %v4785_v25  ;;  %2374 = vmatprep.subr.bf16.mxu1 %v4788_v19  ;;  %v1926_v25 = vsel %vm208_vm4, %v6145_v62, %v1923_v2  ;;  %v6202_v62 = vld [vmem:[#allocation10 + $0x228] ss:$16 sps:$4 sm:$0xff]  }
 0x61c   :  { %2324 = vmatpush1.bf16.msra.mxu0 %v4783_v29  ;;  %2375 = vmatpush1.bf16.msra.mxu1 %v4786_v34 }
 0x61d   :  { %2325 = vmatprep.subr.bf16.mxu0 %v4791_v63  ;;  %2376 = vmatprep.subr.bf16.mxu1 %v4794_v58  ;;  %v6194_v63 = vld [vmem:[#allocation10 + $0x224] ss:$16 sps:$4 sm:$0xff]   ;;  %v6208_v58 = vld [vmem:[#allocation10 + $0x24c] ss:$16 sps:$4 sm:$0xff]  }
 0x620   :  { %2326 = vmatpush1.bf16.msra.mxu0 %v4789_v11  ;;  %2377 = vmatpush1.bf16.msra.mxu1 %v4792_v17  ;;  %v6196_v11 = vld [vmem:[#allocation10 + $0x22c] ss:$16 sps:$4 sm:$0xff]   ;;  %v6206_v17 = vld [vmem:[#allocation10 + $0x244] ss:$16 sps:$4 sm:$0xff]  }
 0x621   :  { %2327 = vmatprep.subr.bf16.mxu0 %v4797_v35  ;;  %2378 = vmatprep.subr.bf16.mxu1 %v4800_v18  ;;  %v6214_v35 = vld [vmem:[#allocation10 + $0x240] ss:$16 sps:$4 sm:$0xff]   ;;  %v6216_v18 = vld [vmem:[#allocation10 + $0x248] ss:$16 sps:$4 sm:$0xff]  }
 0x624   :  { %2328 = vmatpush1.bf16.msra.mxu0 %v4795_v6  ;;  %2379 = vmatpush1.bf16.msra.mxu1 %v4798_v10  ;;  %v6220_v10 = vld [vmem:[#allocation10 + $0x264] ss:$16 sps:$4 sm:$0xff]  }
 0x625   :  { %2329 = vmatprep.subr.bf16.mxu0 %v4803_v3  ;;  %2380 = vmatprep.subr.bf16.mxu1 %v4806_v13  ;;  %v6222_v3 = vld [vmem:[#allocation10 + $0x26c] ss:$16 sps:$4 sm:$0xff]   ;;  %v6226_v13 = vld [vmem:[#allocation10 + $0x260] ss:$16 sps:$4 sm:$0xff]  }
 0x628   :  { %2330 = vmatpush1.bf16.msra.mxu0 %v4801_v26  ;;  %2381 = vmatpush1.bf16.msra.mxu1 %v4804_v36  ;;  %v6228_v26 = vld [vmem:[#allocation10 + $0x268] ss:$16 sps:$4 sm:$0xff]   ;;  %v6232_v36 = vld [vmem:[#allocation10 + $0x284] ss:$16 sps:$4 sm:$0xff]  }
 0x629   :  { %2606 = vmatprep.subr.bf16.mxu0 %v6151_v37  ;;  %2647 = vmatprep.subr.bf16.mxu1 %v6153_v38 }
 0x6dd   :  { %v1975_v40 = vpop.f32.mrb[36].mxu0  ;;  %v2016_v41 = vpop.f32.mrb[36].mxu1 }
 0x6de   :  { %v2023_v42 = vadd.f32 %v1975_v40, %v6076_v31  ;;  %v2025_v45 = vadd.f32 %v2016_v41, %v6628_v43  ;;  %v1977_v48 = vpop.f32.mrb[37].mxu0  ;;  %v2018_v49 = vpop.f32.mrb[37].mxu1  ;;  %v6234_v40 = vld [vmem:[#allocation10 + $0x28c] ss:$16 sps:$4 sm:$0xff]   ;;  %v6240_v41 = vld [vmem:[#allocation10 + $0x280] ss:$16 sps:$4 sm:$0xff]  }
 0x6df   :  { %v2024_v53 = vadd.f32 %v1977_v48, %v6631_v52  ;;  %v2026_v31 = vadd.f32 %v2018_v49, %v6633_v55  ;;  %v1979_v56 = vpop.f32.mrb[38].mxu0  ;;  %v2020_v57 = vpop.f32.mrb[38].mxu1  ;;  %v6246_v43 = vld [vmem:[#allocation10 + $0x2a4] ss:$16 sps:$4 sm:$0xff]   ;;  %v6252_v48 = vld [vmem:[#allocation10 + $0x2a0] ss:$16 sps:$4 sm:$0xff]  }
 0x6e0   :  { %v4213_v59 = vmul.f32 -1.442695, %v2023_v42  ;;  %v1980_v60 = vpop.f32.mrb[39].mxu0  ;;  %v2021_v4 = vpop.f32.mrb[39].mxu1  ;;  %v6242_v42 = vld [vmem:[#allocation10 + $0x288] ss:$16 sps:$4 sm:$0xff]  }
 0x6e1   :  { %v4214_v1 = vmul.f32 -1.442695, %v2024_v53  ;;  %v4215_v61 = vmul.f32 -1.442695, %v2026_v31  ;;  %v6254_v49 = vld [vmem:[#allocation10 + $0x2a8] ss:$16 sps:$4 sm:$0xff]  }
 0x6e2   :  { %5055 = vpow2.f32 %v4213_v59  ;;  %v6260_v52 = vld [vmem:[#allocation10 + $0x2cc] ss:$16 sps:$4 sm:$0xff]   ;;  %v6264_v53 = vld [vmem:[#allocation10 + $0x2c0] ss:$16 sps:$4 sm:$0xff]   ;;  %v6266_v55 = vld [vmem:[#allocation10 + $0x2c8] ss:$16 sps:$4 sm:$0xff]  }
 0x6e3   :  { %5057 = vpow2.f32 %v4214_v1  ;;  %v6270_v31 = vld [vmem:[#allocation10 + $0x2e4] ss:$16 sps:$4 sm:$0xff]   ;;  %v6272_v56 = vld [vmem:[#allocation10 + $0x2ec] ss:$16 sps:$4 sm:$0xff]   ;;  %v6276_v57 = vld [vmem:[#allocation10 + $0x2e0] ss:$16 sps:$4 sm:$0xff]  }
 0x6e4   :  { %5059 = vpow2.f32 %v4215_v61  ;;  %v6278_v59 = vld [vmem:[#allocation10 + $0x2e8] ss:$16 sps:$4 sm:$0xff]   ;;  %v2430_v60 = vld [vmem:[#allocation13 + $0x10] sm:$0xff] }
 0x6e5   :  { %5061 = vtanh.f32 %v2025_v45  ;;  %v6248_v45 = vld [vmem:[#allocation10 + $0x2ac] ss:$16 sps:$4 sm:$0xff]   ;;  %v2445_v4 = vpack.c.bf16 %v2430_v60, %v2430_v60  ;;  %v2133_v1 = vld [vmem:[#allocation11 + $0x8] sm:$0xf] }
 0x6ec   :  { %v5056_v14 = vpop.eup %5055 }
 0x6ed   :  { %v5058_v46 = vpop.eup %5057  ;;  %v2030_v0 = vadd.f32 1.0, %v5056_v14 }
 0x6ee   :  { %v2036_v9 = vadd.f32 1.0, %v5058_v46  ;;  %v5060_v12 = vpop.eup %5059  ;;  %v6635_v46 = vld [vmem:[#allocation30_spill] sm:$0xff] }
 0x6ef   :  { %5063 = vrcp.f32 %v2030_v0  ;;  %v5062_v33 = vpop.eup %5061  ;;  %v2043_v20 = vadd.f32 1.0, %v5060_v12  ;;  %v2138_v0 = vrot.slane %v2133_v1, %v6635_v46 }
 0x6f0   :  { %5065 = vrcp.f32 %v2036_v9  ;;  %v6636_v9 = vld [vmem:[#allocation31_spill] sm:$0xff] }
 0x6f1   :  { %5067 = vrcp.f32 %v2043_v20  ;;  %v2146_v12 = vrot.slane %v2133_v1, %v6636_v9  ;;  %v6638_v20 = vld [vmem:[#allocation33_spill] sm:$0xff] }
 0x6f9   :  { %v5064_v47 = vpop.eup %5063 }
 0x6fa   :  { %v5066_v5 = vpop.eup %5065  ;;  %v2047_v30 = vmul.f32 %v5064_v47, %v5062_v33 }
 0x6fb   :  { %v2046_v22 = vmul.f32 %v5066_v5, %v6142_v16  ;;  %v5068_v44 = vpop.eup %5067  ;;  %v6183_v16 = vld [vmem:[#allocation10 + $0x200] ss:$16 sps:$4 sm:$0xff]   ;;  %v6637_v5 = vld [vmem:[#allocation34_spill] sm:$0xff] }
 0x6fd   :  { %v2048_v39 = vadd.f32 %v2047_v30, %v2046_v22  ;;  %v2142_v30 = vrot.slane %v2133_v1, %v6637_v5  ;;  %v2150_v22 = vrot.slane %v2133_v1, %v6638_v20 }
 0x6ff   :  { %5069 = vtanh.f32 %v2048_v39  ;;  %2060 = vst [vmem:[#allocation22 + $0x8] sm:$0xff] %v2048_v39 }
 0x709   :  { %v5070_v23 = vpop.eup %5069 }
 0x70a   :  { %v2050_v27 = vmul.f32 %v5070_v23, %v5068_v44 }
 0x70c   :  { %v2055_v19 = vsel %vm208_vm4, %v2050_v27, %v1800_v28  ;;  %2058 = vst [vmem:[#allocation20 + $0x8] sm:$0xff] %v2050_v27  ;;  %v2052_v29 = vsel %vm203_vm0, %v2050_v27, %v1804_v32 }
 0x70d   :  { %v2064_v34 = vpack.c.bf16 %v1926_v25, %v2055_v19  ;;  %v2065_v6 = vpack.c.bf16 %v2052_v29, %v2052_v29 }
 0x70f   :  { %2348 = vmatmul.mubr.bf16.vlgmr.msra.gmra.mrb[40].mxu0 %v2064_v34  ;;  %2399 = vmatmul.mubr.bf16.vlgmr.msra.gmra.mrb[40].mxu1 %v2064_v34 }
 0x710   :  { %2607 = vmatpush1.bf16.msra.mxu0 %v6183_v16  ;;  %2648 = vmatpush1.bf16.msra.mxu1 %v6185_v24 }
 0x711   :  { %2608 = vmatprep.subr.bf16.mxu0 %v6194_v63  ;;  %2649 = vmatprep.subr.bf16.mxu1 %v6196_v11 }
 0x712   :  { %2357 = vmatprep.mubr.bf16.mxu0 %v6613_v21  ;;  %2408 = vmatprep.mubr.bf16.mxu1 %v6613_v21 }
 0x714   :  { %2609 = vmatpush1.bf16.msra.mxu0 %v6200_v8  ;;  %2650 = vmatpush1.bf16.msra.mxu1 %v6202_v62 }
 0x715   :  { %2610 = vmatprep.subr.bf16.mxu0 %v6206_v17  ;;  %2651 = vmatprep.subr.bf16.mxu1 %v6208_v58 }
 0x717   :  { %2358 = vmatmul.mubr.bf16.gmra.mrb[44].mxu0 %v2065_v6  ;;  %2409 = vmatmul.mubr.bf16.gmra.mrb[44].mxu1 %v2065_v6 }
 0x718   :  { %2611 = vmatpush1.bf16.msra.mxu0 %v6214_v35  ;;  %2652 = vmatpush1.bf16.msra.mxu1 %v6216_v18 }
 0x719   :  { %2612 = vmatprep.subr.bf16.mxu0 %v6220_v10  ;;  %2653 = vmatprep.subr.bf16.mxu1 %v6222_v3 }
 0x71a   :  { %2638 = vmatprep.mubr.bf16.mxu0 %v6613_v21  ;;  %2679 = vmatprep.mubr.bf16.mxu1 %v6613_v21 }
 0x71c   :  { %2613 = vmatpush1.bf16.msra.mxu0 %v6226_v13  ;;  %2654 = vmatpush1.bf16.msra.mxu1 %v6228_v26 }
 0x71d   :  { %2614 = vmatprep.subr.bf16.mxu0 %v6232_v36  ;;  %2655 = vmatprep.subr.bf16.mxu1 %v6234_v40 }
 0x720   :  { %2615 = vmatpush1.bf16.msra.mxu0 %v6240_v41  ;;  %2656 = vmatpush1.bf16.msra.mxu1 %v6242_v42 }
 0x721   :  { %2616 = vmatprep.subr.bf16.mxu0 %v6246_v43  ;;  %2657 = vmatprep.subr.bf16.mxu1 %v6248_v45 }
 0x724   :  { %2617 = vmatpush1.bf16.msra.mxu0 %v6252_v48  ;;  %2658 = vmatpush1.bf16.msra.mxu1 %v6254_v49 }
 0x725   :  { %2618 = vmatprep.subr.bf16.mxu0 %v6258_v51  ;;  %2659 = vmatprep.subr.bf16.mxu1 %v6260_v52 }
 0x728   :  { %2619 = vmatpush1.bf16.msra.mxu0 %v6264_v53  ;;  %2660 = vmatpush1.bf16.msra.mxu1 %v6266_v55 }
 0x729   :  { %2620 = vmatprep.subr.bf16.mxu0 %v6270_v31  ;;  %2661 = vmatprep.subr.bf16.mxu1 %v6272_v56 }
 0x72c   :  { %2621 = vmatpush1.bf16.msra.mxu0 %v6276_v57  ;;  %2662 = vmatpush1.bf16.msra.mxu1 %v6278_v59 }
 0x72d   :  { %2727 = vmatprep.subr.bf16.mxu0 %v6151_v37  ;;  %2768 = vmatprep.subr.bf16.mxu1 %v6153_v38 }
 0x72f   :  { %2639 = vmatmul.mubr.bf16.vlgmr.msra.gmra.mrb[48].mxu0 %v2445_v4  ;;  %2680 = vmatmul.mubr.bf16.vlgmr.msra.gmra.mrb[48].mxu1 %v2445_v4 }
 0x730   :  { %2728 = vmatpush1.bf16.msra.mxu0 %v6183_v16  ;;  %2769 = vmatpush1.bf16.msra.mxu1 %v6185_v24 }
 0x731   :  { %2729 = vmatprep.subr.bf16.mxu0 %v6194_v63  ;;  %2770 = vmatprep.subr.bf16.mxu1 %v6196_v11 }
 0x732   :  { %2759 = vmatprep.mubr.bf16.mxu0 %v6613_v21  ;;  %2800 = vmatprep.mubr.bf16.mxu1 %v6613_v21 }
 0x734   :  { %2730 = vmatpush1.bf16.msra.mxu0 %v6200_v8  ;;  %2771 = vmatpush1.bf16.msra.mxu1 %v6202_v62 }
 0x735   :  { %2731 = vmatprep.subr.bf16.mxu0 %v6206_v17  ;;  %2772 = vmatprep.subr.bf16.mxu1 %v6208_v58 }
 0x738   :  { %2732 = vmatpush1.bf16.msra.mxu0 %v6214_v35  ;;  %2773 = vmatpush1.bf16.msra.mxu1 %v6216_v18 }
 0x739   :  { %2733 = vmatprep.subr.bf16.mxu0 %v6220_v10  ;;  %2774 = vmatprep.subr.bf16.mxu1 %v6222_v3 }
 0x73c   :  { %2734 = vmatpush1.bf16.msra.mxu0 %v6226_v13  ;;  %2775 = vmatpush1.bf16.msra.mxu1 %v6228_v26 }
 0x73d   :  { %2735 = vmatprep.subr.bf16.mxu0 %v6232_v36  ;;  %2776 = vmatprep.subr.bf16.mxu1 %v6234_v40 }
 0x740   :  { %2736 = vmatpush1.bf16.msra.mxu0 %v6240_v41  ;;  %2777 = vmatpush1.bf16.msra.mxu1 %v6242_v42 }
 0x741   :  { %2737 = vmatprep.subr.bf16.mxu0 %v6246_v43  ;;  %2778 = vmatprep.subr.bf16.mxu1 %v6248_v45 }
 0x744   :  { %2738 = vmatpush1.bf16.msra.mxu0 %v6252_v48  ;;  %2779 = vmatpush1.bf16.msra.mxu1 %v6254_v49 }
 0x745   :  { %2739 = vmatprep.subr.bf16.mxu0 %v6258_v51  ;;  %2780 = vmatprep.subr.bf16.mxu1 %v6260_v52 }
 0x748   :  { %2740 = vmatpush1.bf16.msra.mxu0 %v6264_v53  ;;  %2781 = vmatpush1.bf16.msra.mxu1 %v6266_v55 }
 0x749   :  { %2741 = vmatprep.subr.bf16.mxu0 %v6270_v31  ;;  %2782 = vmatprep.subr.bf16.mxu1 %v6272_v56 }
 0x74c   :  { %2742 = vmatpush1.bf16.msra.mxu0 %v6276_v57  ;;  %2783 = vmatpush1.bf16.msra.mxu1 %v6278_v59 }
 0x74d   :  { %2856 = vmatprep.subr.bf16.mxu0 %v6151_v37  ;;  %2897 = vmatprep.subr.bf16.mxu1 %v6153_v38 }
 0x7e2   :  { %v2349_v61 = vpop.f32.mrb[40].mxu0  ;;  %v2400_v14 = vpop.f32.mrb[40].mxu1 }
 0x7e3   :  { %v2351_v33 = vpop.f32.mrb[41].mxu0  ;;  %v2402_v47 = vpop.f32.mrb[41].mxu1  ;;  %v2350_v19 = vadd.f32 %v2349_v61, %v2138_v0  ;;  %v6332_v29 = vadd.f32 %v2400_v14, %v2146_v12 }
 0x7e4   :  { %v2353_v39 = vpop.f32.mrb[42].mxu0  ;;  %v2404_v44 = vpop.f32.mrb[42].mxu1  ;;  %v6336_v1 = vadd.f32 %v2351_v33, %v2142_v30  ;;  %v6338_v20 = vadd.f32 %v2402_v47, %v2150_v22 }
 0x7e5   :  { %v6324_v23 = vadd.f32 %v2353_v39, %v2138_v0  ;;  %v6326_v37 = vadd.f32 %v2404_v44, %v2146_v12  ;;  %v2355_v38 = vpop.f32.mrb[43].mxu0  ;;  %v2406_v2 = vpop.f32.mrb[43].mxu1 }
 0x7e6   :  { %v6328_v27 = vadd.f32 %v2355_v38, %v2142_v30  ;;  %v6330_v28 = vadd.f32 %v2406_v2, %v2150_v22  ;;  %6639 = vst [vmem:[#allocation40_spill] sm:$0xff] %v6336_v1 }
 0x7ea   :  { %v2359_v32 = vpop.f32.mrb[44].mxu0  ;;  %v2410_v25 = vpop.f32.mrb[44].mxu1 }
 0x7eb   :  { %v2360_v34 = vadd.f32 %v2359_v32, %v2138_v0  ;;  %v6334_v6 = vadd.f32 %v2410_v25, %v2146_v12  ;;  %v2361_v60 = vpop.f32.mrb[45].mxu0  ;;  %v2412_v4 = vpop.f32.mrb[45].mxu1 }
 0x7ec   :  { %v6340_v39 = vadd.f32 %v2361_v60, %v2142_v30  ;;  %v6342_v44 = vadd.f32 %v2412_v4, %v2150_v22  ;;  %v2363_v38 = vpop.f32.mrb[46].mxu0  ;;  %v2414_v2 = vpop.f32.mrb[46].mxu1 }
 0x7ed   :  { %v2364_v5 = vpop.f32.mrb[47].mxu0  ;;  %v2415_v9 = vpop.f32.mrb[47].mxu1  ;;  %v2441_v61 = vsel %vm203_vm0, %v2350_v19, %v2360_v34  ;;  %v2443_v14 = vsel %vm5761_vm1, %v6332_v29, %v6334_v6  ;;  %v6352_v0 = vsel %vm203_vm0, %v2360_v34, %v2350_v19 }
 0x7ee   :  { %v2442_v9 = vsel %vm5765_vm2, %v6336_v1, %v6340_v39  ;;  %v2444_v33 = vsel %vm5771_vm3, %v6338_v20, %v6342_v44 }
 0x802   :  { %v2640_v30 = vpop.f32.mrb[48].mxu0  ;;  %v2681_v22 = vpop.f32.mrb[48].mxu1 }
 0x803   :  { %v2688_v32 = vadd.f32 %v2640_v30, %v2441_v61  ;;  %v2690_v25 = vadd.f32 %v2681_v22, %v2443_v14  ;;  %v2642_v19 = vpop.f32.mrb[49].mxu0  ;;  %v2683_v34 = vpop.f32.mrb[49].mxu1 }
 0x804   :  { %v2689_v60 = vadd.f32 %v2642_v19, %v2442_v9  ;;  %v2691_v4 = vadd.f32 %v2683_v34, %v2444_v33  ;;  %v2644_v38 = vpop.f32.mrb[50].mxu0  ;;  %v2685_v2 = vpop.f32.mrb[50].mxu1  ;;  %v2432_v33 = vld [vmem:[#allocation14 + $0x10] sm:$0xff]  ;;  %v4862_v34 = vld [vmem:[#allocation16 + $0x20] ss:$12 sps:$4 sm:$0xff]  }
 0x805   :  { %v4280_v12 = vmul.f32 -1.442695, %v2688_v32  ;;  %v2645_v46 = vpop.f32.mrb[51].mxu0  ;;  %v2686_v15 = vpop.f32.mrb[51].mxu1  ;;  %v4866_v38 = vld [vmem:[#allocation16 + $0x38] ss:$12 sps:$4 sm:$0xff]  }
 0x806   :  { %v4281_v50 = vmul.f32 -1.442695, %v2689_v60  ;;  %v4282_v47 = vmul.f32 -1.442695, %v2691_v4  ;;  %v4865_v60 = vld [vmem:[#allocation16 + $0x34] ss:$12 sps:$4 sm:$0xff]  }
 0x807   :  { %5071 = vpow2.f32 %v4280_v12  ;;  %v4863_v4 = vld [vmem:[#allocation16 + $0x30] ss:$12 sps:$4 sm:$0xff]   ;;  %v4869_v2 = vld [vmem:[#allocation16 + $0x4c] ss:$12 sps:$4 sm:$0xff]  }
 0x808   :  { %5073 = vpow2.f32 %v4281_v50 }
 0x809   :  { %5075 = vpow2.f32 %v4282_v47  ;;  %v5392_v47 = vmov 0.0  }
 0x80a   :  { %5077 = vtanh.f32 %v2690_v25  ;;  %v4859_v25 = vld [vmem:[#allocation16 + $0x18] ss:$12 sps:$4 sm:$0xff]  }
 0x811   :  { %v5072_v1 = vpop.eup %5071 }
 0x812   :  { %v5074_v54 = vpop.eup %5073  ;;  %v2695_v5 = vadd.f32 1.0, %v5072_v1 }
 0x813   :  { %v2701_v61 = vadd.f32 1.0, %v5074_v54  ;;  %v5076_v14 = vpop.eup %5075 }
 0x814   :  { %5079 = vrcp.f32 %v2695_v5  ;;  %v5078_v9 = vpop.eup %5077  ;;  %v2708_v46 = vadd.f32 1.0, %v5076_v14  ;;  %v4861_v5 = vld [vmem:[#allocation16 + $0x1c] ss:$12 sps:$4 sm:$0xff]  }
 0x815   :  { %5081 = vrcp.f32 %v2701_v61  ;;  %v4867_v61 = vld [vmem:[#allocation16 + $0x48] ss:$12 sps:$4 sm:$0xff]   ;;  %v4870_v14 = vld [vmem:[#allocation16 + $0x50] ss:$12 sps:$4 sm:$0xff]  }
 0x816   :  { %5083 = vrcp.f32 %v2708_v46  ;;  %v4878_v46 = vld [vmem:[#allocation16 + $0x80] ss:$12 sps:$4 sm:$0xff]  }
 0x81e   :  { %v5080_v30 = vpop.eup %5079 }
 0x81f   :  { %v5082_v22 = vpop.eup %5081  ;;  %v2712_v32 = vmul.f32 %v5080_v30, %v5078_v9  ;;  %v4873_v9 = vld [vmem:[#allocation16 + $0x64] ss:$12 sps:$4 sm:$0xff]   ;;  %v4874_v30 = vld [vmem:[#allocation16 + $0x68] ss:$12 sps:$4 sm:$0xff]  }
 0x820   :  { %v2711_v15 = vmul.f32 %v5082_v22, %v2432_v33  ;;  %v5084_v50 = vpop.eup %5083  ;;  %v4871_v33 = vld [vmem:[#allocation16 + $0x60] ss:$12 sps:$4 sm:$0xff]   ;;  %v4877_v22 = vld [vmem:[#allocation16 + $0x7c] ss:$12 sps:$4 sm:$0xff]  }
 0x822   :  { %v6374_v19 = vadd.f32 %v2712_v32, %v2711_v15  ;;  %v4875_v32 = vld [vmem:[#allocation16 + $0x78] ss:$12 sps:$4 sm:$0xff]   ;;  %v4881_v15 = vld [vmem:[#allocation16 + $0x94] ss:$12 sps:$4 sm:$0xff]  }
 0x824   :  { %5085 = vtanh.f32 %v6374_v19 }
 0x82e   :  { %v5086_v1 = vpop.eup %5085 }
 0x82f   :  { %v6377_v12 = vmul.f32 %v5086_v1, %v5084_v50  ;;  %v4882_v50 = vld [vmem:[#allocation16 + $0x98] ss:$12 sps:$4 sm:$0xff]  }
 0x830   :  { %v4885_v1 = vld [vmem:[#allocation16 + $0xac] ss:$12 sps:$4 sm:$0xff]  }
 0x831   :  { %v2726_v54 = vpack.c.bf16 %v6377_v12, %v6377_v12 }
 0x833   :  { %2760 = vmatmul.mubr.bf16.vlgmr.msra.gmra.mrb[52].mxu0 %v2726_v54  ;;  %2801 = vmatmul.mubr.bf16.vlgmr.msra.gmra.mrb[52].mxu1 %v2726_v54  ;;  %v4883_v54 = vld [vmem:[#allocation16 + $0xa8] ss:$12 sps:$4 sm:$0xff]  }
 0x834   :  { %2857 = vmatpush1.bf16.msra.mxu0 %v6183_v16  ;;  %2898 = vmatpush1.bf16.msra.mxu1 %v6185_v24 }
 0x835   :  { %2858 = vmatprep.subr.bf16.mxu0 %v6194_v63  ;;  %2899 = vmatprep.subr.bf16.mxu1 %v6196_v11 }
 0x836   :  { %2888 = vmatprep.mubr.bf16.mxu0 %v6613_v21  ;;  %2929 = vmatprep.mubr.bf16.mxu1 %v6613_v21 }
 0x838   :  { %2859 = vmatpush1.bf16.msra.mxu0 %v6200_v8  ;;  %2900 = vmatpush1.bf16.msra.mxu1 %v6202_v62 }
 0x839   :  { %2860 = vmatprep.subr.bf16.mxu0 %v6206_v17  ;;  %2901 = vmatprep.subr.bf16.mxu1 %v6208_v58 }
 0x83c   :  { %2861 = vmatpush1.bf16.msra.mxu0 %v6214_v35  ;;  %2902 = vmatpush1.bf16.msra.mxu1 %v6216_v18 }
 0x83d   :  { %2862 = vmatprep.subr.bf16.mxu0 %v6220_v10  ;;  %2903 = vmatprep.subr.bf16.mxu1 %v6222_v3 }
 0x840   :  { %2863 = vmatpush1.bf16.msra.mxu0 %v6226_v13  ;;  %2904 = vmatpush1.bf16.msra.mxu1 %v6228_v26 }
 0x841   :  { %2864 = vmatprep.subr.bf16.mxu0 %v6232_v36  ;;  %2905 = vmatprep.subr.bf16.mxu1 %v6234_v40 }
 0x844   :  { %2865 = vmatpush1.bf16.msra.mxu0 %v6240_v41  ;;  %2906 = vmatpush1.bf16.msra.mxu1 %v6242_v42 }
 0x845   :  { %2866 = vmatprep.subr.bf16.mxu0 %v6246_v43  ;;  %2907 = vmatprep.subr.bf16.mxu1 %v6248_v45 }
 0x848   :  { %2867 = vmatpush1.bf16.msra.mxu0 %v6252_v48  ;;  %2908 = vmatpush1.bf16.msra.mxu1 %v6254_v49 }
 0x849   :  { %2868 = vmatprep.subr.bf16.mxu0 %v6258_v51  ;;  %2909 = vmatprep.subr.bf16.mxu1 %v6260_v52 }
 0x84c   :  { %2869 = vmatpush1.bf16.msra.mxu0 %v6264_v53  ;;  %2910 = vmatpush1.bf16.msra.mxu1 %v6266_v55 }
 0x84d   :  { %2870 = vmatprep.subr.bf16.mxu0 %v6270_v31  ;;  %2911 = vmatprep.subr.bf16.mxu1 %v6272_v56 }
 0x850   :  { %2871 = vmatpush1.bf16.msra.mxu0 %v6276_v57  ;;  %2912 = vmatpush1.bf16.msra.mxu1 %v6278_v59 }
 0x851   :  { %4444 = vmatprep.subr.bf16.mxu1 %v5392_v47 }
 0x906   :  { %v2761_v16 = vpop.f32.mrb[52].mxu0  ;;  %v2802_v24 = vpop.f32.mrb[52].mxu1 }
 0x907   :  { %v2809_v63 = vadd.f32 %v2761_v16, %v6324_v23  ;;  %v2811_v11 = vadd.f32 %v2802_v24, %v6326_v37  ;;  %v2763_v8 = vpop.f32.mrb[53].mxu0  ;;  %v2804_v62 = vpop.f32.mrb[53].mxu1  ;;  %v4857_v37 = vld [vmem:[#allocation16 + $0x4] ss:$12 sps:$4 sm:$0xff]  }
 0x908   :  { %v2810_v17 = vadd.f32 %v2763_v8, %v6328_v27  ;;  %v2812_v58 = vadd.f32 %v2804_v62, %v6330_v28  ;;  %v2765_v35 = vpop.f32.mrb[54].mxu0  ;;  %v2806_v18 = vpop.f32.mrb[54].mxu1  ;;  %v4855_v27 = vld [vmem:[#allocation16] ss:$12 sps:$4 sm:$0xff]   ;;  %v4858_v28 = vld [vmem:[#allocation16 + $0x8] ss:$12 sps:$4 sm:$0xff]   ;;  %3139 = vmatprep.subr.bf16.mxu0 %v4857_v37  ;;  %v6640_v62 = vsel %vm5761_vm1, %v6334_v6, %v6332_v29 }
 0x909   :  { %v4283_v10 = vmul.f32 -1.442695, %v2809_v63  ;;  %v2766_v3 = vpop.f32.mrb[55].mxu0  ;;  %v2807_v13 = vpop.f32.mrb[55].mxu1  ;;  %v4886_v16 = vld [vmem:[#allocation16 + $0xb0] ss:$12 sps:$4 sm:$0xff]  }
 0x90a   :  { %v4284_v26 = vmul.f32 -1.442695, %v2810_v17  ;;  %v4285_v36 = vmul.f32 -1.442695, %v2812_v58  ;;  %v4889_v24 = vld [vmem:[#allocation16 + $0xc4] ss:$12 sps:$4 sm:$0xff]  }
 0x90b   :  { %5087 = vpow2.f32 %v4283_v10  ;;  %v6642_v10 = vld [vmem:[#allocation40_spill] sm:$0xff]  ;;  %v4918_v18 = vld [vmem:[#allocation16 + $0x170] ss:$12 sps:$4 sm:$0xff]  }
 0x90c   :  { %5089 = vpow2.f32 %v4284_v26  ;;  %v6643_v3 = vsel %vm5765_vm2, %v6340_v39, %v6642_v10  ;;  %v4921_v10 = vld [vmem:[#allocation16 + $0x184] ss:$12 sps:$4 sm:$0xff]   ;;  %v4922_v26 = vld [vmem:[#allocation16 + $0x188] ss:$12 sps:$4 sm:$0xff]  }
 0x90d   :  { %5091 = vpow2.f32 %v4285_v36  ;;  %v6645_v36 = vsel %vm5771_vm3, %v6342_v44, %v6338_v20 }
 0x90e   :  { %5093 = vtanh.f32 %v2811_v11 }
 0x915   :  { %v5088_v40 = vpop.eup %5087 }
 0x916   :  { %v5090_v41 = vpop.eup %5089  ;;  %v2816_v42 = vadd.f32 1.0, %v5088_v40 }
 0x917   :  { %v2822_v43 = vadd.f32 1.0, %v5090_v41  ;;  %v5092_v45 = vpop.eup %5091 }
 0x918   :  { %5095 = vrcp.f32 %v2816_v42  ;;  %v5094_v48 = vpop.eup %5093  ;;  %v2829_v53 = vadd.f32 1.0, %v5092_v45 }
 0x919   :  { %5097 = vrcp.f32 %v2822_v43 }
 0x91a   :  { %5099 = vrcp.f32 %v2829_v53 }
 0x922   :  { %v5096_v49 = vpop.eup %5095 }
 0x923   :  { %v5098_v51 = vpop.eup %5097  ;;  %v2833_v52 = vmul.f32 %v5096_v49, %v5094_v48 }
 0x924   :  { %v2832_v55 = vmul.f32 %v5098_v51, %v6374_v19  ;;  %v5100_v56 = vpop.eup %5099  ;;  %v4879_v19 = vld [vmem:[#allocation16 + $0x90] ss:$12 sps:$4 sm:$0xff]  }
 0x926   :  { %v6418_v31 = vadd.f32 %v2833_v52, %v2832_v55 }
 0x928   :  { %5101 = vtanh.f32 %v6418_v31 }
 0x932   :  { %v5102_v57 = vpop.eup %5101 }
 0x933   :  { %v6421_v59 = vmul.f32 %v5102_v57, %v5100_v56 }
 0x935   :  { %v2855_v23 = vpack.c.bf16 %v6421_v59, %v6421_v59 }
 0x937   :  { %2889 = vmatmul.mubr.bf16.vlgmr.msra.gmra.mrb[56].mxu0 %v2855_v23  ;;  %2930 = vmatmul.mubr.bf16.vlgmr.msra.gmra.mrb[56].mxu1 %v2855_v23 }
 0x938   :  { %3171 = vmatprep.mubr.bf16.mxu0 %v6613_v21  ;;  %3140 = vmatpush1.bf16.msra.mxu0 %v4855_v27 }
 0x939   :  { %4445 = vmatpush3.bf16.msra.mxu1 %v4858_v28  ;;  %3141 = vmatprep.subr.bf16.mxu0 %v4861_v5  ;;  %v6646_v28 = vld [vmem:[#allocation38_spill] sm:$0xff]  ;;  %v4954_v5 = vld [vmem:[#allocation17 + $0x88] sm:$0xff]  }
 0x93a   :  { %4446 = vmatprep.subr.bf16.mxu1 %v5392_v47  ;;  %4460 = vmatprep.mubr.msk.bf16.mxu1 %vm5393_vm5, %v5392_v47 }
 0x93c   :  { %3142 = vmatpush1.bf16.msra.mxu0 %v4859_v25  ;;  %v2717_v25 = vsel %vm203_vm0, %v6377_v12, %v6646_v28  ;;  %v4955_v28 = vld [vmem:[#allocation17 + $0x48] sm:$0xff]  }
 0x93d   :  { %4447 = vmatpush3.bf16.msra.mxu1 %v4862_v34  ;;  %3143 = vmatprep.subr.bf16.mxu0 %v4865_v60  ;;  %v6648_v34 = vld [vmem:[#allocation39_spill] sm:$0xff] }
 0x93e   :  { %4448 = vmatprep.subr.bf16.mxu1 %v5392_v47  ;;  %v2720_v60 = vsel %vm208_vm4, %v6377_v12, %v6648_v34  ;;  %v4897_v12 = vld [vmem:[#allocation16 + $0xf4] ss:$12 sps:$4 sm:$0xff]  }
 0x93f   :  { %v4958_v34 = vld [vmem:[#allocation17 + $0x50] sm:$0xff]  }
 0x940   :  { %3144 = vmatpush1.bf16.msra.mxu0 %v4863_v4  ;;  %v4887_v4 = vld [vmem:[#allocation16 + $0xc0] ss:$12 sps:$4 sm:$0xff]  }
 0x941   :  { %4449 = vmatpush3.bf16.msra.mxu1 %v4866_v38  ;;  %3145 = vmatprep.subr.bf16.mxu0 %v4869_v2  ;;  %v4890_v38 = vld [vmem:[#allocation16 + $0xc8] ss:$12 sps:$4 sm:$0xff]  }
 0x942   :  { %4450 = vmatprep.subr.bf16.mxu1 %v5392_v47 }
 0x944   :  { %3146 = vmatpush1.bf16.msra.mxu0 %v4867_v61 }
 0x945   :  { %4451 = vmatpush3.bf16.msra.mxu1 %v4870_v14  ;;  %3147 = vmatprep.subr.bf16.mxu0 %v4873_v9  ;;  %v4893_v14 = vld [vmem:[#allocation16 + $0xdc] ss:$12 sps:$4 sm:$0xff]   ;;  %v4891_v9 = vld [vmem:[#allocation16 + $0xd8] ss:$12 sps:$4 sm:$0xff]  }
 0x946   :  { %4452 = vmatprep.subr.bf16.mxu1 %v5392_v47 }
 0x948   :  { %3148 = vmatpush1.bf16.msra.mxu0 %v4871_v33  ;;  %v4894_v33 = vld [vmem:[#allocation16 + $0xe0] ss:$12 sps:$4 sm:$0xff]  }
 0x949   :  { %4453 = vmatpush3.bf16.msra.mxu1 %v4874_v30  ;;  %3149 = vmatprep.subr.bf16.mxu0 %v4877_v22  ;;  %v4895_v30 = vld [vmem:[#allocation16 + $0xf0] ss:$12 sps:$4 sm:$0xff]   ;;  %v4898_v22 = vld [vmem:[#allocation16 + $0xf8] ss:$12 sps:$4 sm:$0xff]  }
 0x94a   :  { %4454 = vmatprep.subr.bf16.mxu1 %v5392_v47 }
 0x94c   :  { %3150 = vmatpush1.bf16.msra.mxu0 %v4875_v32  ;;  %v4901_v32 = vld [vmem:[#allocation16 + $0x10c] ss:$12 sps:$4 sm:$0xff]  }
 0x94d   :  { %4455 = vmatpush3.bf16.msra.mxu1 %v4878_v46  ;;  %3151 = vmatprep.subr.bf16.mxu0 %v4881_v15  ;;  %v4899_v46 = vld [vmem:[#allocation16 + $0x108] ss:$12 sps:$4 sm:$0xff]   ;;  %v4902_v15 = vld [vmem:[#allocation16 + $0x110] ss:$12 sps:$4 sm:$0xff]  }
 0x94e   :  { %4456 = vmatprep.subr.bf16.mxu1 %v5392_v47 }
 0x950   :  { %3152 = vmatpush1.bf16.msra.mxu0 %v4879_v19  ;;  %v4905_v19 = vld [vmem:[#allocation16 + $0x124] ss:$12 sps:$4 sm:$0xff]  }
 0x951   :  { %4457 = vmatpush3.bf16.msra.mxu1 %v4882_v50  ;;  %3153 = vmatprep.subr.bf16.mxu0 %v4885_v1  ;;  %v4903_v50 = vld [vmem:[#allocation16 + $0x120] ss:$12 sps:$4 sm:$0xff]   ;;  %v4906_v1 = vld [vmem:[#allocation16 + $0x128] ss:$12 sps:$4 sm:$0xff]  }
 0x952   :  { %4458 = vmatprep.subr.bf16.mxu1 %v5392_v47 }
 0x954   :  { %3154 = vmatpush1.bf16.msra.mxu0 %v4883_v54  ;;  %v4909_v54 = vld [vmem:[#allocation16 + $0x13c] ss:$12 sps:$4 sm:$0xff]  }
 0x955   :  { %4459 = vmatpush3.bf16.msra.mxu1 %v4886_v16  ;;  %3402 = vmatprep.subr.bf16.mxu0 %v4889_v24  ;;  %v4907_v16 = vld [vmem:[#allocation16 + $0x138] ss:$12 sps:$4 sm:$0xff]   ;;  %v4910_v24 = vld [vmem:[#allocation16 + $0x140] ss:$12 sps:$4 sm:$0xff]  }
 0x956   :  { %4464 = vmatprep.subr.bf16.mxu1 %v5392_v47 }
 0xa0a   :  { %v2890_v63 = vpop.f32.mrb[56].mxu0  ;;  %v2931_v11 = vpop.f32.mrb[56].mxu1 }
 0xa0b   :  { %v2938_v8 = vadd.f32 %v2890_v63, %v6352_v0  ;;  %v2940_v17 = vadd.f32 %v2931_v11, %v6640_v62  ;;  %v2892_v58 = vpop.f32.mrb[57].mxu0  ;;  %v2933_v35 = vpop.f32.mrb[57].mxu1  ;;  %v4913_v63 = vld [vmem:[#allocation16 + $0x154] ss:$12 sps:$4 sm:$0xff]   ;;  %v4911_v11 = vld [vmem:[#allocation16 + $0x150] ss:$12 sps:$4 sm:$0xff]  }
 0xa0c   :  { %v2939_v13 = vadd.f32 %v2892_v58, %v6643_v3  ;;  %v2941_v0 = vadd.f32 %v2933_v35, %v6645_v36  ;;  %v2894_v40 = vpop.f32.mrb[58].mxu0  ;;  %v2935_v7 = vpop.f32.mrb[58].mxu1  ;;  %v4917_v62 = vld [vmem:[#allocation16 + $0x16c] ss:$12 sps:$4 sm:$0xff]   ;;  %v4915_v35 = vld [vmem:[#allocation16 + $0x168] ss:$12 sps:$4 sm:$0xff]  }
 0xa0d   :  { %v4286_v41 = vmul.f32 -1.442695, %v2938_v8  ;;  %v2895_v42 = vpop.f32.mrb[59].mxu0  ;;  %v2936_v29 = vpop.f32.mrb[59].mxu1  ;;  %v4914_v8 = vld [vmem:[#allocation16 + $0x158] ss:$12 sps:$4 sm:$0xff]  }
 0xa0e   :  { %v4287_v6 = vmul.f32 -1.442695, %v2939_v13  ;;  %v4288_v43 = vmul.f32 -1.442695, %v2941_v0  ;;  %v4919_v13 = vld [vmem:[#allocation16 + $0x180] ss:$12 sps:$4 sm:$0xff]  }
 0xa0f   :  { %5103 = vpow2.f32 %v4286_v41  ;;  %v4925_v0 = vld [vmem:[#allocation16 + $0x19c] ss:$12 sps:$4 sm:$0xff]   ;;  %v4923_v40 = vld [vmem:[#allocation16 + $0x198] ss:$12 sps:$4 sm:$0xff]   ;;  %v4926_v7 = vld [vmem:[#allocation16 + $0x1a0] ss:$12 sps:$4 sm:$0xff]  }
 0xa10   :  { %5105 = vpow2.f32 %v4287_v6  ;;  %v4929_v41 = vld [vmem:[#allocation16 + $0x1b4] ss:$12 sps:$4 sm:$0xff]   ;;  %v4930_v42 = vld [vmem:[#allocation16 + $0x1b8] ss:$12 sps:$4 sm:$0xff]  }
 0xa11   :  { %5107 = vpow2.f32 %v4288_v43  ;;  %v4933_v29 = vld [vmem:[#allocation16 + $0x1cc] ss:$12 sps:$4 sm:$0xff]   ;;  %v4931_v6 = vld [vmem:[#allocation16 + $0x1c8] ss:$12 sps:$4 sm:$0xff]   ;;  %v4934_v43 = vld [vmem:[#allocation16 + $0x1d0] ss:$12 sps:$4 sm:$0xff]  }
 0xa12   :  { %5109 = vtanh.f32 %v2940_v17  ;;  %v6649_v17 = vld [vmem:[#allocation37_spill] sm:$0xff] }
 0xa13   :  { %v2838_v58 = vsel %vm203_vm0, %v6421_v59, %v6649_v17 }
 0xa14   :  { %v2841_v3 = vsel %vm208_vm4, %v6421_v59, %v2838_v58  ;;  %v4927_v59 = vld [vmem:[#allocation16 + $0x1b0] ss:$12 sps:$4 sm:$0xff]  }
 0xa15   :  { %v3240_v36 = vpack.c.bf16 %v2841_v3, %v2841_v3 }
 0xa19   :  { %v5104_v45 = vpop.eup %5103 }
 0xa1a   :  { %v5106_v48 = vpop.eup %5105  ;;  %v2945_v49 = vadd.f32 1.0, %v5104_v45  ;;  %v4937_v45 = vld [vmem:[#allocation16 + $0x1e4] ss:$12 sps:$4 sm:$0xff]  }
 0xa1b   :  { %v2951_v39 = vadd.f32 1.0, %v5106_v48  ;;  %v5108_v51 = vpop.eup %5107  ;;  %v4938_v48 = vld [vmem:[#allocation16 + $0x1e8] ss:$12 sps:$4 sm:$0xff]  }
 0xa1c   :  { %5111 = vrcp.f32 %v2945_v49  ;;  %v5110_v20 = vpop.eup %5109  ;;  %v2958_v55 = vadd.f32 1.0, %v5108_v51  ;;  %v4941_v49 = vld [vmem:[#allocation16 + $0x1fc] ss:$12 sps:$4 sm:$0xff]   ;;  %v4942_v51 = vld [vmem:[#allocation16 + $0x200] ss:$12 sps:$4 sm:$0xff]  }
 0xa1d   :  { %5113 = vrcp.f32 %v2951_v39  ;;  %v4939_v39 = vld [vmem:[#allocation16 + $0x1f8] ss:$12 sps:$4 sm:$0xff]  }
 0xa1e   :  { %5115 = vrcp.f32 %v2958_v55  ;;  %v4947_v55 = vld [vmem:[#allocation16 + $0x228] ss:$12 sps:$4 sm:$0xff]  }
 0xa26   :  { %v5112_v44 = vpop.eup %5111 }
 0xa27   :  { %v5114_v52 = vpop.eup %5113  ;;  %v2962_v53 = vmul.f32 %v5112_v44, %v5110_v20  ;;  %v4945_v20 = vld [vmem:[#allocation16 + $0x214] ss:$12 sps:$4 sm:$0xff]   ;;  %v4943_v44 = vld [vmem:[#allocation16 + $0x210] ss:$12 sps:$4 sm:$0xff]  }
 0xa28   :  { %v2961_v56 = vmul.f32 %v5114_v52, %v6418_v31  ;;  %v5116_v23 = vpop.eup %5115  ;;  %v4946_v52 = vld [vmem:[#allocation16 + $0x218] ss:$12 sps:$4 sm:$0xff]  }
 0xa2a   :  { %v2963_v57 = vadd.f32 %v2962_v53, %v2961_v56  ;;  %v4949_v53 = vld [vmem:[#allocation16 + $0x22c] ss:$12 sps:$4 sm:$0xff]   ;;  %v4950_v56 = vld [vmem:[#allocation16 + $0x230] ss:$12 sps:$4 sm:$0xff]  }
 0xa2c   :  { %5117 = vtanh.f32 %v2963_v57  ;;  %2975 = vst [vmem:[#allocation22 + $0x10] sm:$0xff] %v2963_v57  ;;  %v4952_v57 = vld [vmem:[#allocation17 + $0x40] sm:$0xff]  }
 0xa36   :  { %v5118_v37 = vpop.eup %5117 }
 0xa37   :  { %v2965_v27 = vmul.f32 %v5118_v37, %v5116_v23  ;;  %v4951_v23 = vld [vmem:[#allocation17 + $0x80] sm:$0xff]  }
 0xa38   :  { %v4953_v37 = vld [vmem:[#allocation17] sm:$0xff]  }
 0xa39   :  { %v2970_v31 = vsel %vm208_vm4, %v2965_v27, %v2717_v25  ;;  %2973 = vst [vmem:[#allocation20 + $0x10] sm:$0xff] %v2965_v27  ;;  %v6466_v2 = vsel %vm203_vm0, %v2965_v27, %v2720_v60  ;;  %v4956_v25 = vld [vmem:[#allocation17 + $0x8] sm:$0xff]   ;;  %v4957_v60 = vld [vmem:[#allocation17 + $0x90] sm:$0xff]  }
 0xa3a   :  { %v2978_v61 = vpack.c.bf16 %v2970_v31, %v2970_v31  ;;  %v3487_v27 = vpack.c.bf16 %v6466_v2, %v6466_v2  ;;  %v4961_v31 = vld [vmem:[#allocation17 + $0x58] sm:$0xff]  }
 0xa3b   :  { %v4962_v2 = vld [vmem:[#allocation17 + $0x18] sm:$0xff]  }
 0xa3c   :  { %3172 = vmatmul.mubr.bf16.vlgmr.msra.gmra.mrb[60].mxu0 %v2978_v61  ;;  %4461 = vmatmul.mubr.bf16.vlgmr.msra.gmra.mrb[60].mxu1 %v2978_v61  ;;  %v4964_v61 = vld [vmem:[#allocation17 + $0x60] sm:$0xff]  }
 0xa3d   :  { %3403 = vmatpush1.bf16.msra.mxu0 %v4887_v4  ;;  %4465 = vmatpush3.bf16.msra.mxu1 %v4890_v38  ;;  %v4959_v4 = vld [vmem:[#allocation17 + $0x10] sm:$0xff]   ;;  %v4960_v38 = vld [vmem:[#allocation17 + $0x98] sm:$0xff]  }
 0xa3e   :  { %3404 = vmatprep.subr.bf16.mxu0 %v4893_v14  ;;  %4466 = vmatprep.subr.bf16.mxu1 %v5392_v47  ;;  %v4963_v14 = vld [vmem:[#allocation17 + $0xa0] sm:$0xff]  }
 0xa3f   :  { %3434 = vmatprep.mubr.bf16.mxu0 %v6613_v21  ;;  %4480 = vmatprep.mubr.msk.bf16.mxu1 %vm5393_vm5, %v5392_v47 }
 0xa41   :  { %3405 = vmatpush1.bf16.msra.mxu0 %v4891_v9  ;;  %4467 = vmatpush3.bf16.msra.mxu1 %v4894_v33  ;;  %v4965_v9 = vld [vmem:[#allocation17 + $0x20] sm:$0xff]   ;;  %v4967_v33 = vld [vmem:[#allocation17 + $0x68] sm:$0xff]  }
 0xa42   :  { %3406 = vmatprep.subr.bf16.mxu0 %v4897_v12  ;;  %4468 = vmatprep.subr.bf16.mxu1 %v5392_v47  ;;  %v4966_v12 = vld [vmem:[#allocation17 + $0xa8] sm:$0xff]  }
 0xa45   :  { %3407 = vmatpush1.bf16.msra.mxu0 %v4895_v30  ;;  %4469 = vmatpush3.bf16.msra.mxu1 %v4898_v22  ;;  %v4968_v30 = vld [vmem:[#allocation17 + $0x28] sm:$0xff]   ;;  %v4970_v22 = vld [vmem:[#allocation17 + $0x70] sm:$0xff]  }
 0xa46   :  { %3408 = vmatprep.subr.bf16.mxu0 %v4901_v32  ;;  %4470 = vmatprep.subr.bf16.mxu1 %v5392_v47  ;;  %v4969_v32 = vld [vmem:[#allocation17 + $0xb0] sm:$0xff]  }
 0xa49   :  { %3409 = vmatpush1.bf16.msra.mxu0 %v4899_v46  ;;  %4471 = vmatpush3.bf16.msra.mxu1 %v4902_v15  ;;  %v4971_v46 = vld [vmem:[#allocation17 + $0x30] sm:$0xff]   ;;  %v4972_v15 = vld [vmem:[#allocation17 + $0xb8] sm:$0xff]  }
 0xa4a   :  { %3410 = vmatprep.subr.bf16.mxu0 %v4905_v19  ;;  %4472 = vmatprep.subr.bf16.mxu1 %v5392_v47  ;;  %v4973_v19 = vld [vmem:[#allocation17 + $0x78] sm:$0xff]  }
 0xa4d   :  { %3411 = vmatpush1.bf16.msra.mxu0 %v4903_v50  ;;  %4473 = vmatpush3.bf16.msra.mxu1 %v4906_v1  ;;  %v4974_v50 = vld [vmem:[#allocation17 + $0x38] sm:$0xff]  }
 0xa4e   :  { %3412 = vmatprep.subr.bf16.mxu0 %v4909_v54  ;;  %4474 = vmatprep.subr.bf16.mxu1 %v5392_v47  ;;  %v2976_v1 = vld [vmem:[%s6566_s7] sm:$0x7]  ;;  %s5394_s7 = smov [#allocation20]  }
 0xa4f   :  { %v6650_v54 = vld [vmem:[#allocation30_spill] sm:$0xff]  ;;  %s4031_s22 = sshll.u32 %s5394_s7, 4  ;;  %s4032_s22 = int_to_ptr.vmem [resolvable:$true] %s4031_s22 }
 0xa50   :  { %s5295_s0 = scalar_lea.vmem %s4032_s22, 384  ;;  %p5300_p9 = scmp.lt.s32.totalorder %s4032_s22, %s4032_s22 }
 0xa51   :  { %3413 = vmatpush1.bf16.msra.mxu0 %v4907_v16  ;;  %4475 = vmatpush3.bf16.msra.mxu1 %v4910_v24  ;;  %v3224_v16 = vrot.slane %v2976_v1, %v6650_v54  ;;  %v6651_v24 = vld [vmem:[#allocation31_spill] sm:$0xff]  ;;  %p5296_p8 = scmp.ne.s32.totalorder %s4032_s22, %s5295_s0  ;;  %p5301_p10 = scmp.lt.s32.totalorder %s5295_s0, %s5295_s0 }
 0xa52   :  { %3414 = vmatprep.subr.bf16.mxu0 %v4913_v63  ;;  %4476 = vmatprep.subr.bf16.mxu1 %v5392_v47  ;;  %v3232_v63 = vrot.slane %v2976_v1, %v6651_v24 }
 0xa53   :  { %p5302_p11 = por %p5301_p10, %p5300_p9 }
 0xa55   :  { %3415 = vmatpush1.bf16.msra.mxu0 %v4911_v11  ;;  %4477 = vmatpush3.bf16.msra.mxu1 %v4914_v8  ;;  %v6652_v11 = vld [vmem:[#allocation34_spill] sm:$0xff]  ;;  %p5303_p12 = pnand %p5302_p11, %p5296_p8 }
 0xa56   :  { %3416 = vmatprep.subr.bf16.mxu0 %v4917_v62  ;;  %4478 = vmatprep.subr.bf16.mxu1 %v5392_v47  ;;  %v3228_v8 = vrot.slane %v2976_v1, %v6652_v11 }
 0xa59   :  { %3417 = vmatpush1.bf16.msra.mxu0 %v4915_v35  ;;  %4479 = vmatpush3.bf16.msra.mxu1 %v4918_v18 }
 0xa5a   :  { %3649 = vmatprep.subr.bf16.mxu0 %v4921_v10  ;;  %4484 = vmatprep.subr.bf16.mxu1 %v5392_v47 }
 0xa5c   :  { %3435 = vmatmul.mubr.bf16.vlgmr.msra.gmra.mrb[60].mxu0 %v3240_v36  ;;  %4481 = vmatmul.mubr.bf16.vlgmr.msra.gmra.mrb[60].mxu1 %v3240_v36 }
 0xa5d   :  { %3650 = vmatpush1.bf16.msra.mxu0 %v4919_v13  ;;  %4485 = vmatpush3.bf16.msra.mxu1 %v4922_v26 }
 0xa5e   :  { %3651 = vmatprep.subr.bf16.mxu0 %v4925_v0  ;;  %4486 = vmatprep.subr.bf16.mxu1 %v5392_v47 }
 0xa5f   :  { %3681 = vmatprep.mubr.bf16.mxu0 %v6613_v21  ;;  %4500 = vmatprep.mubr.msk.bf16.mxu1 %vm5393_vm5, %v5392_v47  ;;  %v4935_v21 = vld [vmem:[#allocation16 + $0x1e0] ss:$12 sps:$4 sm:$0xff]  }
 0xa61   :  { %3652 = vmatpush1.bf16.msra.mxu0 %v4923_v40  ;;  %4487 = vmatpush3.bf16.msra.mxu1 %v4926_v7 }
 0xa62   :  { %3653 = vmatprep.subr.bf16.mxu0 %v4929_v41  ;;  %4488 = vmatprep.subr.bf16.mxu1 %v5392_v47 }
 0xa65   :  { %3654 = vmatpush1.bf16.msra.mxu0 %v4927_v59  ;;  %4489 = vmatpush3.bf16.msra.mxu1 %v4930_v42 }
 0xa66   :  { %3655 = vmatprep.subr.bf16.mxu0 %v4933_v29  ;;  %4490 = vmatprep.subr.bf16.mxu1 %v5392_v47 }
 0xa69   :  { %3656 = vmatpush1.bf16.msra.mxu0 %v4931_v6  ;;  %4491 = vmatpush3.bf16.msra.mxu1 %v4934_v43 }
 0xa6a   :  { %3657 = vmatprep.subr.bf16.mxu0 %v4937_v45  ;;  %4492 = vmatprep.subr.bf16.mxu1 %v5392_v47 }
 0xa6d   :  { %3658 = vmatpush1.bf16.msra.mxu0 %v4935_v21  ;;  %4493 = vmatpush3.bf16.msra.mxu1 %v4938_v48 }
 0xa6e   :  { %3659 = vmatprep.subr.bf16.mxu0 %v4941_v49  ;;  %4494 = vmatprep.subr.bf16.mxu1 %v5392_v47 }
 0xa71   :  { %3660 = vmatpush1.bf16.msra.mxu0 %v4939_v39  ;;  %4495 = vmatpush3.bf16.msra.mxu1 %v4942_v51 }
 0xa72   :  { %3661 = vmatprep.subr.bf16.mxu0 %v4945_v20  ;;  %4496 = vmatprep.subr.bf16.mxu1 %v5392_v47 }
 0xa75   :  { %3662 = vmatpush1.bf16.msra.mxu0 %v4943_v44  ;;  %4497 = vmatpush3.bf16.msra.mxu1 %v4946_v52 }
 0xa76   :  { %3663 = vmatprep.subr.bf16.mxu0 %v4949_v53  ;;  %4498 = vmatprep.subr.bf16.mxu1 %v5392_v47 }
 0xa79   :  { %3664 = vmatpush1.bf16.msra.mxu0 %v4947_v55  ;;  %4499 = vmatpush3.bf16.msra.mxu1 %v4950_v56 }
 0xa7a   :  { %4504 = vmatprep.subr.bf16.mxu1 %v5392_v47  ;;  %4413 = vmatprep.subr.bf16.mxu0 %v4952_v57 }
 0xa7c   :  { %3682 = vmatmul.mubr.bf16.vlgmr.msra.gmra.mrb[60].mxu0 %v3487_v27  ;;  %4501 = vmatmul.mubr.bf16.vlgmr.msra.gmra.mrb[60].mxu1 %v3487_v27 }
 0xa7d   :  { %4505 = vmatpush3.bf16.msra.mxu1 %v4951_v23  ;;  %4414 = vmatpush3.bf16.msra.mxu0 %v4953_v37 }
 0xa7e   :  { %4506 = vmatprep.subr.bf16.mxu1 %v5392_v47  ;;  %4415 = vmatprep.subr.bf16.mxu0 %v4955_v28 }
 0xa7f   :  { %4520 = vmatprep.mubr.msk.bf16.mxu1 %vm5393_vm5, %v5392_v47 }
 0xa81   :  { %4507 = vmatpush3.bf16.msra.mxu1 %v4954_v5  ;;  %4416 = vmatpush3.bf16.msra.mxu0 %v4956_v25 }
 0xa82   :  { %4508 = vmatprep.subr.bf16.mxu1 %v5392_v47  ;;  %4417 = vmatprep.subr.bf16.mxu0 %v4958_v34 }
 0xa85   :  { %4509 = vmatpush3.bf16.msra.mxu1 %v4957_v60  ;;  %4418 = vmatpush3.bf16.msra.mxu0 %v4959_v4 }
 0xa86   :  { %4510 = vmatprep.subr.bf16.mxu1 %v5392_v47  ;;  %4419 = vmatprep.subr.bf16.mxu0 %v4961_v31 }
 0xa89   :  { %4511 = vmatpush3.bf16.msra.mxu1 %v4960_v38  ;;  %4420 = vmatpush3.bf16.msra.mxu0 %v4962_v2 }
 0xa8a   :  { %4512 = vmatprep.subr.bf16.mxu1 %v5392_v47  ;;  %4421 = vmatprep.subr.bf16.mxu0 %v4964_v61 }
 0xa8d   :  { %4513 = vmatpush3.bf16.msra.mxu1 %v4963_v14  ;;  %4422 = vmatpush3.bf16.msra.mxu0 %v4965_v9 }
 0xa8e   :  { %4514 = vmatprep.subr.bf16.mxu1 %v5392_v47  ;;  %4423 = vmatprep.subr.bf16.mxu0 %v4967_v33 }
 0xa91   :  { %4515 = vmatpush3.bf16.msra.mxu1 %v4966_v12  ;;  %4424 = vmatpush3.bf16.msra.mxu0 %v4968_v30 }
 0xa92   :  { %4516 = vmatprep.subr.bf16.mxu1 %v5392_v47  ;;  %4425 = vmatprep.subr.bf16.mxu0 %v4970_v22 }
 0xa95   :  { %4517 = vmatpush3.bf16.msra.mxu1 %v4969_v32  ;;  %4426 = vmatpush3.bf16.msra.mxu0 %v4971_v46 }
 0xa96   :  { %4518 = vmatprep.subr.bf16.mxu1 %v5392_v47  ;;  %4427 = vmatprep.subr.bf16.mxu0 %v4973_v19 }
 0xa99   :  { %4519 = vmatpush3.bf16.msra.mxu1 %v4972_v15  ;;  %4428 = vmatpush3.bf16.msra.mxu0 %v4974_v50 }
 0xb4f   :  { %v3683_v62 = vpop.f32.mrb[60].mxu0  ;;  %v3724_v47 = vpop.f32.mrb[60].mxu1 }
 0xb50   :  { %v4524_v17 = vadd.f32 %v3683_v62, %v3224_v16  ;;  %v4526_v58 = vadd.f32 %v3724_v47, %v3232_v63  ;;  %v3685_v35 = vpop.f32.mrb[61].mxu0  ;;  %v4502_v18 = vpop.f32.mrb[61].mxu1 }
 0xb51   :  { %v4525_v10 = vadd.f32 %v3685_v35, %v3228_v8  ;;  %v3687_v3 = vpop.f32.mrb[62].mxu0  ;;  %v3727_v13 = vpop.f32.mrb[62].mxu1 }
 0xb52   :  { %v3735_v26 = vpack.c.bf16 %v4526_v58, %v4526_v58  ;;  %v3688_v36 = vpop.f32.mrb[63].mxu0  ;;  %v4503_v0 = vpop.f32.mrb[63].mxu1  ;;  %v3733_v7 = vpack.c.bf16 %v4524_v17, %v4524_v17 }
 0xb53   :  { %v3734_v40 = vpack.c.bf16 %v4525_v10, %v4525_v10 }
 0xb54   :  { %4521 = vmatmul.mubr.bf16.vlgmr.msra.gmra.mrb[64].mxu1 %v3735_v26 }
 0xb55   :  { %3967 = vmatprep.mubr.bf16.mxu0 %v3734_v40 }
 0xb56   :  { %3968 = vmatmul.mubr.bf16.vlgmr.msra.gmra.mrb[64].mxu0 %v3733_v7 }
 0xb57   :  { %5306 = shalt.err (!%p5303_p12)
}
 0xb58   :  { %s5307_s5 = scalar_lea.hbm %s6570_s11, 384 }
 0xb59   :  { %p5308_p13 = scmp.ne.s32.totalorder %s6570_s11, %s5307_s5  ;;  %p5311_p0 = scmp.lt.u32.totalorder %s5307_s5, %s6570_s11 }
 0xb5b   :  { %p5313_p1 = pnand %p5311_p0, %p5308_p13 }
 0xb5d   :  { %5316 = shalt.err (!%p5313_p1)
}
 0xb5e   :  { %4037 = dma.vmem_to_hbm [thread:$0]  %s4032_s22, 384, %s6570_s11, [#allocation21], %s5383_s18, %s5383_s18, %s5384_s27  }
 0xb5f   :  { %s5395_s16 = smov [#allocation22]  }
 0xb60   :  { %s4043_s19 = sshll.u32 %s5395_s16, 4  ;;  %s4044_s19 = int_to_ptr.vmem [resolvable:$true] %s4043_s19 }
 0xb61   :  { %s5317_s20 = scalar_lea.vmem %s4044_s19, 384  ;;  %p5322_p3 = scmp.lt.s32.totalorder %s4044_s19, %s4044_s19 }
 0xb62   :  { %p5318_p2 = scmp.ne.s32.totalorder %s4044_s19, %s5317_s20  ;;  %p5323_p4 = scmp.lt.s32.totalorder %s5317_s20, %s5317_s20 }
 0xb64   :  { %p5324_p5 = por %p5323_p4, %p5322_p3 }
 0xb66   :  { %p5325_p6 = pnand %p5324_p5, %p5318_p2 }
 0xb68   :  { %5328 = shalt.err (!%p5325_p6)
}
 0xb69   :  { %s5329_s14 = scalar_lea.hbm %s6571_s12, 384 }
 0xb6a   :  { %p5330_p7 = scmp.ne.s32.totalorder %s6571_s12, %s5329_s14  ;;  %p5333_p8 = scmp.lt.u32.totalorder %s5329_s14, %s6571_s12 }
 0xb6c   :  { %p5335_p9 = pnand %p5333_p8, %p5330_p7 }
 0xb6e   :  { %5338 = shalt.err (!%p5335_p9)
}
 0xb6f   :  { %4049 = dma.vmem_to_hbm [thread:$0]  %s4044_s19, 384, %s6571_s12, [#allocation21], %s5383_s18, %s5383_s18, %s5384_s27  }
 0xb70   :  { %v4361_v6 = vld [vmem:[%s6568_s9] ss:$0 sm:$0xff]  ;;  %s5396_s7 = smov [#allocation19]  }
 0xb71   :  { %s4022_s22 = sshll.u32 %s5396_s7, 4  ;;  %s4023_s22 = int_to_ptr.vmem [resolvable:$true] %s4022_s22 }
 0xb72   :  { %s5339_s12 = scalar_lea.vmem %s4023_s22, 128  ;;  %p5344_p11 = scmp.lt.s32.totalorder %s4023_s22, %s4023_s22 }
 0xb73   :  { %p5340_p10 = scmp.ne.s32.totalorder %s4023_s22, %s5339_s12  ;;  %p5345_p12 = scmp.lt.s32.totalorder %s5339_s12, %s5339_s12 }
 0xb75   :  { %p5346_p13 = por %p5345_p12, %p5344_p11 }
 0xb77   :  { %p5347_p0 = pnand %p5346_p13, %p5340_p10 }
 0xc27   :  { %v4009_v41 = vpop.f32.mrb[64].mxu1 }
 0xc28   :  { %v4522_v59 = vpop.f32.mrb[65].mxu1 }
 0xc29   :  { %v4429_v42 = vpop.f32.mrb[64].mxu0  ;;  %v4012_v29 = vpop.f32.mrb[66].mxu1 }
 0xc2a   :  { %v4430_v43 = vpop.f32.mrb[65].mxu0  ;;  %v4523_v45 = vpop.f32.mrb[67].mxu1 }
 0xc2b   :  { %v4431_v21 = vadd.f32 %v4430_v43, %v4429_v42  ;;  %v4432_v48 = vpop.f32.mrb[66].mxu0 }
 0xc2c   :  { %v4433_v49 = vpop.f32.mrb[67].mxu0 }
 0xc2d   :  { %v3970_v39 = vadd.f32 %v4431_v21, %v4361_v6 }
 0xc2f   :  { %v4010_v51 = vadd.f32 %v4009_v41, %v3970_v39 }
 0xc31   :  { %4015 = vst [vmem:[#allocation19] sm:$0xff] %v4010_v51 }
 0xc32   :  { %5350 = shalt.err (!%p5347_p0)
}
 0xc33   :  { %s5351_s27 = scalar_lea.hbm %s6569_s10, 128 }
 0xc34   :  { %p5352_p1 = scmp.ne.s32.totalorder %s6569_s10, %s5351_s27  ;;  %p5355_p2 = scmp.lt.u32.totalorder %s5351_s27, %s6569_s10 }
 0xc36   :  { %p5357_p3 = pnand %p5355_p2, %p5352_p1 }
 0xc38   :  { %5360 = shalt.err (!%p5357_p3)
}
 0xc39   :  { %4025 = dma.vmem_to_hbm [thread:$0]  %s4023_s22, 128, %s6569_s10, [#allocation7]  }
 0xc3a   :  { %5371 = dma.done.wait [#allocation7], 128  }
 0xc3b   :  { %5372 = vsyncadd [#allocation7], 4294967168 }
 0xc3c   :  { %5373 = dma.done.wait [#allocation21], 768  }
 0xc3d   :  { %5374 = vsyncadd [#allocation21], 4294966528 }
 0xc3e   :  { %4059 = vsyncpa [#allocation6], 1 }
 0xc3f   :  { %4060 = vsyncpa [#allocation9], 1 }
 0xc40   :  { %4061 = vsyncpa [#allocation12], 1 }
 0xc41   :  { %4062 = vsyncpa [#allocation15], 1 }
 0xc42   :  { %4063 = vsyncpa [#allocation18], 1 }
 0xc43   :  { %4064 = vsyncpa [#allocation7], 1 }
 0xc44   :  { %4065 = vsyncpa [#allocation21], 1 }

</bundles_post_ra>
